<compile_context>
chip_gen: v7x
topology: tpu7x:2x2x1
jax: 0.10.0
libtpu: 0.0.40
codegen_flags: <defaults>
</compile_context>

<pallas_src>
import functools

import jax
import jax.numpy as jnp
from jax import lax
from jax.experimental import pallas as pl
from jax.experimental.pallas import tpu as pltpu

K_NEAREST = 5
EPS = 1e-7
_LANE = 128
_KC = 8                      # carried top-k rows (5 used, padded to a sublane group)
_PAD_SENTINEL = 1e18         # padded queries sit ~2e36 away -> never in the top-5


def _round_up(x, m):
    return (x + m - 1) // m * m


def _vmem_capacity_bytes():
    try:
        info = pltpu.get_tpu_info()
        cap = getattr(info, "vmem_capacity_bytes", None)
        if cap:
            return int(cap)
    except Exception:
        pass
    return 64 * 1024 * 1024          # conservative default (v7x-sized VMEM)


def _num_tensorcores():
    try:
        dev = jax.local_devices()[0]
        for attr in ("num_cores", "core_count", "num_tensorcores"):
            v = getattr(dev, attr, None)
            if isinstance(v, int) and v > 0:
                return v
    except Exception:
        pass
    return 1


def _project_color_kernel(coords_ref, colors_ref, out_ref,
                          dtop_ref, rtop_ref, gtop_ref, btop_ref,
                          *, tp, width, nc):
    # coords_ref: (1, nc, 2)  projected query (x, y); queries on sublanes
    # colors_ref: (1, 3, nc)  query colors, channel-major (matmul LHS)
    # out_ref   : (1, 3, tp)  averaged top-5 colors, channel-major, lane-dense
    # *_top refs: (8, tp)     running top-5 carry across the N-chunk grid axis
    n = pl.program_id(2)
    n_last = pl.num_programs(2) - 1

    # ---- init the running top-5 at the first chunk of every (b, p) tile
    @pl.when(n == 0)
    def _():
        dtop_ref[...] = jnp.full((_KC, tp), jnp.inf, jnp.float32)
        rtop_ref[...] = jnp.zeros((_KC, tp), jnp.float32)
        gtop_ref[...] = jnp.zeros((_KC, tp), jnp.float32)
        btop_ref[...] = jnp.zeros((_KC, tp), jnp.float32)

    # ---- pixel coordinates for this tile, generated in-kernel ([1, tp] rows)
    lin = (pl.program_id(1) * tp
           + lax.broadcasted_iota(jnp.int32, (1, tp), 1)).astype(jnp.float32)
    w_f = float(width)
    # exact f32 floor-division (valid while H*W < 2^24), one-step fixup
    py = jnp.floor(lin / w_f)
    py = py - (py * w_f > lin).astype(jnp.float32)
    py = py + ((py + 1.0) * w_f <= lin).astype(jnp.float32)
    px = lin - py * w_f                                       # [1, tp]

    coords = coords_ref[0]                                    # [nc, 2]
    qx = coords[:, 0:1]                                       # [nc, 1]
    qy = coords[:, 1:2]
    cols = colors_ref[0]                                      # [3, nc]

    # ---- squared distances; queries on sublanes / pixels on lanes (VPU)
    dx = px - qx                                              # [nc, tp]
    dy = py - qy
    d_chunk = dx * dx + dy * dy                               # [nc, tp]

    d_old = dtop_ref[...]                                     # [8, tp]
    r_old = rtop_ref[...]
    g_old = gtop_ref[...]
    b_old = btop_ref[...]

    big = _KC + nc                                            # "no match" index

    # ---- merge carry (8 candidate rows) with the chunk (nc rows) into a fresh
    #      top-5.  Carried rows get the smallest combined indices, preserving
    #      global first-occurrence tie-break order.
    def body(kk, carry):
        d_c, d_q, nd, nr, ng, nb = carry
        row_c = lax.broadcasted_iota(jnp.int32, (_KC, tp), 0)            # 0..7
        row_q = lax.broadcasted_iota(jnp.int32, (nc, tp), 0) + _KC       # 8..
        m_c = jnp.min(d_c, axis=0, keepdims=True)                        # [1, tp]
        m_q = jnp.min(d_q, axis=0, keepdims=True)
        minv = jnp.minimum(m_c, m_q)
        idx_c = jnp.min(jnp.where(d_c == minv, row_c, big),
                        axis=0, keepdims=True)
        idx_q = jnp.min(jnp.where(d_q == minv, row_q, big),
                        axis=0, keepdims=True)
        idx = jnp.minimum(idx_c, idx_q)                                  # [1, tp]
        sel_c = row_c == idx                                             # [8, tp]
        sel_q = row_q == idx                                             # [nc, tp]
        # color of the selected candidate: chunk part via a tiny MXU matmul
        # (no transposed operands), carry part via an 8-deep masked sum.
        sel_qf = sel_q.astype(jnp.float32)
        col_q = lax.dot_general(cols, sel_qf, (((1,), (0,)), ((), ())),
                                preferred_element_type=jnp.float32)      # [3, tp]
        sel_cf = sel_c.astype(jnp.float32)
        col_r = col_q[0:1] + jnp.sum(r_old * sel_cf, axis=0, keepdims=True)
        col_g = col_q[1:2] + jnp.sum(g_old * sel_cf, axis=0, keepdims=True)
        col_b = col_q[2:3] + jnp.sum(b_old * sel_cf, axis=0, keepdims=True)
        slot = row_c == kk                                               # [8, tp]
        nd = jnp.where(slot, minv, nd)
        nr = jnp.where(slot, col_r, nr)
        ng = jnp.where(slot, col_g, ng)
        nb = jnp.where(slot, col_b, nb)
        # remove the selected candidate from its source
        d_c = jnp.where(sel_c, jnp.inf, d_c)
        d_q = jnp.where(sel_q, jnp.inf, d_q)
        return d_c, d_q, nd, nr, ng, nb

    init = (d_old, d_chunk,
            jnp.full((_KC, tp), jnp.inf, jnp.float32),
            jnp.zeros((_KC, tp), jnp.float32),
            jnp.zeros((_KC, tp), jnp.float32),
            jnp.zeros((_KC, tp), jnp.float32))
    _, _, nd, nr, ng, nb = lax.fori_loop(0, K_NEAREST, body, init, unroll=True)

    # ---- persist the merged top-5 for the next chunk
    @pl.when(n < n_last)
    def _():
        dtop_ref[...] = nd
        rtop_ref[...] = nr
        gtop_ref[...] = ng
        btop_ref[...] = nb

    # ---- last chunk: write the averaged colors (channel-major, lane-dense)
    @pl.when(n == n_last)
    def _():
        inv_k = 1.0 / K_NEAREST
        out_ref[0, 0:1, :] = (jnp.sum(nr, axis=0, keepdims=True) * inv_k
                              ).astype(out_ref.dtype)
        out_ref[0, 1:2, :] = (jnp.sum(ng, axis=0, keepdims=True) * inv_k
                              ).astype(out_ref.dtype)
        out_ref[0, 2:3, :] = (jnp.sum(nb, axis=0, keepdims=True) * inv_k
                              ).astype(out_ref.dtype)


def project_color_onto_image_v2(image_grid, query_points, query_colors,
                                intrinsics, *, chunk_n=None):
    """JAX/Pallas equivalent of ProjectColorOntoImage_v2.forward (NCHW in/out)."""
    B, C, H, W = image_grid.shape
    assert C == 3, "module semantics require 3 color channels"
    P = H * W
    N = query_points.shape[1]
    assert N >= K_NEAREST
    assert P + 2048 < (1 << 24), "f32 pixel-index generation requires H*W < 2^24"
    # TODO(synk): add an i32 / per-row pixel-index path for >=16M-pixel images.

    intr = jnp.asarray(intrinsics, jnp.float32)

    # --- Project3D hoisted to the wrapper (default T: identity rot, zero trans)
    pc = query_points.astype(jnp.float32) @ intr.T                  # [B, N, 3]
    qg = pc[..., :2] / (pc[..., 2:3] + EPS)                         # [B, N, 2]

    # --- query chunk size (lane-dense) and padded query count
    if chunk_n is None:
        nc = min(512, _round_up(N, _LANE))
    else:
        assert chunk_n % _LANE == 0
        nc = chunk_n
    n_pad = _round_up(N, nc)
    num_chunks = n_pad // nc

    # queries on sublanes (B, n_pad, 2); colors lane-dense channel-major
    coords = jnp.full((B, n_pad, 2), _PAD_SENTINEL, jnp.float32)
    coords = coords.at[:, :N, :].set(qg)
    colors_t = jnp.zeros((B, 3, n_pad), jnp.float32)
    colors_t = colors_t.at[:, :, :N].set(
        jnp.transpose(query_colors.astype(jnp.float32), (0, 2, 1)))

    # --- generation-aware pixel tile: ~6 live [nc, tp] f32 intermediates
    vmem_cap = _vmem_capacity_bytes()
    small_vmem = vmem_cap <= 64 * 1024 * 1024            # v7x-class parts
    inter_budget = (12 if small_vmem else 24) * 1024 * 1024
    tp_max = 512 if small_vmem else 1024
    tp = _LANE
    for cand in (1024, 512, 256, 128):
        if cand <= tp_max and 6 * cand * nc * 4 <= inter_budget:
            tp = cand
            break
    tp = min(tp, _round_up(P, _LANE))
    p_pad = _round_up(P, tp)
    # only split the pixel tile for multi-TensorCore parts (v7x); on a single
    # TC the grid is a sequential loop and halving just adds per-step overhead.
    if _num_tensorcores() > 1 and B * (p_pad // tp) < 2 and tp > _LANE:
        tp //= 2
        p_pad = _round_up(P, tp)
    p_tiles = p_pad // tp

    grid = (B, p_tiles, num_chunks)
    kernel = functools.partial(_project_color_kernel, tp=tp, width=W, nc=nc)

    steps = B * p_tiles * num_chunks
    cost = pl.CostEstimate(
        flops=int(steps * 64 * nc * tp),
        transcendentals=0,
        bytes_accessed=int(steps * 5 * nc * 4
                           + B * p_tiles * 3 * tp * image_grid.dtype.itemsize),
    )

    out = pl.pallas_call(
        kernel,
        out_shape=jax.ShapeDtypeStruct((B, 3, p_pad), image_grid.dtype),
        grid_spec=pltpu.PrefetchScalarGridSpec(
            num_scalar_prefetch=0,
            grid=grid,
            in_specs=[
                pl.BlockSpec((1, nc, 2), lambda b, p, n: (b, n, 0)),
                pl.BlockSpec((1, 3, nc), lambda b, p, n: (b, 0, n)),
            ],
            out_specs=pl.BlockSpec((1, 3, tp), lambda b, p, n: (b, 0, p)),
            scratch_shapes=[pltpu.VMEM((_KC, tp), jnp.float32)] * 4,
        ),
        compiler_params=pltpu.CompilerParams(
            dimension_semantics=("parallel", "parallel", "arbitrary"),
            vmem_limit_bytes=int(min(vmem_cap // 2, 64 * 1024 * 1024))),
        cost_estimate=cost,
    )(coords, colors_t)

    if p_pad != P:
        out = out[:, :, :P]                 # drop padded tail pixels
    return out.reshape(B, 3, H, W)


def _reference(image_grid, query_points, query_colors, intrinsics):
    """Pure-JAX reference mirroring the PyTorch forward (for validation)."""
    B, C, H, W = image_grid.shape
    P = H * W
    pc = query_points.astype(jnp.float32) @ intrinsics.T
    qg = pc[..., :2] / (pc[..., 2:3] + EPS)                          # [B, N, 2]
    y, x = jnp.meshgrid(jnp.arange(H), jnp.arange(W), indexing="ij")
    pix = jnp.stack([x, y], -1).astype(jnp.float32).reshape(P, 2)
    outs = []
    for b in range(B):
        diff = pix[:, None, :] - qg[b][None, :, :]
        d = jnp.sum(diff * diff, axis=-1)                            # [P, N]
        _, idx = lax.top_k(-d, K_NEAREST)                            # 5 smallest
        avg = query_colors[b][idx].mean(axis=1)                      # [P, 3]
        outs.append(avg.T.reshape(3, H, W))
    return jnp.stack(outs).astype(image_grid.dtype)


if __name__ == "__main__":
    def make_case(key, B, H, W, N):
        k1, k2, k3, k4 = jax.random.split(key, 4)
        image_grid = jax.random.normal(k1, (B, 3, H, W), jnp.float32)
        xy = jax.random.uniform(k2, (B, N, 2), minval=-0.5, maxval=0.5)
        z = jax.random.uniform(k3, (B, N, 1), minval=1.0, maxval=3.0)
        query_points = jnp.concatenate([xy * z, z], axis=-1)          # [B, N, 3]
        query_colors = jax.random.uniform(k4, (B, N, 3))
        intr = jnp.array([[20.0, 0.0, W / 2.0],
                          [0.0, 20.0, H / 2.0],
                          [0.0, 0.0, 1.0]], jnp.float32)
        return image_grid, query_points, query_colors, intr

    key = jax.random.PRNGKey(0)
    k_a, k_b = jax.random.split(key)

    # case 1: tiny point set -> single query chunk, heavy lane padding
    img, qp, qc, intr = make_case(k_a, B=2, H=16, W=16, N=8)
    out = jax.block_until_ready(project_color_onto_image_v2(img, qp, qc, intr))
    ref = _reference(img, qp, qc, intr)
    assert out.shape == img.shape
    assert bool(jnp.all(jnp.isfinite(out)))
    assert bool(jnp.allclose(out, ref, atol=1e-4)), float(jnp.max(jnp.abs(out - ref)))

    # case 2: larger point set with a forced 128-point chunk -> exercises the
    # multi-chunk running-top-5 merge across the "arbitrary" grid axis.
    img, qp, qc, intr = make_case(k_b, B=2, H=16, W=16, N=200)
    out = jax.block_until_ready(
        project_color_onto_image_v2(img, qp, qc, intr, chunk_n=128))
    ref = _reference(img, qp, qc, intr)
    assert out.shape == img.shape
    assert bool(jnp.all(jnp.isfinite(out)))
    assert bool(jnp.allclose(out, ref, atol=1e-4)), float(jnp.max(jnp.abs(out - ref)))

    print("KERNEL_OK")
</pallas_src>

<mosaic_0001>
module attributes {stable_mosaic.version = 11 : i64} {
  func.func @_project_color_kernel(%arg0: i32, %arg1: i32, %arg2: i32, %arg3: memref<1x128x2xf32, #tpu.memory_space<vmem>>, %arg4: memref<1x3x128xf32, #tpu.memory_space<vmem>>, %arg5: memref<1x3x256xf32, #tpu.memory_space<vmem>>, %arg6: memref<8x256xf32, #tpu.memory_space<vmem>>, %arg7: memref<8x256xf32, #tpu.memory_space<vmem>>, %arg8: memref<8x256xf32, #tpu.memory_space<vmem>>, %arg9: memref<8x256xf32, #tpu.memory_space<vmem>>) attributes {dimension_semantics = [#tpu.dimension_semantics<parallel>, #tpu.dimension_semantics<parallel>, #tpu.dimension_semantics<arbitrary>], iteration_bounds = array<i64: 2, 1, 1>, scalar_prefetch = 0 : i64, scratch_operands = 4 : i64, tpu.core_type = #tpu.core_type<tc>, window_params = [{transform_indices = @transform_0, window_bounds = array<i64: 1, 128, 2>}, {transform_indices = @transform_1, window_bounds = array<i64: 1, 3, 128>}, {transform_indices = @transform_2, window_bounds = array<i64: 1, 3, 256>}]} {
    %c0_i32 = arith.constant 0 : i32
    %0 = arith.cmpi eq, %arg2, %c0_i32 : i32
    %1 = arith.extui %0 : i1 to i32
    %c0_i32_0 = arith.constant 0 : i32
    %2 = arith.cmpi ne, %1, %c0_i32_0 : i32
    scf.if %2 {
      %cst_90 = arith.constant 0x7F800000 : f32
      %377 = vector.broadcast %cst_90 : f32 to vector<8x256xf32>
      %c0_91 = arith.constant 0 : index
      %c0_92 = arith.constant 0 : index
      %378 = vector.load %arg6[%c0_91, %c0_92] : memref<8x256xf32, #tpu.memory_space<vmem>>, vector<8x256xf32>
      tpu.vector_store %arg6[%c0_91, %c0_92], %377 {strides = array<i32>} : memref<8x256xf32, #tpu.memory_space<vmem>>, vector<8x256xf32>,
      %cst_93 = arith.constant 0.000000e+00 : f32
      %379 = vector.broadcast %cst_93 : f32 to vector<8x256xf32>
      %c0_94 = arith.constant 0 : index
      %c0_95 = arith.constant 0 : index
      %380 = vector.load %arg7[%c0_94, %c0_95] : memref<8x256xf32, #tpu.memory_space<vmem>>, vector<8x256xf32>
      tpu.vector_store %arg7[%c0_94, %c0_95], %379 {strides = array<i32>} : memref<8x256xf32, #tpu.memory_space<vmem>>, vector<8x256xf32>,
      %cst_96 = arith.constant 0.000000e+00 : f32
      %381 = vector.broadcast %cst_96 : f32 to vector<8x256xf32>
      %c0_97 = arith.constant 0 : index
      %c0_98 = arith.constant 0 : index
      %382 = vector.load %arg8[%c0_97, %c0_98] : memref<8x256xf32, #tpu.memory_space<vmem>>, vector<8x256xf32>
      tpu.vector_store %arg8[%c0_97, %c0_98], %381 {strides = array<i32>} : memref<8x256xf32, #tpu.memory_space<vmem>>, vector<8x256xf32>,
      %cst_99 = arith.constant 0.000000e+00 : f32
      %383 = vector.broadcast %cst_99 : f32 to vector<8x256xf32>
      %c0_100 = arith.constant 0 : index
      %c0_101 = arith.constant 0 : index
      %384 = vector.load %arg9[%c0_100, %c0_101] : memref<8x256xf32, #tpu.memory_space<vmem>>, vector<8x256xf32>
      tpu.vector_store %arg9[%c0_100, %c0_101], %383 {strides = array<i32>} : memref<8x256xf32, #tpu.memory_space<vmem>>, vector<8x256xf32>,
    } else {
    }
    %c256_i32 = arith.constant 256 : i32
    %3 = arith.muli %arg1, %c256_i32 : i32
    %4 = tpu.iota {dimensions = array<i32: 1>} : vector<1x256xi32>
    %5 = vector.broadcast %3 : i32 to vector<1x256xi32>
    %6 = arith.addi %5, %4 : vector<1x256xi32>
    %7 = arith.sitofp %6 : vector<1x256xi32> to vector<1x256xf32>
    %cst = arith.constant 1.600000e+01 : f32
    %8 = vector.broadcast %cst : f32 to vector<1x256xf32>
    %9 = arith.divf %7, %8 : vector<1x256xf32>
    %10 = math.floor %9 : vector<1x256xf32>
    %cst_1 = arith.constant 1.600000e+01 : f32
    %11 = vector.broadcast %cst_1 : f32 to vector<1x256xf32>
    %12 = arith.mulf %10, %11 : vector<1x256xf32>
    %13 = arith.cmpf ogt, %12, %7 : vector<1x256xf32>
    %14 = arith.extui %13 : vector<1x256xi1> to vector<1x256xi32>
    %15 = arith.sitofp %14 : vector<1x256xi32> to vector<1x256xf32>
    %16 = arith.subf %10, %15 : vector<1x256xf32>
    %cst_2 = arith.constant 1.000000e+00 : f32
    %17 = vector.broadcast %cst_2 : f32 to vector<1x256xf32>
    %18 = arith.addf %16, %17 : vector<1x256xf32>
    %cst_3 = arith.constant 1.600000e+01 : f32
    %19 = vector.broadcast %cst_3 : f32 to vector<1x256xf32>
    %20 = arith.mulf %18, %19 : vector<1x256xf32>
    %21 = arith.cmpf ole, %20, %7 : vector<1x256xf32>
    %22 = arith.extui %21 : vector<1x256xi1> to vector<1x256xi32>
    %23 = arith.sitofp %22 : vector<1x256xi32> to vector<1x256xf32>
    %24 = arith.addf %16, %23 : vector<1x256xf32>
    %cst_4 = arith.constant 1.600000e+01 : f32
    %25 = vector.broadcast %cst_4 : f32 to vector<1x256xf32>
    %26 = arith.mulf %24, %25 : vector<1x256xf32>
    %27 = arith.subf %7, %26 : vector<1x256xf32>
    %c0 = arith.constant 0 : index
    %c0_5 = arith.constant 0 : index
    %c0_6 = arith.constant 0 : index
    %28 = vector.load %arg3[%c0, %c0_5, %c0_6] : memref<1x128x2xf32, #tpu.memory_space<vmem>>, vector<1x128x2xf32>
    %29 = vector.shape_cast %28 : vector<1x128x2xf32> to vector<128x2xf32>
    %30 = vector.extract_strided_slice %29 {offsets = [0, 0], sizes = [128, 1], strides = [1, 1]} : vector<128x2xf32> to vector<128x1xf32>
    %31 = vector.extract_strided_slice %29 {offsets = [0, 1], sizes = [128, 1], strides = [1, 1]} : vector<128x2xf32> to vector<128x1xf32>
    %c0_7 = arith.constant 0 : index
    %c0_8 = arith.constant 0 : index
    %c0_9 = arith.constant 0 : index
    %32 = vector.load %arg4[%c0_7, %c0_8, %c0_9] : memref<1x3x128xf32, #tpu.memory_space<vmem>>, vector<1x3x128xf32>
    %33 = vector.shape_cast %32 : vector<1x3x128xf32> to vector<3x128xf32>
    %34 = vector.broadcast %27 : vector<1x256xf32> to vector<128x256xf32>
    %35 = vector.broadcast %30 : vector<128x1xf32> to vector<128x256xf32>
    %36 = arith.subf %34, %35 : vector<128x256xf32>
    %37 = vector.broadcast %24 : vector<1x256xf32> to vector<128x256xf32>
    %38 = vector.broadcast %31 : vector<128x1xf32> to vector<128x256xf32>
    %39 = arith.subf %37, %38 : vector<128x256xf32>
    %40 = arith.mulf %36, %36 : vector<128x256xf32>
    %41 = arith.mulf %39, %39 : vector<128x256xf32>
    %42 = arith.addf %40, %41 : vector<128x256xf32>
    %c0_10 = arith.constant 0 : index
    %c0_11 = arith.constant 0 : index
    %43 = vector.load %arg6[%c0_10, %c0_11] : memref<8x256xf32, #tpu.memory_space<vmem>>, vector<8x256xf32>
    %c0_12 = arith.constant 0 : index
    %c0_13 = arith.constant 0 : index
    %44 = vector.load %arg7[%c0_12, %c0_13] : memref<8x256xf32, #tpu.memory_space<vmem>>, vector<8x256xf32>
    %c0_14 = arith.constant 0 : index
    %c0_15 = arith.constant 0 : index
    %45 = vector.load %arg8[%c0_14, %c0_15] : memref<8x256xf32, #tpu.memory_space<vmem>>, vector<8x256xf32>
    %c0_16 = arith.constant 0 : index
    %c0_17 = arith.constant 0 : index
    %46 = vector.load %arg9[%c0_16, %c0_17] : memref<8x256xf32, #tpu.memory_space<vmem>>, vector<8x256xf32>
    %cst_18 = arith.constant 0x7F800000 : f32
    %47 = vector.broadcast %cst_18 : f32 to vector<8x256xf32>
    %cst_19 = arith.constant 0.000000e+00 : f32
    %48 = vector.broadcast %cst_19 : f32 to vector<8x256xf32>
    %cst_20 = arith.constant 0.000000e+00 : f32
    %49 = vector.broadcast %cst_20 : f32 to vector<8x256xf32>
    %cst_21 = arith.constant 0.000000e+00 : f32
    %50 = vector.broadcast %cst_21 : f32 to vector<8x256xf32>
    %c0_i32_22 = arith.constant 0 : i32
    %51 = tpu.iota {dimensions = array<i32: 0>} : vector<8x256xi32>
    %52 = tpu.iota {dimensions = array<i32: 0>} : vector<128x256xi32>
    %c8_i32 = arith.constant 8 : i32
    %53 = vector.broadcast %c8_i32 : i32 to vector<128x256xi32>
    %54 = arith.addi %52, %53 : vector<128x256xi32>
    %cst_23 = arith.constant dense<0x7F800000> : vector<256xf32>
    %55 = vector.multi_reduction <minimumf>, %43, %cst_23 [0] : vector<8x256xf32> to vector<256xf32>
    %56 = vector.shape_cast %55 : vector<256xf32> to vector<1x256xf32>
    %cst_24 = arith.constant dense<0x7F800000> : vector<256xf32>
    %57 = vector.multi_reduction <minimumf>, %42, %cst_24 [0] : vector<128x256xf32> to vector<256xf32>
    %58 = vector.shape_cast %57 : vector<256xf32> to vector<1x256xf32>
    %59 = arith.minimumf %56, %58 : vector<1x256xf32>
    %60 = vector.broadcast %59 : vector<1x256xf32> to vector<8x256xf32>
    %61 = arith.cmpf oeq, %43, %60 : vector<8x256xf32>
    %c136_i32 = arith.constant 136 : i32
    %62 = vector.broadcast %c136_i32 : i32 to vector<8x256xi32>
    %63 = arith.select %61, %51, %62 : vector<8x256xi1>, vector<8x256xi32>
    %cst_25 = arith.constant dense<2147483647> : vector<256xi32>
    %64 = vector.multi_reduction <minsi>, %63, %cst_25 [0] : vector<8x256xi32> to vector<256xi32>
    %65 = vector.shape_cast %64 : vector<256xi32> to vector<1x256xi32>
    %66 = vector.broadcast %59 : vector<1x256xf32> to vector<128x256xf32>
    %67 = arith.cmpf oeq, %42, %66 : vector<128x256xf32>
    %c136_i32_26 = arith.constant 136 : i32
    %68 = vector.broadcast %c136_i32_26 : i32 to vector<128x256xi32>
    %69 = arith.select %67, %54, %68 : vector<128x256xi1>, vector<128x256xi32>
    %cst_27 = arith.constant dense<2147483647> : vector<256xi32>
    %70 = vector.multi_reduction <minsi>, %69, %cst_27 [0] : vector<128x256xi32> to vector<256xi32>
    %71 = vector.shape_cast %70 : vector<256xi32> to vector<1x256xi32>
    %72 = arith.minsi %65, %71 : vector<1x256xi32>
    %73 = vector.broadcast %72 : vector<1x256xi32> to vector<8x256xi32>
    %74 = arith.cmpi eq, %51, %73 : vector<8x256xi32>
    %75 = vector.broadcast %72 : vector<1x256xi32> to vector<128x256xi32>
    %76 = arith.cmpi eq, %54, %75 : vector<128x256xi32>
    %77 = arith.extui %76 : vector<128x256xi1> to vector<128x256xi32>
    %78 = arith.sitofp %77 : vector<128x256xi32> to vector<128x256xf32>
    %cst_28 = arith.constant dense<0.000000e+00> : vector<3x256xf32>
    %79 = tpu.matmul %33, %78, %cst_28 {dimension_numbers = #tpu.dot_dimension_numbers<[1], [0], [0], [1], [0, 0, 1, 1], [], []>} : vector<3x128xf32>, vector<128x256xf32>, vector<3x256xf32> -> vector<3x256xf32>
    %80 = arith.extui %74 : vector<8x256xi1> to vector<8x256xi32>
    %81 = arith.sitofp %80 : vector<8x256xi32> to vector<8x256xf32>
    %82 = vector.extract_strided_slice %79 {offsets = [0, 0], sizes = [1, 256], strides = [1, 1]} : vector<3x256xf32> to vector<1x256xf32>
    %83 = arith.mulf %44, %81 : vector<8x256xf32>
    %cst_29 = arith.constant dense<0.000000e+00> : vector<256xf32>
    %84 = vector.multi_reduction <add>, %83, %cst_29 [0] : vector<8x256xf32> to vector<256xf32>
    %85 = vector.shape_cast %84 : vector<256xf32> to vector<1x256xf32>
    %86 = arith.addf %82, %85 : vector<1x256xf32>
    %87 = vector.extract_strided_slice %79 {offsets = [1, 0], sizes = [1, 256], strides = [1, 1]} : vector<3x256xf32> to vector<1x256xf32>
    %88 = arith.mulf %45, %81 : vector<8x256xf32>
    %cst_30 = arith.constant dense<0.000000e+00> : vector<256xf32>
    %89 = vector.multi_reduction <add>, %88, %cst_30 [0] : vector<8x256xf32> to vector<256xf32>
    %90 = vector.shape_cast %89 : vector<256xf32> to vector<1x256xf32>
    %91 = arith.addf %87, %90 : vector<1x256xf32>
    %92 = vector.extract_strided_slice %79 {offsets = [2, 0], sizes = [1, 256], strides = [1, 1]} : vector<3x256xf32> to vector<1x256xf32>
    %93 = arith.mulf %46, %81 : vector<8x256xf32>
    %cst_31 = arith.constant dense<0.000000e+00> : vector<256xf32>
    %94 = vector.multi_reduction <add>, %93, %cst_31 [0] : vector<8x256xf32> to vector<256xf32>
    %95 = vector.shape_cast %94 : vector<256xf32> to vector<1x256xf32>
    %96 = arith.addf %92, %95 : vector<1x256xf32>
    %97 = vector.broadcast %c0_i32_22 : i32 to vector<8x256xi32>
    %98 = arith.cmpi eq, %51, %97 : vector<8x256xi32>
    %99 = vector.shape_cast %59 : vector<1x256xf32> to vector<1x256xf32>
    %100 = vector.broadcast %99 : vector<1x256xf32> to vector<8x256xf32>
    %101 = arith.select %98, %100, %47 : vector<8x256xi1>, vector<8x256xf32>
    %102 = vector.shape_cast %86 : vector<1x256xf32> to vector<1x256xf32>
    %103 = vector.broadcast %102 : vector<1x256xf32> to vector<8x256xf32>
    %104 = arith.select %98, %103, %48 : vector<8x256xi1>, vector<8x256xf32>
    %105 = vector.shape_cast %91 : vector<1x256xf32> to vector<1x256xf32>
    %106 = vector.broadcast %105 : vector<1x256xf32> to vector<8x256xf32>
    %107 = arith.select %98, %106, %49 : vector<8x256xi1>, vector<8x256xf32>
    %108 = vector.shape_cast %96 : vector<1x256xf32> to vector<1x256xf32>
    %109 = vector.broadcast %108 : vector<1x256xf32> to vector<8x256xf32>
    %110 = arith.select %98, %109, %50 : vector<8x256xi1>, vector<8x256xf32>
    %cst_32 = arith.constant 0x7F800000 : f32
    %111 = vector.broadcast %cst_32 : f32 to vector<8x256xf32>
    %112 = arith.select %74, %111, %43 : vector<8x256xi1>, vector<8x256xf32>
    %cst_33 = arith.constant 0x7F800000 : f32
    %113 = vector.broadcast %cst_33 : f32 to vector<128x256xf32>
    %114 = arith.select %76, %113, %42 : vector<128x256xi1>, vector<128x256xf32>
    %c1_i32 = arith.constant 1 : i32
    %115 = tpu.iota {dimensions = array<i32: 0>} : vector<8x256xi32>
    %116 = tpu.iota {dimensions = array<i32: 0>} : vector<128x256xi32>
    %c8_i32_34 = arith.constant 8 : i32
    %117 = vector.broadcast %c8_i32_34 : i32 to vector<128x256xi32>
    %118 = arith.addi %116, %117 : vector<128x256xi32>
    %cst_35 = arith.constant dense<0x7F800000> : vector<256xf32>
    %119 = vector.multi_reduction <minimumf>, %112, %cst_35 [0] : vector<8x256xf32> to vector<256xf32>
    %120 = vector.shape_cast %119 : vector<256xf32> to vector<1x256xf32>
    %cst_36 = arith.constant dense<0x7F800000> : vector<256xf32>
    %121 = vector.multi_reduction <minimumf>, %114, %cst_36 [0] : vector<128x256xf32> to vector<256xf32>
    %122 = vector.shape_cast %121 : vector<256xf32> to vector<1x256xf32>
    %123 = arith.minimumf %120, %122 : vector<1x256xf32>
    %124 = vector.broadcast %123 : vector<1x256xf32> to vector<8x256xf32>
    %125 = arith.cmpf oeq, %112, %124 : vector<8x256xf32>
    %c136_i32_37 = arith.constant 136 : i32
    %126 = vector.broadcast %c136_i32_37 : i32 to vector<8x256xi32>
    %127 = arith.select %125, %115, %126 : vector<8x256xi1>, vector<8x256xi32>
    %cst_38 = arith.constant dense<2147483647> : vector<256xi32>
    %128 = vector.multi_reduction <minsi>, %127, %cst_38 [0] : vector<8x256xi32> to vector<256xi32>
    %129 = vector.shape_cast %128 : vector<256xi32> to vector<1x256xi32>
    %130 = vector.broadcast %123 : vector<1x256xf32> to vector<128x256xf32>
    %131 = arith.cmpf oeq, %114, %130 : vector<128x256xf32>
    %c136_i32_39 = arith.constant 136 : i32
    %132 = vector.broadcast %c136_i32_39 : i32 to vector<128x256xi32>
    %133 = arith.select %131, %118, %132 : vector<128x256xi1>, vector<128x256xi32>
    %cst_40 = arith.constant dense<2147483647> : vector<256xi32>
    %134 = vector.multi_reduction <minsi>, %133, %cst_40 [0] : vector<128x256xi32> to vector<256xi32>
    %135 = vector.shape_cast %134 : vector<256xi32> to vector<1x256xi32>
    %136 = arith.minsi %129, %135 : vector<1x256xi32>
    %137 = vector.broadcast %136 : vector<1x256xi32> to vector<8x256xi32>
    %138 = arith.cmpi eq, %115, %137 : vector<8x256xi32>
    %139 = vector.broadcast %136 : vector<1x256xi32> to vector<128x256xi32>
    %140 = arith.cmpi eq, %118, %139 : vector<128x256xi32>
    %141 = arith.extui %140 : vector<128x256xi1> to vector<128x256xi32>
    %142 = arith.sitofp %141 : vector<128x256xi32> to vector<128x256xf32>
    %cst_41 = arith.constant dense<0.000000e+00> : vector<3x256xf32>
    %143 = tpu.matmul %33, %142, %cst_41 {dimension_numbers = #tpu.dot_dimension_numbers<[1], [0], [0], [1], [0, 0, 1, 1], [], []>} : vector<3x128xf32>, vector<128x256xf32>, vector<3x256xf32> -> vector<3x256xf32>
    %144 = arith.extui %138 : vector<8x256xi1> to vector<8x256xi32>
    %145 = arith.sitofp %144 : vector<8x256xi32> to vector<8x256xf32>
    %146 = vector.extract_strided_slice %143 {offsets = [0, 0], sizes = [1, 256], strides = [1, 1]} : vector<3x256xf32> to vector<1x256xf32>
    %147 = arith.mulf %44, %145 : vector<8x256xf32>
    %cst_42 = arith.constant dense<0.000000e+00> : vector<256xf32>
    %148 = vector.multi_reduction <add>, %147, %cst_42 [0] : vector<8x256xf32> to vector<256xf32>
    %149 = vector.shape_cast %148 : vector<256xf32> to vector<1x256xf32>
    %150 = arith.addf %146, %149 : vector<1x256xf32>
    %151 = vector.extract_strided_slice %143 {offsets = [1, 0], sizes = [1, 256], strides = [1, 1]} : vector<3x256xf32> to vector<1x256xf32>
    %152 = arith.mulf %45, %145 : vector<8x256xf32>
    %cst_43 = arith.constant dense<0.000000e+00> : vector<256xf32>
    %153 = vector.multi_reduction <add>, %152, %cst_43 [0] : vector<8x256xf32> to vector<256xf32>
    %154 = vector.shape_cast %153 : vector<256xf32> to vector<1x256xf32>
    %155 = arith.addf %151, %154 : vector<1x256xf32>
    %156 = vector.extract_strided_slice %143 {offsets = [2, 0], sizes = [1, 256], strides = [1, 1]} : vector<3x256xf32> to vector<1x256xf32>
    %157 = arith.mulf %46, %145 : vector<8x256xf32>
    %cst_44 = arith.constant dense<0.000000e+00> : vector<256xf32>
    %158 = vector.multi_reduction <add>, %157, %cst_44 [0] : vector<8x256xf32> to vector<256xf32>
    %159 = vector.shape_cast %158 : vector<256xf32> to vector<1x256xf32>
    %160 = arith.addf %156, %159 : vector<1x256xf32>
    %161 = vector.broadcast %c1_i32 : i32 to vector<8x256xi32>
    %162 = arith.cmpi eq, %115, %161 : vector<8x256xi32>
    %163 = vector.shape_cast %123 : vector<1x256xf32> to vector<1x256xf32>
    %164 = vector.broadcast %163 : vector<1x256xf32> to vector<8x256xf32>
    %165 = arith.select %162, %164, %101 : vector<8x256xi1>, vector<8x256xf32>
    %166 = vector.shape_cast %150 : vector<1x256xf32> to vector<1x256xf32>
    %167 = vector.broadcast %166 : vector<1x256xf32> to vector<8x256xf32>
    %168 = arith.select %162, %167, %104 : vector<8x256xi1>, vector<8x256xf32>
    %169 = vector.shape_cast %155 : vector<1x256xf32> to vector<1x256xf32>
    %170 = vector.broadcast %169 : vector<1x256xf32> to vector<8x256xf32>
    %171 = arith.select %162, %170, %107 : vector<8x256xi1>, vector<8x256xf32>
    %172 = vector.shape_cast %160 : vector<1x256xf32> to vector<1x256xf32>
    %173 = vector.broadcast %172 : vector<1x256xf32> to vector<8x256xf32>
    %174 = arith.select %162, %173, %110 : vector<8x256xi1>, vector<8x256xf32>
    %cst_45 = arith.constant 0x7F800000 : f32
    %175 = vector.broadcast %cst_45 : f32 to vector<8x256xf32>
    %176 = arith.select %138, %175, %112 : vector<8x256xi1>, vector<8x256xf32>
    %cst_46 = arith.constant 0x7F800000 : f32
    %177 = vector.broadcast %cst_46 : f32 to vector<128x256xf32>
    %178 = arith.select %140, %177, %114 : vector<128x256xi1>, vector<128x256xf32>
    %c2_i32 = arith.constant 2 : i32
    %179 = tpu.iota {dimensions = array<i32: 0>} : vector<8x256xi32>
    %180 = tpu.iota {dimensions = array<i32: 0>} : vector<128x256xi32>
    %c8_i32_47 = arith.constant 8 : i32
    %181 = vector.broadcast %c8_i32_47 : i32 to vector<128x256xi32>
    %182 = arith.addi %180, %181 : vector<128x256xi32>
    %cst_48 = arith.constant dense<0x7F800000> : vector<256xf32>
    %183 = vector.multi_reduction <minimumf>, %176, %cst_48 [0] : vector<8x256xf32> to vector<256xf32>
    %184 = vector.shape_cast %183 : vector<256xf32> to vector<1x256xf32>
    %cst_49 = arith.constant dense<0x7F800000> : vector<256xf32>
    %185 = vector.multi_reduction <minimumf>, %178, %cst_49 [0] : vector<128x256xf32> to vector<256xf32>
    %186 = vector.shape_cast %185 : vector<256xf32> to vector<1x256xf32>
    %187 = arith.minimumf %184, %186 : vector<1x256xf32>
    %188 = vector.broadcast %187 : vector<1x256xf32> to vector<8x256xf32>
    %189 = arith.cmpf oeq, %176, %188 : vector<8x256xf32>
    %c136_i32_50 = arith.constant 136 : i32
    %190 = vector.broadcast %c136_i32_50 : i32 to vector<8x256xi32>
    %191 = arith.select %189, %179, %190 : vector<8x256xi1>, vector<8x256xi32>
    %cst_51 = arith.constant dense<2147483647> : vector<256xi32>
    %192 = vector.multi_reduction <minsi>, %191, %cst_51 [0] : vector<8x256xi32> to vector<256xi32>
    %193 = vector.shape_cast %192 : vector<256xi32> to vector<1x256xi32>
    %194 = vector.broadcast %187 : vector<1x256xf32> to vector<128x256xf32>
    %195 = arith.cmpf oeq, %178, %194 : vector<128x256xf32>
    %c136_i32_52 = arith.constant 136 : i32
    %196 = vector.broadcast %c136_i32_52 : i32 to vector<128x256xi32>
    %197 = arith.select %195, %182, %196 : vector<128x256xi1>, vector<128x256xi32>
    %cst_53 = arith.constant dense<2147483647> : vector<256xi32>
    %198 = vector.multi_reduction <minsi>, %197, %cst_53 [0] : vector<128x256xi32> to vector<256xi32>
    %199 = vector.shape_cast %198 : vector<256xi32> to vector<1x256xi32>
    %200 = arith.minsi %193, %199 : vector<1x256xi32>
    %201 = vector.broadcast %200 : vector<1x256xi32> to vector<8x256xi32>
    %202 = arith.cmpi eq, %179, %201 : vector<8x256xi32>
    %203 = vector.broadcast %200 : vector<1x256xi32> to vector<128x256xi32>
    %204 = arith.cmpi eq, %182, %203 : vector<128x256xi32>
    %205 = arith.extui %204 : vector<128x256xi1> to vector<128x256xi32>
    %206 = arith.sitofp %205 : vector<128x256xi32> to vector<128x256xf32>
    %cst_54 = arith.constant dense<0.000000e+00> : vector<3x256xf32>
    %207 = tpu.matmul %33, %206, %cst_54 {dimension_numbers = #tpu.dot_dimension_numbers<[1], [0], [0], [1], [0, 0, 1, 1], [], []>} : vector<3x128xf32>, vector<128x256xf32>, vector<3x256xf32> -> vector<3x256xf32>
    %208 = arith.extui %202 : vector<8x256xi1> to vector<8x256xi32>
    %209 = arith.sitofp %208 : vector<8x256xi32> to vector<8x256xf32>
    %210 = vector.extract_strided_slice %207 {offsets = [0, 0], sizes = [1, 256], strides = [1, 1]} : vector<3x256xf32> to vector<1x256xf32>
    %211 = arith.mulf %44, %209 : vector<8x256xf32>
    %cst_55 = arith.constant dense<0.000000e+00> : vector<256xf32>
    %212 = vector.multi_reduction <add>, %211, %cst_55 [0] : vector<8x256xf32> to vector<256xf32>
    %213 = vector.shape_cast %212 : vector<256xf32> to vector<1x256xf32>
    %214 = arith.addf %210, %213 : vector<1x256xf32>
    %215 = vector.extract_strided_slice %207 {offsets = [1, 0], sizes = [1, 256], strides = [1, 1]} : vector<3x256xf32> to vector<1x256xf32>
    %216 = arith.mulf %45, %209 : vector<8x256xf32>
    %cst_56 = arith.constant dense<0.000000e+00> : vector<256xf32>
    %217 = vector.multi_reduction <add>, %216, %cst_56 [0] : vector<8x256xf32> to vector<256xf32>
    %218 = vector.shape_cast %217 : vector<256xf32> to vector<1x256xf32>
    %219 = arith.addf %215, %218 : vector<1x256xf32>
    %220 = vector.extract_strided_slice %207 {offsets = [2, 0], sizes = [1, 256], strides = [1, 1]} : vector<3x256xf32> to vector<1x256xf32>
    %221 = arith.mulf %46, %209 : vector<8x256xf32>
    %cst_57 = arith.constant dense<0.000000e+00> : vector<256xf32>
    %222 = vector.multi_reduction <add>, %221, %cst_57 [0] : vector<8x256xf32> to vector<256xf32>
    %223 = vector.shape_cast %222 : vector<256xf32> to vector<1x256xf32>
    %224 = arith.addf %220, %223 : vector<1x256xf32>
    %225 = vector.broadcast %c2_i32 : i32 to vector<8x256xi32>
    %226 = arith.cmpi eq, %179, %225 : vector<8x256xi32>
    %227 = vector.shape_cast %187 : vector<1x256xf32> to vector<1x256xf32>
    %228 = vector.broadcast %227 : vector<1x256xf32> to vector<8x256xf32>
    %229 = arith.select %226, %228, %165 : vector<8x256xi1>, vector<8x256xf32>
    %230 = vector.shape_cast %214 : vector<1x256xf32> to vector<1x256xf32>
    %231 = vector.broadcast %230 : vector<1x256xf32> to vector<8x256xf32>
    %232 = arith.select %226, %231, %168 : vector<8x256xi1>, vector<8x256xf32>
    %233 = vector.shape_cast %219 : vector<1x256xf32> to vector<1x256xf32>
    %234 = vector.broadcast %233 : vector<1x256xf32> to vector<8x256xf32>
    %235 = arith.select %226, %234, %171 : vector<8x256xi1>, vector<8x256xf32>
    %236 = vector.shape_cast %224 : vector<1x256xf32> to vector<1x256xf32>
    %237 = vector.broadcast %236 : vector<1x256xf32> to vector<8x256xf32>
    %238 = arith.select %226, %237, %174 : vector<8x256xi1>, vector<8x256xf32>
    %cst_58 = arith.constant 0x7F800000 : f32
    %239 = vector.broadcast %cst_58 : f32 to vector<8x256xf32>
    %240 = arith.select %202, %239, %176 : vector<8x256xi1>, vector<8x256xf32>
    %cst_59 = arith.constant 0x7F800000 : f32
    %241 = vector.broadcast %cst_59 : f32 to vector<128x256xf32>
    %242 = arith.select %204, %241, %178 : vector<128x256xi1>, vector<128x256xf32>
    %c3_i32 = arith.constant 3 : i32
    %243 = tpu.iota {dimensions = array<i32: 0>} : vector<8x256xi32>
    %244 = tpu.iota {dimensions = array<i32: 0>} : vector<128x256xi32>
    %c8_i32_60 = arith.constant 8 : i32
    %245 = vector.broadcast %c8_i32_60 : i32 to vector<128x256xi32>
    %246 = arith.addi %244, %245 : vector<128x256xi32>
    %cst_61 = arith.constant dense<0x7F800000> : vector<256xf32>
    %247 = vector.multi_reduction <minimumf>, %240, %cst_61 [0] : vector<8x256xf32> to vector<256xf32>
    %248 = vector.shape_cast %247 : vector<256xf32> to vector<1x256xf32>
    %cst_62 = arith.constant dense<0x7F800000> : vector<256xf32>
    %249 = vector.multi_reduction <minimumf>, %242, %cst_62 [0] : vector<128x256xf32> to vector<256xf32>
    %250 = vector.shape_cast %249 : vector<256xf32> to vector<1x256xf32>
    %251 = arith.minimumf %248, %250 : vector<1x256xf32>
    %252 = vector.broadcast %251 : vector<1x256xf32> to vector<8x256xf32>
    %253 = arith.cmpf oeq, %240, %252 : vector<8x256xf32>
    %c136_i32_63 = arith.constant 136 : i32
    %254 = vector.broadcast %c136_i32_63 : i32 to vector<8x256xi32>
    %255 = arith.select %253, %243, %254 : vector<8x256xi1>, vector<8x256xi32>
    %cst_64 = arith.constant dense<2147483647> : vector<256xi32>
    %256 = vector.multi_reduction <minsi>, %255, %cst_64 [0] : vector<8x256xi32> to vector<256xi32>
    %257 = vector.shape_cast %256 : vector<256xi32> to vector<1x256xi32>
    %258 = vector.broadcast %251 : vector<1x256xf32> to vector<128x256xf32>
    %259 = arith.cmpf oeq, %242, %258 : vector<128x256xf32>
    %c136_i32_65 = arith.constant 136 : i32
    %260 = vector.broadcast %c136_i32_65 : i32 to vector<128x256xi32>
    %261 = arith.select %259, %246, %260 : vector<128x256xi1>, vector<128x256xi32>
    %cst_66 = arith.constant dense<2147483647> : vector<256xi32>
    %262 = vector.multi_reduction <minsi>, %261, %cst_66 [0] : vector<128x256xi32> to vector<256xi32>
    %263 = vector.shape_cast %262 : vector<256xi32> to vector<1x256xi32>
    %264 = arith.minsi %257, %263 : vector<1x256xi32>
    %265 = vector.broadcast %264 : vector<1x256xi32> to vector<8x256xi32>
    %266 = arith.cmpi eq, %243, %265 : vector<8x256xi32>
    %267 = vector.broadcast %264 : vector<1x256xi32> to vector<128x256xi32>
    %268 = arith.cmpi eq, %246, %267 : vector<128x256xi32>
    %269 = arith.extui %268 : vector<128x256xi1> to vector<128x256xi32>
    %270 = arith.sitofp %269 : vector<128x256xi32> to vector<128x256xf32>
    %cst_67 = arith.constant dense<0.000000e+00> : vector<3x256xf32>
    %271 = tpu.matmul %33, %270, %cst_67 {dimension_numbers = #tpu.dot_dimension_numbers<[1], [0], [0], [1], [0, 0, 1, 1], [], []>} : vector<3x128xf32>, vector<128x256xf32>, vector<3x256xf32> -> vector<3x256xf32>
    %272 = arith.extui %266 : vector<8x256xi1> to vector<8x256xi32>
    %273 = arith.sitofp %272 : vector<8x256xi32> to vector<8x256xf32>
    %274 = vector.extract_strided_slice %271 {offsets = [0, 0], sizes = [1, 256], strides = [1, 1]} : vector<3x256xf32> to vector<1x256xf32>
    %275 = arith.mulf %44, %273 : vector<8x256xf32>
    %cst_68 = arith.constant dense<0.000000e+00> : vector<256xf32>
    %276 = vector.multi_reduction <add>, %275, %cst_68 [0] : vector<8x256xf32> to vector<256xf32>
    %277 = vector.shape_cast %276 : vector<256xf32> to vector<1x256xf32>
    %278 = arith.addf %274, %277 : vector<1x256xf32>
    %279 = vector.extract_strided_slice %271 {offsets = [1, 0], sizes = [1, 256], strides = [1, 1]} : vector<3x256xf32> to vector<1x256xf32>
    %280 = arith.mulf %45, %273 : vector<8x256xf32>
    %cst_69 = arith.constant dense<0.000000e+00> : vector<256xf32>
    %281 = vector.multi_reduction <add>, %280, %cst_69 [0] : vector<8x256xf32> to vector<256xf32>
    %282 = vector.shape_cast %281 : vector<256xf32> to vector<1x256xf32>
    %283 = arith.addf %279, %282 : vector<1x256xf32>
    %284 = vector.extract_strided_slice %271 {offsets = [2, 0], sizes = [1, 256], strides = [1, 1]} : vector<3x256xf32> to vector<1x256xf32>
    %285 = arith.mulf %46, %273 : vector<8x256xf32>
    %cst_70 = arith.constant dense<0.000000e+00> : vector<256xf32>
    %286 = vector.multi_reduction <add>, %285, %cst_70 [0] : vector<8x256xf32> to vector<256xf32>
    %287 = vector.shape_cast %286 : vector<256xf32> to vector<1x256xf32>
    %288 = arith.addf %284, %287 : vector<1x256xf32>
    %289 = vector.broadcast %c3_i32 : i32 to vector<8x256xi32>
    %290 = arith.cmpi eq, %243, %289 : vector<8x256xi32>
    %291 = vector.shape_cast %251 : vector<1x256xf32> to vector<1x256xf32>
    %292 = vector.broadcast %291 : vector<1x256xf32> to vector<8x256xf32>
    %293 = arith.select %290, %292, %229 : vector<8x256xi1>, vector<8x256xf32>
    %294 = vector.shape_cast %278 : vector<1x256xf32> to vector<1x256xf32>
    %295 = vector.broadcast %294 : vector<1x256xf32> to vector<8x256xf32>
    %296 = arith.select %290, %295, %232 : vector<8x256xi1>, vector<8x256xf32>
    %297 = vector.shape_cast %283 : vector<1x256xf32> to vector<1x256xf32>
    %298 = vector.broadcast %297 : vector<1x256xf32> to vector<8x256xf32>
    %299 = arith.select %290, %298, %235 : vector<8x256xi1>, vector<8x256xf32>
    %300 = vector.shape_cast %288 : vector<1x256xf32> to vector<1x256xf32>
    %301 = vector.broadcast %300 : vector<1x256xf32> to vector<8x256xf32>
    %302 = arith.select %290, %301, %238 : vector<8x256xi1>, vector<8x256xf32>
    %cst_71 = arith.constant 0x7F800000 : f32
    %303 = vector.broadcast %cst_71 : f32 to vector<8x256xf32>
    %304 = arith.select %266, %303, %240 : vector<8x256xi1>, vector<8x256xf32>
    %cst_72 = arith.constant 0x7F800000 : f32
    %305 = vector.broadcast %cst_72 : f32 to vector<128x256xf32>
    %306 = arith.select %268, %305, %242 : vector<128x256xi1>, vector<128x256xf32>
    %c4_i32 = arith.constant 4 : i32
    %307 = tpu.iota {dimensions = array<i32: 0>} : vector<8x256xi32>
    %308 = tpu.iota {dimensions = array<i32: 0>} : vector<128x256xi32>
    %c8_i32_73 = arith.constant 8 : i32
    %309 = vector.broadcast %c8_i32_73 : i32 to vector<128x256xi32>
    %310 = arith.addi %308, %309 : vector<128x256xi32>
    %cst_74 = arith.constant dense<0x7F800000> : vector<256xf32>
    %311 = vector.multi_reduction <minimumf>, %304, %cst_74 [0] : vector<8x256xf32> to vector<256xf32>
    %312 = vector.shape_cast %311 : vector<256xf32> to vector<1x256xf32>
    %cst_75 = arith.constant dense<0x7F800000> : vector<256xf32>
    %313 = vector.multi_reduction <minimumf>, %306, %cst_75 [0] : vector<128x256xf32> to vector<256xf32>
    %314 = vector.shape_cast %313 : vector<256xf32> to vector<1x256xf32>
    %315 = arith.minimumf %312, %314 : vector<1x256xf32>
    %316 = vector.broadcast %315 : vector<1x256xf32> to vector<8x256xf32>
    %317 = arith.cmpf oeq, %304, %316 : vector<8x256xf32>
    %c136_i32_76 = arith.constant 136 : i32
    %318 = vector.broadcast %c136_i32_76 : i32 to vector<8x256xi32>
    %319 = arith.select %317, %307, %318 : vector<8x256xi1>, vector<8x256xi32>
    %cst_77 = arith.constant dense<2147483647> : vector<256xi32>
    %320 = vector.multi_reduction <minsi>, %319, %cst_77 [0] : vector<8x256xi32> to vector<256xi32>
    %321 = vector.shape_cast %320 : vector<256xi32> to vector<1x256xi32>
    %322 = vector.broadcast %315 : vector<1x256xf32> to vector<128x256xf32>
    %323 = arith.cmpf oeq, %306, %322 : vector<128x256xf32>
    %c136_i32_78 = arith.constant 136 : i32
    %324 = vector.broadcast %c136_i32_78 : i32 to vector<128x256xi32>
    %325 = arith.select %323, %310, %324 : vector<128x256xi1>, vector<128x256xi32>
    %cst_79 = arith.constant dense<2147483647> : vector<256xi32>
    %326 = vector.multi_reduction <minsi>, %325, %cst_79 [0] : vector<128x256xi32> to vector<256xi32>
    %327 = vector.shape_cast %326 : vector<256xi32> to vector<1x256xi32>
    %328 = arith.minsi %321, %327 : vector<1x256xi32>
    %329 = vector.broadcast %328 : vector<1x256xi32> to vector<8x256xi32>
    %330 = arith.cmpi eq, %307, %329 : vector<8x256xi32>
    %331 = vector.broadcast %328 : vector<1x256xi32> to vector<128x256xi32>
    %332 = arith.cmpi eq, %310, %331 : vector<128x256xi32>
    %333 = arith.extui %332 : vector<128x256xi1> to vector<128x256xi32>
    %334 = arith.sitofp %333 : vector<128x256xi32> to vector<128x256xf32>
    %cst_80 = arith.constant dense<0.000000e+00> : vector<3x256xf32>
    %335 = tpu.matmul %33, %334, %cst_80 {dimension_numbers = #tpu.dot_dimension_numbers<[1], [0], [0], [1], [0, 0, 1, 1], [], []>} : vector<3x128xf32>, vector<128x256xf32>, vector<3x256xf32> -> vector<3x256xf32>
    %336 = arith.extui %330 : vector<8x256xi1> to vector<8x256xi32>
    %337 = arith.sitofp %336 : vector<8x256xi32> to vector<8x256xf32>
    %338 = vector.extract_strided_slice %335 {offsets = [0, 0], sizes = [1, 256], strides = [1, 1]} : vector<3x256xf32> to vector<1x256xf32>
    %339 = arith.mulf %44, %337 : vector<8x256xf32>
    %cst_81 = arith.constant dense<0.000000e+00> : vector<256xf32>
    %340 = vector.multi_reduction <add>, %339, %cst_81 [0] : vector<8x256xf32> to vector<256xf32>
    %341 = vector.shape_cast %340 : vector<256xf32> to vector<1x256xf32>
    %342 = arith.addf %338, %341 : vector<1x256xf32>
    %343 = vector.extract_strided_slice %335 {offsets = [1, 0], sizes = [1, 256], strides = [1, 1]} : vector<3x256xf32> to vector<1x256xf32>
    %344 = arith.mulf %45, %337 : vector<8x256xf32>
    %cst_82 = arith.constant dense<0.000000e+00> : vector<256xf32>
    %345 = vector.multi_reduction <add>, %344, %cst_82 [0] : vector<8x256xf32> to vector<256xf32>
    %346 = vector.shape_cast %345 : vector<256xf32> to vector<1x256xf32>
    %347 = arith.addf %343, %346 : vector<1x256xf32>
    %348 = vector.extract_strided_slice %335 {offsets = [2, 0], sizes = [1, 256], strides = [1, 1]} : vector<3x256xf32> to vector<1x256xf32>
    %349 = arith.mulf %46, %337 : vector<8x256xf32>
    %cst_83 = arith.constant dense<0.000000e+00> : vector<256xf32>
    %350 = vector.multi_reduction <add>, %349, %cst_83 [0] : vector<8x256xf32> to vector<256xf32>
    %351 = vector.shape_cast %350 : vector<256xf32> to vector<1x256xf32>
    %352 = arith.addf %348, %351 : vector<1x256xf32>
    %353 = vector.broadcast %c4_i32 : i32 to vector<8x256xi32>
    %354 = arith.cmpi eq, %307, %353 : vector<8x256xi32>
    %355 = vector.shape_cast %315 : vector<1x256xf32> to vector<1x256xf32>
    %356 = vector.broadcast %355 : vector<1x256xf32> to vector<8x256xf32>
    %357 = arith.select %354, %356, %293 : vector<8x256xi1>, vector<8x256xf32>
    %358 = vector.shape_cast %342 : vector<1x256xf32> to vector<1x256xf32>
    %359 = vector.broadcast %358 : vector<1x256xf32> to vector<8x256xf32>
    %360 = arith.select %354, %359, %296 : vector<8x256xi1>, vector<8x256xf32>
    %361 = vector.shape_cast %347 : vector<1x256xf32> to vector<1x256xf32>
    %362 = vector.broadcast %361 : vector<1x256xf32> to vector<8x256xf32>
    %363 = arith.select %354, %362, %299 : vector<8x256xi1>, vector<8x256xf32>
    %364 = vector.shape_cast %352 : vector<1x256xf32> to vector<1x256xf32>
    %365 = vector.broadcast %364 : vector<1x256xf32> to vector<8x256xf32>
    %366 = arith.select %354, %365, %302 : vector<8x256xi1>, vector<8x256xf32>
    %cst_84 = arith.constant 0x7F800000 : f32
    %367 = vector.broadcast %cst_84 : f32 to vector<8x256xf32>
    %368 = arith.select %330, %367, %304 : vector<8x256xi1>, vector<8x256xf32>
    %cst_85 = arith.constant 0x7F800000 : f32
    %369 = vector.broadcast %cst_85 : f32 to vector<128x256xf32>
    %370 = arith.select %332, %369, %306 : vector<128x256xi1>, vector<128x256xf32>
    %c5_i32 = arith.constant 5 : i32
    %c0_i32_86 = arith.constant 0 : i32
    %371 = arith.cmpi slt, %arg2, %c0_i32_86 : i32
    %372 = arith.extui %371 : i1 to i32
    %c0_i32_87 = arith.constant 0 : i32
    %373 = arith.cmpi ne, %372, %c0_i32_87 : i32
    scf.if %373 {
      %c0_90 = arith.constant 0 : index
      %c0_91 = arith.constant 0 : index
      %377 = vector.load %arg6[%c0_90, %c0_91] : memref<8x256xf32, #tpu.memory_space<vmem>>, vector<8x256xf32>
      tpu.vector_store %arg6[%c0_90, %c0_91], %357 {strides = array<i32>} : memref<8x256xf32, #tpu.memory_space<vmem>>, vector<8x256xf32>,
      %c0_92 = arith.constant 0 : index
      %c0_93 = arith.constant 0 : index
      %378 = vector.load %arg7[%c0_92, %c0_93] : memref<8x256xf32, #tpu.memory_space<vmem>>, vector<8x256xf32>
      tpu.vector_store %arg7[%c0_92, %c0_93], %360 {strides = array<i32>} : memref<8x256xf32, #tpu.memory_space<vmem>>, vector<8x256xf32>,
      %c0_94 = arith.constant 0 : index
      %c0_95 = arith.constant 0 : index
      %379 = vector.load %arg8[%c0_94, %c0_95] : memref<8x256xf32, #tpu.memory_space<vmem>>, vector<8x256xf32>
      tpu.vector_store %arg8[%c0_94, %c0_95], %363 {strides = array<i32>} : memref<8x256xf32, #tpu.memory_space<vmem>>, vector<8x256xf32>,
      %c0_96 = arith.constant 0 : index
      %c0_97 = arith.constant 0 : index
      %380 = vector.load %arg9[%c0_96, %c0_97] : memref<8x256xf32, #tpu.memory_space<vmem>>, vector<8x256xf32>
      tpu.vector_store %arg9[%c0_96, %c0_97], %366 {strides = array<i32>} : memref<8x256xf32, #tpu.memory_space<vmem>>, vector<8x256xf32>,
    } else {
    }
    %c0_i32_88 = arith.constant 0 : i32
    %374 = arith.cmpi eq, %arg2, %c0_i32_88 : i32
    %375 = arith.extui %374 : i1 to i32
    %c0_i32_89 = arith.constant 0 : i32
    %376 = arith.cmpi ne, %375, %c0_i32_89 : i32
    scf.if %376 {
      %cst_90 = arith.constant dense<0.000000e+00> : vector<256xf32>
      %377 = vector.multi_reduction <add>, %360, %cst_90 [0] : vector<8x256xf32> to vector<256xf32>
      %378 = vector.shape_cast %377 : vector<256xf32> to vector<1x256xf32>
      %cst_91 = arith.constant 2.000000e-01 : f32
      %379 = vector.broadcast %cst_91 : f32 to vector<1x256xf32>
      %380 = arith.mulf %378, %379 : vector<1x256xf32>
      %c0_92 = arith.constant 0 : index
      %c0_93 = arith.constant 0 : index
      %c0_94 = arith.constant 0 : index
      %381 = vector.load %arg5[%c0_92, %c0_93, %c0_94] : memref<1x3x256xf32, #tpu.memory_space<vmem>>, vector<1x1x256xf32>
      %382 = vector.shape_cast %381 : vector<1x1x256xf32> to vector<1x256xf32>
      %383 = vector.shape_cast %380 : vector<1x256xf32> to vector<1x1x256xf32>
      tpu.vector_store %arg5[%c0_92, %c0_93, %c0_94], %383 {strides = array<i32>} : memref<1x3x256xf32, #tpu.memory_space<vmem>>, vector<1x1x256xf32>,
      %cst_95 = arith.constant dense<0.000000e+00> : vector<256xf32>
      %384 = vector.multi_reduction <add>, %363, %cst_95 [0] : vector<8x256xf32> to vector<256xf32>
      %385 = vector.shape_cast %384 : vector<256xf32> to vector<1x256xf32>
      %cst_96 = arith.constant 2.000000e-01 : f32
      %386 = vector.broadcast %cst_96 : f32 to vector<1x256xf32>
      %387 = arith.mulf %385, %386 : vector<1x256xf32>
      %c0_97 = arith.constant 0 : index
      %c1 = arith.constant 1 : index
      %c0_98 = arith.constant 0 : index
      %388 = vector.load %arg5[%c0_97, %c1, %c0_98] : memref<1x3x256xf32, #tpu.memory_space<vmem>>, vector<1x1x256xf32>
      %389 = vector.shape_cast %388 : vector<1x1x256xf32> to vector<1x256xf32>
      %390 = vector.shape_cast %387 : vector<1x256xf32> to vector<1x1x256xf32>
      tpu.vector_store %arg5[%c0_97, %c1, %c0_98], %390 {strides = array<i32>} : memref<1x3x256xf32, #tpu.memory_space<vmem>>, vector<1x1x256xf32>,
      %cst_99 = arith.constant dense<0.000000e+00> : vector<256xf32>
      %391 = vector.multi_reduction <add>, %366, %cst_99 [0] : vector<8x256xf32> to vector<256xf32>
      %392 = vector.shape_cast %391 : vector<256xf32> to vector<1x256xf32>
      %cst_100 = arith.constant 2.000000e-01 : f32
      %393 = vector.broadcast %cst_100 : f32 to vector<1x256xf32>
      %394 = arith.mulf %392, %393 : vector<1x256xf32>
      %c0_101 = arith.constant 0 : index
      %c2 = arith.constant 2 : index
      %c0_102 = arith.constant 0 : index
      %395 = vector.load %arg5[%c0_101, %c2, %c0_102] : memref<1x3x256xf32, #tpu.memory_space<vmem>>, vector<1x1x256xf32>
      %396 = vector.shape_cast %395 : vector<1x1x256xf32> to vector<1x256xf32>
      %397 = vector.shape_cast %394 : vector<1x256xf32> to vector<1x1x256xf32>
      tpu.vector_store %arg5[%c0_101, %c2, %c0_102], %397 {strides = array<i32>} : memref<1x3x256xf32, #tpu.memory_space<vmem>>, vector<1x1x256xf32>,
    } else {
    }
    return
  }
  func.func @transform_0(%arg0: i32, %arg1: i32, %arg2: i32) -> (i32, i32, i32) {
    %c0_i32 = arith.constant 0 : i32
    %c0_i32_0 = arith.constant 0 : i32
    return %arg0, %arg2, %c0_i32 : i32, i32, i32
  }
  func.func @transform_1(%arg0: i32, %arg1: i32, %arg2: i32) -> (i32, i32, i32) {
    %c0_i32 = arith.constant 0 : i32
    %c0_i32_0 = arith.constant 0 : i32
    return %arg0, %c0_i32, %arg2 : i32, i32, i32
  }
  func.func @transform_2(%arg0: i32, %arg1: i32, %arg2: i32) -> (i32, i32, i32) {
    %c0_i32 = arith.constant 0 : i32
    %c0_i32_0 = arith.constant 0 : i32
    return %arg0, %c0_i32, %arg1 : i32, i32, i32
  }
}

</mosaic_0001>

<bundles_post_ra>
// kernel: tpu_custom_call.1
= control target key start
LH: loop header
LB: loop body
LE: loop exit
PB: predicated region body
PF: predicated region fallthrough
CT: control target
= control target key end

     0   :  { %s3995_s9 = smov 0   ;;  %s3997_s10 = smov 0   ;;  %s7163_s0 = inlined_call_operand.vmem [shape: f32[2,128,2], index: 0, kind: input, shape index: {}]   ;;  %s7164_s1 = inlined_call_operand.vmem [shape: f32[2,3,128], index: 1, kind: input, shape index: {}]   ;;  %s7165_s2 = inlined_call_operand.vmem [shape: f32[2,3,256], index: 2, kind: output, shape index: {}]  }
   0x1   :  { %s3999_s11 = smov 0  }
   0x2 LB: > { %s31_s12 = sadd.s32 1, %s3968_s10  ;;  %p3386_p0 = scmp.ge.s32.totalorder %s3972_s11, 1  ;;  %s3972_s11 = sphi %s3999_s11, %s12_s11   ;;  %s3968_s10 = sphi %s3997_s10, %s7518_s10   ;;  %s3964_s9 = sphi %s3995_s9, %s7517_s9  }
   0x3   : > { %p33_p1 = scmp.ge.s32.totalorder %s31_s12, 2  ;;  %p154_p2 = scmp.lt.s32.totalorder %s3972_s11, 3 }
   0x5   : > { %s7520_s12 = smov (%p33_p1, %s31_s12), 0  ;;  %p155_p3 = pnand %p3386_p0, %p154_p2 }
   0x7   : > { %158 = sbr.rel (%p155_p3) target bundleno = 930 (0x3a2), region = 28 }
   0xe   : > { %p192_p4 = scmp.lt.s32.totalorder %s3964_s9, 1  ;;  %v3974_v0 = vmov 0   ;;  %v7166_v1 = vmov 0.0   ;;  %v3976_v7 = vmov 1   ;;  %v7168_v19 = vlaneseq }
   0xf   : > { %3933 = vset.pattern.permute.xlu1 %v3974_v0  ;;  %3932 = vset.pattern.permute.xlu0 %v3974_v0 }
  0x10   : > { %s7522_s9 = smov (!%p192_p4, %s3964_s9), 1  ;;  %1017 = vmatprep.mubr.f32.mxu0 %v7166_v1  ;;  %1529 = vmatprep.mubr.f32.mxu1 %v7166_v1  ;;  %v232_v20 = vand.u32 127, %v7168_v19 }
  0x11   : > { %s3730_s13 = sshll.u32 %s7522_s9, 7  ;;  %s3389_s17 = sshll.u32 %s7522_s9, 2 }
  0x12   : > { %s4023_s16 = scalar_lea.vmem %s7163_s0, %s3730_s13  ;;  %v233_v21 = vadd.s32 128, %v232_v20  ;;  %v237_v22 = vcvt.s32.f32 %v232_v20  ;;  %s4940_s20 = scalar_lea.vmem %s7164_s1, %s3389_s17 }
  0x13   : > { %v272_v2 = vld [vmem:[%s4023_s16 + $0x10] sm:$0xff]  ;;  %v270_v3 = vld [vmem:[%s4023_s16] sm:$0xff]  ;;  %v273_v4 = vld [vmem:[%s4023_s16 + $0x18] sm:$0xff]  ;;  %s3731_s21 = sshll.u32 %s7522_s9, 3 }
  0x14   : > { %299 = vperm.xlu1 %3933, %v272_v2   ;;  %289 = vperm.xlu0 %3932, %v270_v3   ;;  %v271_v5 = vld [vmem:[%s4023_s16 + $0x8] sm:$0xff]  ;;  %v276_v8 = vld [vmem:[%s4023_s16 + $0x30] sm:$0xff]  ;;  %v274_v10 = vld [vmem:[%s4023_s16 + $0x20] sm:$0xff]  ;;  %v238_v23 = vcvt.s32.f32 %v233_v21  ;;  %v240_v24 = vmul.f32 0.0625, %v237_v22  ;;  %s216_s24 = scalar_lea.vmem %s7165_s2, %s3731_s21 }
  0x15   : > { %v275_v6 = vld [vmem:[%s4023_s16 + $0x28] sm:$0xff]  ;;  %v280_v11 = vld [vmem:[%s4023_s16 + $0x50] sm:$0xff]  ;;  %v277_v14 = vld [vmem:[%s4023_s16 + $0x38] sm:$0xff] }
  0x16   : > { %v279_v9 = vld [vmem:[%s4023_s16 + $0x48] sm:$0xff]  ;;  %v284_v13 = vld [vmem:[%s4023_s16 + $0x70] sm:$0xff]  ;;  %v278_v15 = vld [vmem:[%s4023_s16 + $0x40] sm:$0xff]  ;;  %v241_v25 = vmul.f32 0.0625, %v238_v23  ;;  %v242_v28 = vfloor.f32 %v240_v24 }
  0x17   : > { %v283_v12 = vld [vmem:[%s4023_s16 + $0x68] sm:$0xff]  ;;  %v281_v16 = vld [vmem:[%s4023_s16 + $0x58] sm:$0xff]  ;;  %v282_v17 = vld [vmem:[%s4023_s16 + $0x60] sm:$0xff] }
  0x18   : > { %304 = vperm.xlu1 %3933, %v273_v4   ;;  %294 = vperm.xlu0 %3932, %v271_v5   ;;  %v285_v18 = vld [vmem:[%s4023_s16 + $0x78] sm:$0xff]  ;;  %v243_v29 = vfloor.f32 %v241_v25  ;;  %v244_v32 = vmul.f32 16.0, %v242_v28 }
  0x1a   : > { %v245_v33 = vmul.f32 16.0, %v243_v29  ;;  %vm246_vm0 = vcmp.gt.f32.partialorder %v244_v32, %v237_v22 }
  0x1b   : > { %v3392_v36 = vsel %vm246_vm0, 1.0, %v7166_v1 }
  0x1c   : > { %3934 = vset.pattern.permute.xlu1 %v3976_v7  ;;  %314 = vperm.xlu0 %3932, %v275_v6   ;;  %vm247_vm1 = vcmp.gt.f32.partialorder %v245_v33, %v238_v23  ;;  %v252_v39 = vsub.f32 %v242_v28, %v3392_v36 }
  0x1d   : > { %404 = vperm.xlu1 %3934, %v271_v5   ;;  %v3393_v37 = vsel %vm247_vm1, 1.0, %v7166_v1 }
  0x1e   : > { %v253_v40 = vsub.f32 %v243_v29, %v3393_v37  ;;  %v254_v43 = vadd.f32 1.0, %v252_v39 }
  0x20   : > { %319 = vperm.xlu0 %3932, %v276_v8   ;;  %v255_v44 = vadd.f32 1.0, %v253_v40  ;;  %v256_v46 = vmul.f32 16.0, %v254_v43 }
  0x21   : > { %408 = vperm.xlu1 %3934, %v272_v2  }
  0x22   : > { %v257_v47 = vmul.f32 16.0, %v255_v44  ;;  %vm258_vm2 = vcmp.le.f32.partialorder %v256_v46, %v237_v22 }
  0x23   : > { %v3394_v51 = vsel %vm258_vm2, 1.0, %v7166_v1 }
  0x24   : > { %334 = vperm.xlu0 %3932, %v279_v9   ;;  %vm259_vm3 = vcmp.le.f32.partialorder %v257_v47, %v238_v23  ;;  %v4064_v54 = vadd.f32 %v3394_v51, %v252_v39 }
  0x25   : > { %3935 = vset.pattern.permute.xlu1 %v3974_v0  ;;  %v3395_v52 = vsel %vm259_vm3, 1.0, %v7166_v1 }
  0x26   : > { %309 = vperm.xlu1 %3935, %v274_v10   ;;  %v4066_v55 = vadd.f32 %v3395_v52, %v253_v40  ;;  %v266_v57 = vmul.f32 16.0, %v4064_v54 }
  0x28   : > { %339 = vperm.xlu0 %3932, %v280_v11   ;;  %v267_v58 = vmul.f32 16.0, %v4066_v55  ;;  %v4076_v61 = vsub.f32 %v237_v22, %v266_v57 }
  0x2a   : > { %3936 = vset.pattern.permute.xlu1 %v3976_v7  ;;  %v4078_v62 = vsub.f32 %v238_v23, %v267_v58 }
  0x2b   : > { %416 = vperm.xlu1 %3936, %v274_v10  }
  0x2c   : > { %354 = vperm.xlu0 %3932, %v283_v12  }
  0x2f   : > { %420 = vperm.xlu1 %3936, %v275_v6  }
  0x30   : > { %359 = vperm.xlu0 %3932, %v284_v13  }
  0x33   : > { %3937 = vset.pattern.permute.xlu1 %v3974_v0 }
  0x34   : > { %324 = vperm.xlu1 %3937, %v277_v14   ;;  %3945 = vset.pattern.permute.xlu0 %v3976_v7 }
  0x35   : > { %400 = vperm.xlu0 %3945, %v270_v3  }
  0x38   : > { %3938 = vset.pattern.permute.xlu1 %v3976_v7 }
  0x39   : > { %428 = vperm.xlu1 %3938, %v277_v14   ;;  %412 = vperm.xlu0 %3945, %v273_v4  }
  0x3d   : > { %3939 = vset.pattern.permute.xlu1 %v3974_v0  ;;  %424 = vperm.xlu0 %3945, %v276_v8  }
  0x3e   : > { %329 = vperm.xlu1 %3939, %v278_v15  }
  0x41   : > { %440 = vperm.xlu0 %3945, %v280_v11  }
  0x42   : > { %3940 = vset.pattern.permute.xlu1 %v3976_v7 }
  0x43   : > { %432 = vperm.xlu1 %3940, %v278_v15  }
  0x45   : > { %456 = vperm.xlu0 %3945, %v284_v13  }
  0x47   : > { %436 = vperm.xlu1 %3940, %v279_v9  }
  0x4b   : > { %3941 = vset.pattern.permute.xlu1 %v3974_v0 }
  0x4c   : > { %344 = vperm.xlu1 %3941, %v281_v16  }
  0x50   : > { %3942 = vset.pattern.permute.xlu1 %v3976_v7 }
  0x51   : > { %444 = vperm.xlu1 %3942, %v281_v16  }
  0x55   : > { %3943 = vset.pattern.permute.xlu1 %v3974_v0 }
  0x56   : > { %349 = vperm.xlu1 %3943, %v282_v17  }
  0x5a   : > { %3944 = vset.pattern.permute.xlu1 %v3976_v7 }
  0x5b   : > { %448 = vperm.xlu1 %3944, %v282_v17  }
  0x5f   : > { %452 = vperm.xlu1 %3944, %v283_v12  }
  0x63   : > { %3946 = vset.pattern.permute.xlu1 %v3974_v0 }
  0x64   : > { %364 = vperm.xlu1 %3946, %v285_v18  }
  0x68   : > { %3947 = vset.pattern.permute.xlu1 %v3976_v7 }
  0x69   : > { %460 = vperm.xlu1 %3947, %v285_v18  }
  0x93   : > { %v300_v26 = vpop.permute.xlu1 %299  ;;  %v290_v27 = vpop.permute.xlu0 %289 }
  0x94   : > { %v371_v5 = vsub.f32 %v4076_v61, %v300_v26  ;;  %v372_v6 = vsub.f32 %v4078_v62, %v300_v26  ;;  %v367_v10 = vsub.f32 %v4076_v61, %v290_v27  ;;  %v368_v11 = vsub.f32 %v4078_v62, %v290_v27 }
  0x95   : > { %v3977_v26 = vmov inf  }
  0x96   : > { %v4100_v27 = vrot.slane %v3977_v26, 4  ;;  %v499_v28 = vmul.f32 %v371_v5, %v371_v5  ;;  %v500_v29 = vmul.f32 %v372_v6, %v372_v6 }
  0x97   : > { %v305_v30 = vpop.permute.xlu1 %304  ;;  %v295_v31 = vpop.permute.xlu0 %294 }
  0x98   : > { %v369_v0 = vsub.f32 %v4076_v61, %v295_v31  ;;  %v370_v2 = vsub.f32 %v4078_v62, %v295_v31  ;;  %v373_v12 = vsub.f32 %v4076_v61, %v305_v30  ;;  %v374_v13 = vsub.f32 %v4078_v62, %v305_v30 }
  0x99   : > { %v495_v30 = vmul.f32 %v367_v10, %v367_v10  ;;  %v496_v31 = vmul.f32 %v368_v11, %v368_v11 }
  0x9a   : > { %v497_v14 = vmul.f32 %v369_v0, %v369_v0  ;;  %v498_v15 = vmul.f32 %v370_v2, %v370_v2  ;;  %v501_v32 = vmul.f32 %v373_v12, %v373_v12  ;;  %v502_v33 = vmul.f32 %v374_v13, %v374_v13 }
  0x9b   : > { %v315_v35 = vpop.permute.xlu0 %314 }
  0x9c   : > { %v405_v34 = vpop.permute.xlu1 %404  ;;  %v377_v16 = vsub.f32 %v4076_v61, %v315_v35  ;;  %v378_v17 = vsub.f32 %v4078_v62, %v315_v35 }
  0x9d   : > { %v465_v3 = vsub.f32 %v4064_v54, %v405_v34  ;;  %v466_v4 = vsub.f32 %v4066_v55, %v405_v34 }
  0x9e   : > { %v505_v34 = vmul.f32 %v377_v16, %v377_v16  ;;  %v506_v35 = vmul.f32 %v378_v17, %v378_v17 }
  0x9f   : > { %v320_v41 = vpop.permute.xlu0 %319  ;;  %v529_v20 = vmul.f32 %v465_v3, %v465_v3  ;;  %v530_v21 = vmul.f32 %v466_v4, %v466_v4 }
  0xa0   : > { %v409_v38 = vpop.permute.xlu1 %408  ;;  %v379_v22 = vsub.f32 %v4076_v61, %v320_v41  ;;  %v380_v23 = vsub.f32 %v4078_v62, %v320_v41 }
  0xa1   : > { %v467_v7 = vsub.f32 %v4064_v54, %v409_v38  ;;  %v468_v8 = vsub.f32 %v4066_v55, %v409_v38  ;;  %v4104_v38 = vadd.f32 %v529_v20, %v497_v14  ;;  %v4106_v39 = vadd.f32 %v530_v21, %v498_v15 }
  0xa2   : > { %v4108_v40 = vmul.f32 %v379_v22, %v379_v22  ;;  %v4110_v41 = vmul.f32 %v380_v23, %v380_v23 }
  0xa3   : > { %v4052_v45 = vpop.permute.xlu0 %334  ;;  %v531_v24 = vmul.f32 %v467_v7, %v467_v7  ;;  %v532_v25 = vmul.f32 %v468_v8, %v468_v8 }
  0xa4   : > { %v385_v46 = vsub.f32 %v4076_v61, %v4052_v45  ;;  %v386_v47 = vsub.f32 %v4078_v62, %v4052_v45 }
  0xa5   : > { %v4050_v42 = vpop.permute.xlu1 %309  ;;  %v4112_v43 = vadd.f32 %v531_v24, %v499_v28  ;;  %v4114_v44 = vadd.f32 %v532_v25, %v500_v29 }
  0xa6   : > { %v375_v51 = vsub.f32 %v4076_v61, %v4050_v42  ;;  %v376_v52 = vsub.f32 %v4078_v62, %v4050_v42  ;;  %v4142_v8 = vmul.f32 %v385_v46, %v385_v46 }
  0xa7   : > { %v4056_v49 = vpop.permute.xlu0 %339 }
  0xa8   : > { %v387_v0 = vsub.f32 %v4076_v61, %v4056_v49  ;;  %v388_v2 = vsub.f32 %v4078_v62, %v4056_v49  ;;  %v4144_v49 = vmul.f32 %v386_v47, %v386_v47  ;;  %v503_v11 = vmul.f32 %v375_v51, %v375_v51 }
  0xaa   : > { %v4054_v48 = vpop.permute.xlu1 %416  ;;  %v4150_v14 = vmul.f32 %v387_v0, %v387_v0  ;;  %v4152_v15 = vmul.f32 %v388_v2, %v388_v2 }
  0xab   : > { %v4068_v56 = vpop.permute.xlu0 %354  ;;  %v471_v4 = vsub.f32 %v4064_v54, %v4054_v48  ;;  %v472_v42 = vsub.f32 %v4066_v55, %v4054_v48  ;;  %v504_v48 = vmul.f32 %v376_v52, %v376_v52 }
  0xac   : > { %v393_v5 = vsub.f32 %v4076_v61, %v4068_v56  ;;  %v394_v6 = vsub.f32 %v4078_v62, %v4068_v56 }
  0xad   : > { %v535_v20 = vmul.f32 %v471_v4, %v471_v4  ;;  %v536_v21 = vmul.f32 %v472_v42, %v472_v42 }
  0xae   : > { %v4058_v50 = vpop.permute.xlu1 %420  ;;  %v4154_v22 = vmul.f32 %v393_v5, %v393_v5  ;;  %v4156_v23 = vmul.f32 %v394_v6, %v394_v6 }
  0xaf   : > { %v4074_v60 = vpop.permute.xlu0 %359  ;;  %v474_v10 = vsub.f32 %v4066_v55, %v4058_v50 }
  0xb0   : > { %v396_v26 = vsub.f32 %v4078_v62, %v4074_v60 }
  0xb1   : > { %v538_v25 = vmul.f32 %v474_v10, %v474_v10 }
  0xb3   : > { %v4062_v53 = vpop.permute.xlu1 %324 }
  0xb4   : > { %v401_v9 = vpop.permute.xlu0 %400  ;;  %v382_v0 = vsub.f32 %v4078_v62, %v4062_v53 }
  0xb5   : > { %v463_v3 = vsub.f32 %v4064_v54, %v401_v9  ;;  %v464_v45 = vsub.f32 %v4066_v55, %v401_v9  ;;  %v473_v9 = vsub.f32 %v4064_v54, %v4058_v50  ;;  %v395_v50 = vsub.f32 %v4076_v61, %v4074_v60 }
  0xb6   : > { %v4176_v60 = vadd.f32 %v535_v20, %v503_v11  ;;  %v510_v11 = vmul.f32 %v382_v0, %v382_v0 }
  0xb7   : > { %v527_v56 = vmul.f32 %v463_v3, %v463_v3  ;;  %v528_v16 = vmul.f32 %v464_v45, %v464_v45  ;;  %v537_v24 = vmul.f32 %v473_v9, %v473_v9  ;;  %v4188_v2 = vmul.f32 %v395_v50, %v395_v50 }
  0xb8   : > { %v4072_v59 = vpop.permute.xlu1 %428  ;;  %v413_v36 = vpop.permute.xlu0 %412  ;;  %7288 = vst [vmem:[#allocation6_spill] sm:$0xff] %v4176_v60  ;;  %v4190_v3 = vmul.f32 %v396_v26, %v396_v26 }
  0xb9   : > { %v469_v57 = vsub.f32 %v4064_v54, %v413_v36  ;;  %v470_v58 = vsub.f32 %v4066_v55, %v413_v36  ;;  %v4168_v51 = vadd.f32 %v527_v56, %v495_v30  ;;  %v4170_v52 = vadd.f32 %v528_v16, %v496_v31 }
  0xba   : > { %v4184_v30 = vadd.f32 %v537_v24, %v505_v34  ;;  %v4186_v31 = vadd.f32 %v538_v25, %v506_v35 }
  0xbb   : > { %v533_v12 = vmul.f32 %v469_v57, %v469_v57  ;;  %v534_v13 = vmul.f32 %v470_v58, %v470_v58  ;;  %v477_v57 = vsub.f32 %v4064_v54, %v4072_v59  ;;  %v478_v58 = vsub.f32 %v4066_v55, %v4072_v59 }
  0xbc   : > { %v425_v17 = vpop.permute.xlu0 %424  ;;  %7290 = vst [vmem:[#allocation8_spill] sm:$0xff] %v4184_v30  ;;  %7291 = vst [vmem:[#allocation9_spill] sm:$0xff] %v4186_v31  ;;  %v664_v34 = vmin.f32 %v4170_v52, %v4114_v44 }
  0xbd   : > { %v4080_v63 = vpop.permute.xlu1 %329  ;;  %v4162_v29 = vadd.f32 %v533_v12, %v501_v32  ;;  %v4164_v36 = vadd.f32 %v534_v13, %v502_v33  ;;  %v475_v46 = vsub.f32 %v4064_v54, %v425_v17  ;;  %v476_v47 = vsub.f32 %v4066_v55, %v425_v17 }
  0xbe   : > { %v4178_v32 = vadd.f32 %v536_v21, %v504_v48  ;;  %v381_v33 = vsub.f32 %v4076_v61, %v4062_v53  ;;  %v643_v53 = vmin.f32 %v4168_v51, %v4112_v43  ;;  %v541_v35 = vmul.f32 %v477_v57, %v477_v57 }
  0xbf   : > { %v644_v59 = vmin.f32 %v4104_v38, %v4162_v29  ;;  %v665_v45 = vmin.f32 %v4106_v39, %v4164_v36  ;;  %v539_v4 = vmul.f32 %v475_v46, %v475_v46  ;;  %v540_v42 = vmul.f32 %v476_v47, %v476_v47 }
  0xc0   : > { %7289 = vst [vmem:[#allocation7_spill] sm:$0xff] %v4178_v32  ;;  %v441_v5 = vpop.permute.xlu0 %440  ;;  %v542_v9 = vmul.f32 %v478_v58, %v478_v58  ;;  %v509_v10 = vmul.f32 %v381_v33, %v381_v33  ;;  %v383_v13 = vsub.f32 %v4076_v61, %v4080_v63  ;;  %v384_v56 = vsub.f32 %v4078_v62, %v4080_v63 }
  0xc1   : > { %v483_v16 = vsub.f32 %v4064_v54, %v441_v5  ;;  %v484_v17 = vsub.f32 %v4066_v55, %v441_v5  ;;  %v4211_v20 = vmin.f32 %v644_v59, %v4184_v30  ;;  %v4214_v21 = vmin.f32 %v665_v45, %v4186_v31 }
  0xc2   : > { %v4096_v18 = vpop.permute.xlu1 %432  ;;  %v4217_v24 = vadd.f32 %v539_v4, %v4108_v40  ;;  %v4222_v25 = vadd.f32 %v541_v35, %v509_v10  ;;  %v4224_v50 = vadd.f32 %v542_v9, %v510_v11  ;;  %v645_v63 = vmin.f32 %v643_v53, %v4176_v60 }
  0xc3   : > { %v479_v48 = vsub.f32 %v4064_v54, %v4096_v18  ;;  %v480_v12 = vsub.f32 %v4066_v55, %v4096_v18  ;;  %v4220_v18 = vadd.f32 %v540_v42, %v4110_v41  ;;  %v666_v26 = vmin.f32 %v664_v34, %v4178_v32 }
  0xc4   : > { %7292 = vst [vmem:[#allocation10_spill] sm:$0xff] %v4217_v24  ;;  %7294 = vst [vmem:[#allocation12_spill] sm:$0xff] %v4222_v25  ;;  %v511_v33 = vmul.f32 %v383_v13, %v383_v13  ;;  %v512_v41 = vmul.f32 %v384_v56, %v384_v56  ;;  %v547_v0 = vmul.f32 %v483_v16, %v483_v16  ;;  %v457_v53 = vpop.permute.xlu0 %456 }
  0xc5   : > { %7293 = vst [vmem:[#allocation11_spill] sm:$0xff] %v4220_v18  ;;  %7295 = vst [vmem:[#allocation13_spill] sm:$0xff] %v4224_v50  ;;  %v543_v47 = vmul.f32 %v479_v48, %v479_v48  ;;  %v544_v57 = vmul.f32 %v480_v12, %v480_v12  ;;  %v548_v59 = vmul.f32 %v484_v17, %v484_v17 }
  0xc6   : > { %v4102_v37 = vpop.permute.xlu1 %436  ;;  %v647_v45 = vmin.f32 %v645_v63, %v4217_v24  ;;  %v668_v4 = vmin.f32 %v666_v26, %v4220_v18  ;;  %v648_v42 = vmin.f32 %v4211_v20, %v4222_v25  ;;  %v669_v5 = vmin.f32 %v4214_v21, %v4224_v50 }
  0xc7   : > { %v481_v58 = vsub.f32 %v4064_v54, %v4102_v37  ;;  %v482_v40 = vsub.f32 %v4066_v55, %v4102_v37  ;;  %v4242_v11 = vadd.f32 %v543_v47, %v511_v33  ;;  %v4244_v48 = vadd.f32 %v544_v57, %v512_v41 }
  0xc8   : > { %v491_v20 = vsub.f32 %v4064_v54, %v457_v53  ;;  %v492_v21 = vsub.f32 %v4066_v55, %v457_v53 }
  0xc9   : > { %7296 = vst [vmem:[#allocation14_spill] sm:$0xff] %v4242_v11  ;;  %7297 = vst [vmem:[#allocation15_spill] sm:$0xff] %v4244_v48  ;;  %v545_v12 = vmul.f32 %v481_v58, %v481_v58  ;;  %v546_v13 = vmul.f32 %v482_v40, %v482_v40  ;;  %v649_v40 = vmin.f32 %v647_v45, %v4242_v11 }
  0xcb   : > { %v4140_v7 = vpop.permute.xlu1 %344  ;;  %v4259_v33 = vadd.f32 %v545_v12, %v4142_v8  ;;  %v556_v12 = vmul.f32 %v492_v21, %v492_v21 }
  0xcc   : > { %v389_v56 = vsub.f32 %v4076_v61, %v4140_v7  ;;  %v390_v16 = vsub.f32 %v4078_v62, %v4140_v7  ;;  %v670_v7 = vmin.f32 %v668_v4, %v4244_v48 }
  0xcd   : > { %7298 = vst [vmem:[#allocation16_spill] sm:$0xff] %v4259_v33 }
  0xce   : > { %v517_v53 = vmul.f32 %v389_v56, %v389_v56  ;;  %v518_v1 = vmul.f32 %v390_v16, %v390_v16 }
  0xd0   : > { %v445_v28 = vpop.permute.xlu1 %444 }
  0xd1   : > { %v485_v34 = vsub.f32 %v4064_v54, %v445_v28  ;;  %v486_v35 = vsub.f32 %v4066_v55, %v445_v28 }
  0xd3   : > { %v550_v47 = vmul.f32 %v486_v35, %v486_v35  ;;  %v4268_v35 = vadd.f32 %v548_v59, %v4152_v15 }
  0xd5   : > { %v350_v6 = vpop.permute.xlu1 %349  ;;  %7301 = vst [vmem:[#allocation19_spill] sm:$0xff] %v4268_v35  ;;  %v4272_v8 = vadd.f32 %v550_v47, %v518_v1  ;;  %v672_v56 = vmin.f32 %v670_v7, %v4268_v35  ;;  %v633_v47 = vrot.slane %v4100_v27, 2 }
  0xd6   : > { %v391_v17 = vsub.f32 %v4076_v61, %v350_v6  ;;  %v392_v28 = vsub.f32 %v4078_v62, %v350_v6  ;;  %v4262_v6 = vadd.f32 %v546_v13, %v4144_v49 }
  0xd7   : > { %7303 = vst [vmem:[#allocation21_spill] sm:$0xff] %v4272_v8 }
  0xd8   : > { %7299 = vst [vmem:[#allocation17_spill] sm:$0xff] %v4262_v6  ;;  %v519_v19 = vmul.f32 %v391_v17, %v391_v17  ;;  %v520_v50 = vmul.f32 %v392_v28, %v392_v28  ;;  %v671_v15 = vmin.f32 %v669_v5, %v4262_v6 }
  0xda   : > { %v449_v46 = vpop.permute.xlu1 %448 }
  0xdb   : > { %v487_v37 = vsub.f32 %v4064_v54, %v449_v46  ;;  %v488_v9 = vsub.f32 %v4066_v55, %v449_v46  ;;  %v549_v46 = vmul.f32 %v485_v34, %v485_v34  ;;  %v4265_v34 = vadd.f32 %v547_v0, %v4150_v14 }
  0xdc   : > { %v650_v0 = vmin.f32 %v648_v42, %v4259_v33  ;;  %v673_v42 = vmin.f32 %v671_v15, %v4272_v8 }
  0xdd   : > { %v551_v57 = vmul.f32 %v487_v37, %v487_v37  ;;  %v552_v58 = vmul.f32 %v488_v9, %v488_v9  ;;  %7300 = vst [vmem:[#allocation18_spill] sm:$0xff] %v4265_v34  ;;  %v4270_v4 = vadd.f32 %v549_v46, %v517_v53  ;;  %v651_v59 = vmin.f32 %v649_v40, %v4265_v34 }
  0xde   : > { %v453_v10 = vpop.permute.xlu1 %452 }
  0xdf   : > { %v489_v63 = vsub.f32 %v4064_v54, %v453_v10  ;;  %v490_v26 = vsub.f32 %v4066_v55, %v453_v10  ;;  %7302 = vst [vmem:[#allocation20_spill] sm:$0xff] %v4270_v4  ;;  %v4274_v9 = vadd.f32 %v551_v57, %v519_v19  ;;  %v4276_v49 = vadd.f32 %v552_v58, %v520_v50 }
  0xe0   : > { %v555_v10 = vmul.f32 %v491_v20, %v491_v20 }
  0xe1   : > { %v553_v45 = vmul.f32 %v489_v63, %v489_v63  ;;  %v554_v37 = vmul.f32 %v490_v26, %v490_v26  ;;  %7304 = vst [vmem:[#allocation22_spill] sm:$0xff] %v4274_v9  ;;  %7305 = vst [vmem:[#allocation23_spill] sm:$0xff] %v4276_v49  ;;  %v653_v5 = vmin.f32 %v651_v59, %v4274_v9 }
  0xe2   : > { %v674_v17 = vmin.f32 %v672_v56, %v4276_v49  ;;  %v4297_v63 = vadd.f32 %v555_v10, %v4188_v2 }
  0xe3   : > { %v365_v41 = vpop.permute.xlu1 %364  ;;  %v4285_v19 = vadd.f32 %v553_v45, %v4154_v22  ;;  %v4288_v50 = vadd.f32 %v554_v37, %v4156_v23  ;;  %v4300_v23 = vadd.f32 %v556_v12, %v4190_v3  ;;  %v7312_v12 = vlaneseq }
  0xe4   : > { %v397_v13 = vsub.f32 %v4076_v61, %v365_v41  ;;  %v398_v14 = vsub.f32 %v4078_v62, %v365_v41  ;;  %v652_v62 = vmin.f32 %v650_v0, %v4270_v4  ;;  %7308 = vst [vmem:[#allocation26_spill] sm:$0xff] %v4297_v63  ;;  %v655_v57 = vmin.f32 %v653_v5, %v4297_v63 }
  0xe5   : > { %7306 = vst [vmem:[#allocation24_spill] sm:$0xff] %v4285_v19  ;;  %7307 = vst [vmem:[#allocation25_spill] sm:$0xff] %v4288_v50  ;;  %v676_v58 = vmin.f32 %v674_v17, %v4300_v23  ;;  %v634_v41 = vmin.f32 %v4100_v27, %v633_v47 }
  0xe6   : > { %v525_v28 = vmul.f32 %v397_v13, %v397_v13  ;;  %v526_v20 = vmul.f32 %v398_v14, %v398_v14  ;;  %7309 = vst [vmem:[#allocation27_spill] sm:$0xff] %v4300_v23  ;;  %v4315_v13 = vshrl.u32 %v7312_v12, 7 }
  0xe7   : > { %v635_v14 = vrot.slane %v634_v41, 1 }
  0xe8   : > { %v461_v1 = vpop.permute.xlu1 %460  ;;  %7313 = vst [vmem:[#allocation30_spill] sm:$0xff] %v4315_v13  ;;  %v604_v27 = vadd.s32 32, %v4315_v13  ;;  %v605_v17 = vadd.s32 40, %v4315_v13 }
  0xe9   : > { %v493_v16 = vsub.f32 %v4064_v54, %v461_v1  ;;  %v494_v61 = vsub.f32 %v4066_v55, %v461_v1  ;;  %v654_v54 = vmin.f32 %v652_v62, %v4285_v19  ;;  %v675_v55 = vmin.f32 %v673_v42, %v4288_v50 }
  0xea   : > { %v4318_v1 = vadd.s32 8, %v4315_v13  ;;  %v4323_v62 = vmin.f32 %v634_v41, %v635_v14  ;;  %v4351_v14 = vadd.s32 8, %v605_v17 }
  0xeb   : > { %v557_v21 = vmul.f32 %v493_v16, %v493_v16  ;;  %v558_v22 = vmul.f32 %v494_v61, %v494_v61  ;;  %v602_v16 = vadd.s32 16, %v4315_v13  ;;  %v603_v61 = vadd.s32 24, %v4315_v13 }
  0xec   : > { %7314 = vst [vmem:[#allocation31_spill] sm:$0xff] %v4323_v62 }
  0xed   : > { %v4304_v26 = vadd.f32 %v557_v21, %v525_v28  ;;  %v4306_v46 = vadd.f32 %v558_v22, %v526_v20  ;;  %v606_v28 = vadd.s32 48, %v4315_v13  ;;  %v607_v20 = vadd.s32 56, %v4315_v13 }
  0xee   : > { %v608_v21 = vadd.s32 64, %v4315_v13  ;;  %v609_v22 = vadd.s32 72, %v4315_v13 }
  0xef   : > { %7310 = vst [vmem:[#allocation28_spill] sm:$0xff] %v4304_v26  ;;  %7311 = vst [vmem:[#allocation29_spill] sm:$0xff] %v4306_v46  ;;  %v656_v2 = vmin.f32 %v654_v54, %v4304_v26  ;;  %v677_v40 = vmin.f32 %v675_v55, %v4306_v46  ;;  %v610_v54 = vadd.s32 80, %v4315_v13 }
  0xf1   : > { %v657_v3 = vmin.f32 %v655_v57, %v656_v2  ;;  %v678_v7 = vmin.f32 %v676_v58, %v677_v40  ;;  %v611_v57 = vadd.s32 88, %v4315_v13  ;;  %v612_v58 = vadd.s32 96, %v4315_v13 }
  0xf2   : > { %v613_v2 = vadd.s32 104, %v4315_v13  ;;  %v614_v40 = vadd.s32 112, %v4315_v13 }
  0xf3   : > { %v658_v53 = vrot.slane %v657_v3, 4  ;;  %v679_v45 = vrot.slane %v678_v7, 4 }
  0xf5   : > { %v659_v37 = vmin.f32 %v657_v3, %v658_v53  ;;  %v680_v10 = vmin.f32 %v678_v7, %v679_v45  ;;  %v615_v3 = vadd.s32 120, %v4315_v13  ;;  %v4337_v7 = vadd.s32 8, %v4318_v1 }
  0xf6   : > { %v4345_v45 = vadd.s32 8, %v602_v16 }
  0xf7   : > { %v660_v0 = vrot.slane %v659_v37, 2  ;;  %v681_v15 = vrot.slane %v680_v10, 2 }
  0xf9   : > { %v661_v59 = vmin.f32 %v659_v37, %v660_v0  ;;  %v682_v56 = vmin.f32 %v680_v10, %v681_v15  ;;  %v4347_v37 = vadd.s32 8, %v603_v61  ;;  %v4349_v10 = vadd.s32 8, %v604_v27 }
  0xfa   : > { %v4353_v0 = vadd.s32 8, %v606_v28  ;;  %v4355_v15 = vadd.s32 8, %v607_v20  ;;  %v4365_v27 = vadd.s32 8, %v610_v54  ;;  %v4369_v28 = vadd.s32 8, %v612_v58  ;;  %v7319_v58 = vld [vmem:[#allocation13_spill] sm:$0xff] }
  0xfb   : > { %v662_v42 = vrot.slane %v661_v59, 1  ;;  %v683_v5 = vrot.slane %v682_v56, 1  ;;  %v4371_v20 = vadd.s32 8, %v613_v2 }
  0xfc   : > { %7316 = vst [vmem:[#allocation33_spill] sm:$0xff] %v4369_v28 }
  0xfd   : > { %v663_v55 = vmin.f32 %v661_v59, %v662_v42  ;;  %v684_v47 = vmin.f32 %v682_v56, %v683_v5  ;;  %v4359_v59 = vadd.s32 8, %v608_v21  ;;  %v4361_v56 = vadd.s32 8, %v609_v22  ;;  %7317 = vst [vmem:[#allocation34_spill] sm:$0xff] %v4371_v20 }
  0xfe   : > { %v4367_v42 = vadd.s32 8, %v611_v57  ;;  %v4375_v21 = vadd.s32 8, %v615_v3 }
  0xff   : > { %v4340_v41 = vmin.f32 %v4323_v62, %v663_v55  ;;  %v4343_v53 = vmin.f32 %v4323_v62, %v684_v47  ;;  %v4373_v55 = vadd.s32 8, %v614_v40 }
 0x100   : > { %7315 = vst [vmem:[#allocation32_spill] sm:$0xff] %v4367_v42 }
 0x101   : > { %vm3732_vm4 = vcmp.eq.f32.partialorder %v4340_v41, inf  ;;  %vm3733_vm5 = vcmp.eq.f32.partialorder %v4343_v53, inf  ;;  %7318 = vst [vmem:[#allocation35_spill] sm:$0xff] %v4373_v55  ;;  %vm709_vm8 = vcmp.eq.f32.partialorder %v4168_v51, %v4340_v41  ;;  %vm710_vm9 = vcmp.eq.f32.partialorder %v4170_v52, %v4343_v53 }
 0x102   : > { %v689_v16 = vsel %vm3732_vm4, %v4315_v13, 136  ;;  %v690_v61 = vsel %vm3733_vm5, %v4315_v13, 136  ;;  %vm711_vm10 = vcmp.eq.f32.partialorder %v4104_v38, %v4340_v41  ;;  %vm712_vm11 = vcmp.eq.f32.partialorder %v4106_v39, %v4343_v53 }
 0x103   : > { %v691_v5 = vrot.slane %v689_v16, 4  ;;  %v700_v17 = vrot.slane %v690_v61, 4  ;;  %vm713_vm12 = vcmp.eq.f32.partialorder %v4112_v43, %v4340_v41  ;;  %vm714_vm13 = vcmp.eq.f32.partialorder %v4114_v44, %v4343_v53 }
 0x104   : > { %vm715_vm14 = vcmp.eq.f32.partialorder %v4162_v29, %v4340_v41  ;;  %vm716_vm15 = vcmp.eq.f32.partialorder %v4164_v36, %v4343_v53  ;;  %vm717_vm0 = vcmp.eq.f32.partialorder %v4176_v60, %v4340_v41  ;;  %vm734_vm1 = vcmp.eq.f32.partialorder %v4276_v49, %v4343_v53 }
 0x105   : > { %vm692_vm6 = vcmp.lt.s32.totalorder %v689_v16, %v691_v5  ;;  %vm701_vm7 = vcmp.lt.s32.totalorder %v690_v61, %v700_v17  ;;  %vm735_vm4 = vcmp.eq.f32.partialorder %v4285_v19, %v4340_v41  ;;  %vm736_vm5 = vcmp.eq.f32.partialorder %v4288_v50, %v4343_v53 }
 0x106   : > { %v4381_v22 = vsel %vm692_vm6, %v689_v16, %v691_v5  ;;  %v4383_v54 = vsel %vm701_vm7, %v690_v61, %v700_v17  ;;  %vm737_vm6 = vcmp.eq.f32.partialorder %v4297_v63, %v4340_v41  ;;  %vm738_vm7 = vcmp.eq.f32.partialorder %v4300_v23, %v4343_v53 }
 0x107   : > { %vm739_vm2 = vcmp.eq.f32.partialorder %v4304_v26, %v4340_v41  ;;  %vm740_vm3 = vcmp.eq.f32.partialorder %v4306_v46, %v4343_v53  ;;  %v741_v2 = vsel %vm709_vm8, %v4318_v1, 136  ;;  %v742_v40 = vsel %vm710_vm9, %v4318_v1, 136 }
 0x108   : > { %v743_v3 = vsel %vm711_vm10, %v4337_v7, 136  ;;  %v744_v16 = vsel %vm712_vm11, %v4337_v7, 136  ;;  %v745_v61 = vsel %vm713_vm12, %v4345_v45, 136  ;;  %v746_v5 = vsel %vm714_vm13, %v4345_v45, 136 }
 0x109   : > { %v747_v17 = vsel %vm715_vm14, %v4347_v37, 136  ;;  %v748_v57 = vsel %vm716_vm15, %v4347_v37, 136  ;;  %v749_v47 = vsel %vm717_vm0, %v4349_v10, 136  ;;  %vm7320_vm8 = vcmp.eq.f32.partialorder %v4178_v32, %v4343_v53 }
 0x10a   : > { %v750_v12 = vsel %vm7320_vm8, %v4349_v10, 136  ;;  %vm7321_vm9 = vcmp.eq.f32.partialorder %v4184_v30, %v4340_v41  ;;  %vm7322_vm10 = vcmp.eq.f32.partialorder %v4186_v31, %v4343_v53  ;;  %vm7323_vm11 = vcmp.eq.f32.partialorder %v4217_v24, %v4340_v41 }
 0x10b   : > { %v751_v13 = vsel %vm7321_vm9, %v4351_v14, 136  ;;  %v752_v62 = vsel %vm7322_vm10, %v4351_v14, 136  ;;  %v753_v60 = vsel %vm7323_vm11, %v4353_v0, 136  ;;  %vm7324_vm12 = vcmp.eq.f32.partialorder %v4220_v18, %v4343_v53 }
 0x10c   : > { %v754_v32 = vsel %vm7324_vm12, %v4353_v0, 136  ;;  %vm7325_vm13 = vcmp.eq.f32.partialorder %v4222_v25, %v4340_v41  ;;  %vm7326_vm14 = vcmp.eq.f32.partialorder %v7319_v58, %v4343_v53  ;;  %vm7327_vm15 = vcmp.eq.f32.partialorder %v4242_v11, %v4340_v41 }
 0x10d   : > { %v755_v30 = vsel %vm7325_vm13, %v4355_v15, 136  ;;  %v756_v31 = vsel %vm7326_vm14, %v4355_v15, 136  ;;  %v757_v24 = vsel %vm7327_vm15, %v4359_v59, 136  ;;  %vm7328_vm0 = vcmp.eq.f32.partialorder %v4244_v48, %v4343_v53 }
 0x10e   : > { %v758_v18 = vsel %vm7328_vm0, %v4359_v59, 136  ;;  %vm7329_vm8 = vcmp.eq.f32.partialorder %v4259_v33, %v4340_v41  ;;  %vm7330_vm9 = vcmp.eq.f32.partialorder %v4262_v6, %v4343_v53  ;;  %vm7331_vm10 = vcmp.eq.f32.partialorder %v4265_v34, %v4340_v41 }
 0x10f   : > { %v759_v25 = vsel %vm7329_vm8, %v4361_v56, 136  ;;  %v760_v58 = vsel %vm7330_vm9, %v4361_v56, 136  ;;  %v761_v11 = vsel %vm7331_vm10, %v4365_v27, 136  ;;  %vm7332_vm11 = vcmp.eq.f32.partialorder %v4268_v35, %v4343_v53 }
 0x110   : > { %v762_v48 = vsel %vm7332_vm11, %v4365_v27, 136  ;;  %vm7333_vm12 = vcmp.eq.f32.partialorder %v4270_v4, %v4340_v41  ;;  %vm7334_vm13 = vcmp.eq.f32.partialorder %v4272_v8, %v4343_v53  ;;  %vm7335_vm14 = vcmp.eq.f32.partialorder %v4274_v9, %v4340_v41 }
 0x111   : > { %v763_v33 = vsel %vm7333_vm12, %v4367_v42, 136  ;;  %v764_v6 = vsel %vm7334_vm13, %v4367_v42, 136  ;;  %v765_v34 = vsel %vm7335_vm14, %v4369_v28, 136  ;;  %v766_v35 = vsel %vm734_vm1, %v4369_v28, 136 }
 0x112   : > { %v767_v4 = vsel %vm735_vm4, %v4371_v20, 136  ;;  %v768_v8 = vsel %vm736_vm5, %v4371_v20, 136  ;;  %v769_v9 = vsel %vm737_vm6, %v4373_v55, 136  ;;  %v770_v49 = vsel %vm738_vm7, %v4373_v55, 136 }
 0x113   : > { %v771_v19 = vsel %vm739_vm2, %v4375_v21, 136  ;;  %v772_v50 = vsel %vm740_vm3, %v4375_v21, 136  ;;  %vm773_vm1 = vcmp.lt.s32.totalorder %v741_v2, %v745_v61  ;;  %vm775_vm4 = vcmp.lt.s32.totalorder %v743_v3, %v747_v17 }
 0x114   : > { %v774_v20 = vsel %vm773_vm1, %v741_v2, %v745_v61  ;;  %v776_v63 = vsel %vm775_vm4, %v743_v3, %v747_v17  ;;  %vm812_vm5 = vcmp.lt.s32.totalorder %v742_v40, %v746_v5  ;;  %vm814_vm6 = vcmp.lt.s32.totalorder %v744_v16, %v748_v57 }
 0x115   : > { %vm777_vm15 = vcmp.lt.s32.totalorder %v774_v20, %v749_v47  ;;  %vm779_vm0 = vcmp.lt.s32.totalorder %v776_v63, %v751_v13  ;;  %v813_v23 = vsel %vm812_vm5, %v742_v40, %v746_v5  ;;  %v815_v55 = vsel %vm814_vm6, %v744_v16, %v748_v57 }
 0x116   : > { %v778_v28 = vsel %vm777_vm15, %v774_v20, %v749_v47  ;;  %v780_v42 = vsel %vm779_vm0, %v776_v63, %v751_v13  ;;  %vm816_vm7 = vcmp.lt.s32.totalorder %v813_v23, %v750_v12  ;;  %vm818_vm8 = vcmp.lt.s32.totalorder %v815_v55, %v752_v62 }
 0x117   : > { %vm781_vm2 = vcmp.lt.s32.totalorder %v778_v28, %v753_v60  ;;  %vm783_vm9 = vcmp.lt.s32.totalorder %v780_v42, %v755_v30  ;;  %v817_v41 = vsel %vm816_vm7, %v813_v23, %v750_v12  ;;  %v819_v26 = vsel %vm818_vm8, %v815_v55, %v752_v62 }
 0x118   : > { %v782_v53 = vsel %vm781_vm2, %v778_v28, %v753_v60  ;;  %v784_v46 = vsel %vm783_vm9, %v780_v42, %v755_v30  ;;  %vm820_vm3 = vcmp.lt.s32.totalorder %v817_v41, %v754_v32  ;;  %vm822_vm10 = vcmp.lt.s32.totalorder %v819_v26, %v756_v31 }
 0x119   : > { %vm785_vm11 = vcmp.lt.s32.totalorder %v782_v53, %v757_v24  ;;  %vm787_vm12 = vcmp.lt.s32.totalorder %v784_v46, %v759_v25  ;;  %v821_v2 = vsel %vm820_vm3, %v817_v41, %v754_v32  ;;  %v823_v3 = vsel %vm822_vm10, %v819_v26, %v756_v31 }
 0x11a   : > { %v786_v61 = vsel %vm785_vm11, %v782_v53, %v757_v24  ;;  %v788_v17 = vsel %vm787_vm12, %v784_v46, %v759_v25  ;;  %vm824_vm13 = vcmp.lt.s32.totalorder %v821_v2, %v758_v18  ;;  %vm826_vm14 = vcmp.lt.s32.totalorder %v823_v3, %v760_v58 }
 0x11b   : > { %vm789_vm1 = vcmp.lt.s32.totalorder %v786_v61, %v761_v11  ;;  %vm791_vm4 = vcmp.lt.s32.totalorder %v788_v17, %v763_v33  ;;  %v825_v63 = vsel %vm824_vm13, %v821_v2, %v758_v18  ;;  %v827_v13 = vsel %vm826_vm14, %v823_v3, %v760_v58 }
 0x11c   : > { %v790_v20 = vsel %vm789_vm1, %v786_v61, %v761_v11  ;;  %v792_v47 = vsel %vm791_vm4, %v788_v17, %v763_v33  ;;  %vm828_vm5 = vcmp.lt.s32.totalorder %v825_v63, %v762_v48  ;;  %vm830_vm6 = vcmp.lt.s32.totalorder %v827_v13, %v764_v6 }
 0x11d   : > { %vm793_vm15 = vcmp.lt.s32.totalorder %v790_v20, %v765_v34  ;;  %vm795_vm0 = vcmp.lt.s32.totalorder %v792_v47, %v767_v4  ;;  %v829_v60 = vsel %vm828_vm5, %v825_v63, %v762_v48  ;;  %v831_v30 = vsel %vm830_vm6, %v827_v13, %v764_v6 }
 0x11e   : > { %v794_v23 = vsel %vm793_vm15, %v790_v20, %v765_v34  ;;  %v796_v12 = vsel %vm795_vm0, %v792_v47, %v767_v4  ;;  %vm832_vm7 = vcmp.lt.s32.totalorder %v829_v60, %v766_v35  ;;  %vm834_vm8 = vcmp.lt.s32.totalorder %v831_v30, %v768_v8  ;;  %v7342_v20 = vld [vmem:[#allocation7_spill] sm:$0xff]  ;;  %v7344_v47 = vld [vmem:[#allocation9_spill] sm:$0xff] }
 0x11f   : > { %vm797_vm2 = vcmp.lt.s32.totalorder %v794_v23, %v769_v9  ;;  %vm799_vm9 = vcmp.lt.s32.totalorder %v796_v12, %v771_v19  ;;  %v833_v32 = vsel %vm832_vm7, %v829_v60, %v766_v35  ;;  %v835_v31 = vsel %vm834_vm8, %v831_v30, %v768_v8  ;;  %v7346_v30 = vld [vmem:[#allocation6_spill] sm:$0xff] }
 0x120   : > { %v798_v24 = vsel %vm797_vm2, %v794_v23, %v769_v9  ;;  %v800_v25 = vsel %vm799_vm9, %v796_v12, %v771_v19  ;;  %vm836_vm3 = vcmp.lt.s32.totalorder %v833_v32, %v770_v49  ;;  %vm838_vm10 = vcmp.lt.s32.totalorder %v835_v31, %v772_v50 }
 0x121   : > { %v7336_v18 = vrot.slane %v4381_v22, 2  ;;  %vm801_vm12 = vcmp.lt.s32.totalorder %v798_v24, %v800_v25  ;;  %v837_v11 = vsel %vm836_vm3, %v833_v32, %v770_v49  ;;  %v839_v48 = vsel %vm838_vm10, %v835_v31, %v772_v50  ;;  %v7347_v31 = vld [vmem:[#allocation8_spill] sm:$0xff] }
 0x122   : > { %v7337_v33 = vrot.slane %v4383_v54, 2  ;;  %v802_v6 = vsel %vm801_vm12, %v798_v24, %v800_v25  ;;  %vm840_vm14 = vcmp.lt.s32.totalorder %v837_v11, %v839_v48  ;;  %v7210_v63 = vmov 1.0|1.0  }
 0x123   : > { %vm695_vm11 = vcmp.lt.s32.totalorder %v4381_v22, %v7336_v18  ;;  %v803_v34 = vrot.slane %v802_v6, 4  ;;  %v841_v35 = vsel %vm840_vm14, %v837_v11, %v839_v48  ;;  %v7338_v4 = vmov %v7336_v18  ;;  %v7348_v11 = vld [vmem:[#allocation11_spill] sm:$0xff] }
 0x124   : > { %vm704_vm13 = vcmp.lt.s32.totalorder %v4383_v54, %v7337_v33  ;;  %v696_v8 = vsel %vm695_vm11, %v4381_v22, %v7338_v4  ;;  %v842_v9 = vrot.slane %v841_v35, 4  ;;  %v7339_v19 = vmov %v7337_v33  ;;  %v7350_v33 = vld [vmem:[#allocation13_spill] sm:$0xff] }
 0x125   : > { %v705_v26 = vsel %vm704_vm13, %v4383_v54, %v7339_v19  ;;  %vm804_vm1 = vcmp.lt.s32.totalorder %v802_v6, %v803_v34  ;;  %v697_v50 = vrot.slane %v696_v8, 1 }
 0x126   : > { %v805_v49 = vsel %vm804_vm1, %v802_v6, %v803_v34  ;;  %vm843_vm4 = vcmp.lt.s32.totalorder %v841_v35, %v842_v9  ;;  %v706_v42 = vrot.slane %v705_v26, 1  ;;  %v7351_v34 = vld [vmem:[#allocation10_spill] sm:$0xff] }
 0x127   : > { %v806_v46 = vrot.slane %v805_v49, 2  ;;  %v844_v62 = vsel %vm843_vm4, %v841_v35, %v842_v9  ;;  %vm698_vm15 = vcmp.lt.s32.totalorder %v696_v8, %v697_v50  ;;  %v7352_v9 = vld [vmem:[#allocation12_spill] sm:$0xff] }
 0x128   : > { %v845_v28 = vrot.slane %v844_v62, 2  ;;  %vm707_vm0 = vcmp.lt.s32.totalorder %v705_v26, %v706_v42  ;;  %v699_v40 = vsel %vm698_vm15, %v696_v8, %v697_v50  ;;  %v7353_v50 = vld [vmem:[#allocation15_spill] sm:$0xff] }
 0x129   : > { %vm807_vm5 = vcmp.lt.s32.totalorder %v805_v49, %v806_v46  ;;  %v708_v54 = vsel %vm707_vm0, %v705_v26, %v706_v42 }
 0x12a   : > { %v808_v55 = vsel %vm807_vm5, %v805_v49, %v806_v46  ;;  %vm846_vm6 = vcmp.lt.s32.totalorder %v844_v62, %v845_v28 }
 0x12b   : > { %v809_v57 = vrot.slane %v808_v55, 1  ;;  %v847_v58 = vsel %vm846_vm6, %v844_v62, %v845_v28  ;;  %v7354_v62 = vld [vmem:[#allocation17_spill] sm:$0xff]  ;;  %v7355_v28 = vld [vmem:[#allocation14_spill] sm:$0xff] }
 0x12c   : > { %v848_v22 = vrot.slane %v847_v58, 1 }
 0x12d   : > { %vm810_vm7 = vcmp.lt.s32.totalorder %v808_v55, %v809_v57 }
 0x12e   : > { %v811_v16 = vsel %vm810_vm7, %v808_v55, %v809_v57  ;;  %vm849_vm8 = vcmp.lt.s32.totalorder %v847_v58, %v848_v22 }
 0x12f   : > { %v850_v5 = vsel %vm849_vm8, %v847_v58, %v848_v22  ;;  %vm851_vm2 = vcmp.lt.s32.totalorder %v699_v40, %v811_v16  ;;  %v7356_v22 = vld [vmem:[#allocation16_spill] sm:$0xff] }
 0x130   : > { %v4587_v41 = vsel %vm851_vm2, %v699_v40, %v811_v16  ;;  %vm853_vm9 = vcmp.lt.s32.totalorder %v708_v54, %v850_v5 }
 0x131   : > { %7340 = vst [vmem:[#allocation36_spill] sm:$0xff] %v4587_v41  ;;  %v4589_v53 = vsel %vm853_vm9, %v708_v54, %v850_v5  ;;  %vm857_vm3 = vcmp.eq.s32.totalorder %v4318_v1, %v4587_v41  ;;  %vm859_vm10 = vcmp.eq.s32.totalorder %v4337_v7, %v4587_v41  ;;  %vm861_vm11 = vcmp.eq.s32.totalorder %v4345_v45, %v4587_v41  ;;  %v7357_v5 = vld [vmem:[#allocation32_spill] sm:$0xff] }
 0x132   : > { %7341 = vst [vmem:[#allocation37_spill] sm:$0xff] %v4589_v53  ;;  %vm858_vm12 = vcmp.eq.s32.totalorder %v4318_v1, %v4589_v53  ;;  %vm860_vm13 = vcmp.eq.s32.totalorder %v4337_v7, %v4589_v53  ;;  %vm3744_vm14 = vmpackc.low %vm859_vm10, %vm857_vm3  ;;  %v4602_v2 = vsel %vm857_vm3, inf, %v4168_v51  ;;  %v4605_v3 = vsel %vm859_vm10, inf, %v4104_v38 }
 0x133   : > { %vm3742_vm1 = vmpackc.low %vm860_vm13, %vm858_vm12  ;;  %v4608_v61 = vsel %vm858_vm12, inf, %v4170_v52  ;;  %v4611_v17 = vsel %vm860_vm13, inf, %v4106_v39  ;;  %vm862_vm4 = vcmp.eq.s32.totalorder %v4345_v45, %v4589_v53  ;;  %vm864_vm5 = vcmp.eq.s32.totalorder %v4347_v37, %v4589_v53 }
 0x134   : > { %3743 = vmatprep.subr.msk.bf16.mxu0 %vm3742_vm1, %v7210_v63  ;;  %v4619_v51 = vsel %vm862_vm4, inf, %v4114_v44  ;;  %v4622_v38 = vsel %vm864_vm5, inf, %v4164_v36  ;;  %vm863_vm6 = vcmp.eq.s32.totalorder %v4347_v37, %v4587_v41  ;;  %v4630_v39 = vsel %vm861_vm11, inf, %v4112_v43  ;;  %vm3746_vm15 = vmpackc.low %vm864_vm5, %vm862_vm4 }
 0x135   : > { %3745 = vmatpush1.bf16.msk.msra.mxu0 %vm3744_vm14, %v7210_v63  ;;  %v1176_v52 = vmin.f32 %v4608_v61, %v4619_v51  ;;  %v1177_v44 = vmin.f32 %v4611_v17, %v4622_v38  ;;  %v4641_v36 = vsel %vm863_vm6, inf, %v4162_v29  ;;  %v1155_v13 = vmin.f32 %v4602_v2, %v4630_v39  ;;  %vm3748_vm9 = vmpackc.low %vm863_vm6, %vm861_vm11 }
 0x136   : > { %3747 = vmatprep.subr.msk.bf16.mxu0 %vm3746_vm15, %v7210_v63  ;;  %v1156_v43 = vmin.f32 %v4605_v3, %v4641_v36  ;;  %vm866_vm0 = vcmp.eq.s32.totalorder %v4349_v10, %v4589_v53  ;;  %vm868_vm7 = vcmp.eq.s32.totalorder %v4351_v14, %v4589_v53  ;;  %vm865_vm8 = vcmp.eq.s32.totalorder %v4349_v10, %v4587_v41 }
 0x137   : > { %v4655_v29 = vsel %vm866_vm0, inf, %v7342_v20  ;;  %v4658_v60 = vsel %vm868_vm7, inf, %v7344_v47  ;;  %vm867_vm2 = vcmp.eq.s32.totalorder %v4351_v14, %v4587_v41  ;;  %v4666_v23 = vsel %vm865_vm8, inf, %v7346_v30  ;;  %vm3750_vm3 = vmpackc.low %vm868_vm7, %vm866_vm0  ;;  %v7360_v20 = vld [vmem:[#allocation18_spill] sm:$0xff] }
 0x138   : > { %7343 = vst [vmem:[#allocation7_spill] sm:$0xff] %v4655_v29  ;;  %7345 = vst [vmem:[#allocation9_spill] sm:$0xff] %v4658_v60  ;;  %v1178_v12 = vmin.f32 %v1176_v52, %v4655_v29  ;;  %v1179_v32 = vmin.f32 %v1177_v44, %v4658_v60  ;;  %v4680_v24 = vsel %vm867_vm2, inf, %v7347_v31  ;;  %v1157_v25 = vmin.f32 %v1155_v13, %v4666_v23  ;;  %v7358_v52 = vld [vmem:[#allocation19_spill] sm:$0xff]  ;;  %v7359_v13 = vld [vmem:[#allocation21_spill] sm:$0xff] }
 0x139   : > { %3749 = vmatpush1.bf16.msk.msra.mxu0 %vm3748_vm9, %v7210_v63  ;;  %v1158_v18 = vmin.f32 %v1156_v43, %v4680_v24  ;;  %vm870_vm10 = vcmp.eq.s32.totalorder %v4353_v0, %v4589_v53  ;;  %vm872_vm11 = vcmp.eq.s32.totalorder %v4355_v15, %v4589_v53  ;;  %vm869_vm12 = vcmp.eq.s32.totalorder %v4353_v0, %v4587_v41  ;;  %vm3752_vm14 = vmpackc.low %vm867_vm2, %vm865_vm8 }
 0x13a   : > { %3751 = vmatprep.subr.msk.bf16.mxu0 %vm3750_vm3, %v7210_v63  ;;  %v4696_v48 = vsel %vm870_vm10, inf, %v7348_v11  ;;  %v4702_v6 = vsel %vm872_vm11, inf, %v7350_v33  ;;  %vm871_vm13 = vcmp.eq.s32.totalorder %v4355_v15, %v4587_v41  ;;  %v4710_v35 = vsel %vm869_vm12, inf, %v7351_v34  ;;  %vm3754_vm6 = vmpackc.low %vm872_vm11, %vm870_vm10  ;;  %v7362_v11 = vld [vmem:[#allocation33_spill] sm:$0xff]  ;;  %v7363_v33 = vld [vmem:[#allocation34_spill] sm:$0xff] }
 0x13b   : > { %7349 = vst [vmem:[#allocation6_spill] sm:$0xff] %v4696_v48  ;;  %v1180_v4 = vmin.f32 %v1178_v12, %v4696_v48  ;;  %v1181_v8 = vmin.f32 %v1179_v32, %v4702_v6  ;;  %v4718_v19 = vsel %vm871_vm13, inf, %v7352_v9  ;;  %v1159_v26 = vmin.f32 %v1157_v25, %v4710_v35  ;;  %vm3756_vm2 = vmpackc.low %vm871_vm13, %vm869_vm12  ;;  %v7361_v32 = vld [vmem:[#allocation20_spill] sm:$0xff]  ;;  %v7364_v34 = vld [vmem:[#allocation23_spill] sm:$0xff] }
 0x13c   : > { %v1160_v49 = vmin.f32 %v1158_v18, %v4718_v19  ;;  %vm874_vm1 = vcmp.eq.s32.totalorder %v4359_v59, %v4589_v53  ;;  %vm876_vm4 = vcmp.eq.s32.totalorder %v4361_v56, %v4589_v53  ;;  %vm873_vm5 = vcmp.eq.s32.totalorder %v4359_v59, %v4587_v41 }
 0x13d   : > { %3753 = vmatpush1.bf16.msk.msra.mxu0 %vm3752_vm14, %v7210_v63  ;;  %v4745_v46 = vsel %vm874_vm1, inf, %v7353_v50  ;;  %v4751_v42 = vsel %vm876_vm4, inf, %v7354_v62  ;;  %vm875_vm15 = vcmp.eq.s32.totalorder %v4361_v56, %v4587_v41  ;;  %v4759_v55 = vsel %vm873_vm5, inf, %v7355_v28  ;;  %vm3758_vm3 = vmpackc.low %vm876_vm4, %vm874_vm1  ;;  %v7367_v28 = vld [vmem:[#allocation24_spill] sm:$0xff] }
 0x13e   : > { %3755 = vmatprep.subr.msk.bf16.mxu0 %vm3754_vm6, %v7210_v63  ;;  %v1182_v57 = vmin.f32 %v1180_v4, %v4745_v46  ;;  %v1183_v58 = vmin.f32 %v1181_v8, %v4751_v42  ;;  %v4768_v40 = vsel %vm875_vm15, inf, %v7356_v22  ;;  %v1161_v16 = vmin.f32 %v1159_v26, %v4759_v55  ;;  %v7365_v8 = vld [vmem:[#allocation25_spill] sm:$0xff]  ;;  %v7366_v26 = vld [vmem:[#allocation22_spill] sm:$0xff]  ;;  %vm3760_vm14 = vmpackc.low %vm875_vm15, %vm873_vm5 }
 0x13f   : > { %v1162_v54 = vmin.f32 %v1160_v49, %v4768_v40  ;;  %vm878_vm0 = vcmp.eq.s32.totalorder %v4365_v27, %v4589_v53  ;;  %vm880_vm7 = vcmp.eq.s32.totalorder %v7357_v5, %v4589_v53  ;;  %vm877_vm8 = vcmp.eq.s32.totalorder %v4365_v27, %v4587_v41 }
 0x140   : > { %v4788_v44 = vsel %vm878_vm0, inf, %v7358_v52  ;;  %v4794_v43 = vsel %vm880_vm7, inf, %v7359_v13  ;;  %vm879_vm9 = vcmp.eq.s32.totalorder %v7357_v5, %v4587_v41  ;;  %v4802_v47 = vsel %vm877_vm8, inf, %v7360_v20  ;;  %vm3762_vm1 = vmpackc.low %vm880_vm7, %vm878_vm0  ;;  %v7371_v13 = vld [vmem:[#allocation29_spill] sm:$0xff] }
 0x141   : > { %3757 = vmatpush1.bf16.msk.msra.mxu0 %vm3756_vm2, %v7210_v63  ;;  %v1184_v30 = vmin.f32 %v1182_v57, %v4788_v44  ;;  %v1185_v12 = vmin.f32 %v1183_v58, %v4794_v43  ;;  %v4817_v31 = vsel %vm879_vm9, inf, %v7361_v32  ;;  %v1163_v25 = vmin.f32 %v1161_v16, %v4802_v47  ;;  %v7368_v16 = vld [vmem:[#allocation35_spill] sm:$0xff]  ;;  %vm3764_vm0 = vmpackc.low %vm879_vm9, %vm877_vm8 }
 0x142   : > { %3759 = vmatprep.subr.msk.bf16.mxu0 %vm3758_vm3, %v7210_v63  ;;  %v1164_v18 = vmin.f32 %v1162_v54, %v4817_v31  ;;  %vm882_vm10 = vcmp.eq.s32.totalorder %v7362_v11, %v4589_v53  ;;  %vm884_vm11 = vcmp.eq.s32.totalorder %v7363_v33, %v4589_v53  ;;  %vm881_vm12 = vcmp.eq.s32.totalorder %v7362_v11, %v4587_v41  ;;  %v7369_v54 = vld [vmem:[#allocation27_spill] sm:$0xff] }
 0x143   : > { %v4832_v4 = vsel %vm882_vm10, inf, %v7364_v34  ;;  %v4838_v9 = vsel %vm884_vm11, inf, %v7365_v8  ;;  %vm883_vm13 = vcmp.eq.s32.totalorder %v7363_v33, %v4587_v41  ;;  %v4846_v49 = vsel %vm881_vm12, inf, %v7366_v26  ;;  %vm3766_vm7 = vmpackc.low %vm884_vm11, %vm882_vm10 }
 0x144   : > { %v1186_v50 = vmin.f32 %v1184_v30, %v4832_v4  ;;  %v1187_v62 = vmin.f32 %v1185_v12, %v4838_v9  ;;  %v4860_v57 = vsel %vm883_vm13, inf, %v7367_v28  ;;  %v1165_v58 = vmin.f32 %v1163_v25, %v4846_v49  ;;  %v7373_v30 = vld [vmem:[#allocation26_spill] sm:$0xff]  ;;  %vm3768_vm8 = vmpackc.low %vm883_vm13, %vm881_vm12 }
 0x145   : > { %3761 = vmatpush1.bf16.msk.msra.mxu0 %vm3760_vm14, %v7210_v63  ;;  %v1166_v22 = vmin.f32 %v1164_v18, %v4860_v57  ;;  %vm886_vm4 = vcmp.eq.s32.totalorder %v7368_v16, %v4589_v53  ;;  %vm888_vm5 = vcmp.eq.s32.totalorder %v4375_v21, %v4589_v53  ;;  %vm885_vm6 = vcmp.eq.s32.totalorder %v7368_v16, %v4587_v41  ;;  %v7374_v18 = vld [vmem:[#allocation28_spill] sm:$0xff]  ;;  %v7378_v53 = vld [vmem:[#allocation30_spill] sm:$0xff] }
 0x146   : > { %3763 = vmatprep.subr.msk.bf16.mxu0 %vm3762_vm1, %v7210_v63  ;;  %v4882_v52 = vsel %vm886_vm4, inf, %v7369_v54  ;;  %v4888_v20 = vsel %vm888_vm5, inf, %v7371_v13  ;;  %vm887_vm15 = vcmp.eq.s32.totalorder %v4375_v21, %v4587_v41  ;;  %v4896_v12 = vsel %vm885_vm6, inf, %v7373_v30  ;;  %vm3770_vm2 = vmpackc.low %vm888_vm5, %vm886_vm4 }
 0x147   : > { %7370 = vst [vmem:[#allocation8_spill] sm:$0xff] %v4882_v52  ;;  %7372 = vst [vmem:[#allocation11_spill] sm:$0xff] %v4888_v20  ;;  %v1188_v32 = vmin.f32 %v1186_v50, %v4882_v52  ;;  %v1189_v25 = vmin.f32 %v1187_v62, %v4888_v20  ;;  %v4904_v34 = vsel %vm887_vm15, inf, %v7374_v18  ;;  %v1167_v8 = vmin.f32 %v1165_v58, %v4896_v12 }
 0x148   : > { %v1168_v26 = vmin.f32 %v1166_v22, %v4904_v34  ;;  %vm3772_vm9 = vmpackc.low %vm887_vm15, %vm885_vm6 }
 0x149   : > { %3765 = vmatpush1.bf16.msk.msra.mxu0 %vm3764_vm0, %v7210_v63  ;;  %v1190_v50 = vmin.f32 %v1188_v32, %v1189_v25  ;;  %v4950_v25 = vld [vmem:[%s4940_s20] sm:$0x7] }
 0x14a   : > { %3767 = vmatprep.subr.msk.bf16.mxu0 %vm3766_vm7, %v7210_v63  ;;  %v1169_v62 = vmin.f32 %v1167_v8, %v1168_v26  ;;  %7375 = vst [vmem:[#allocation13_spill] sm:$0xff] %v4950_v25 }
 0x14b   : > { %v1191_v28 = vrot.slane %v1190_v50, 4 }
 0x14c   : > { %v1170_v58 = vrot.slane %v1169_v62, 4 }
 0x14d   : > { %3769 = vmatpush1.bf16.msk.msra.mxu0 %vm3768_vm8, %v7210_v63  ;;  %v1192_v22 = vmin.f32 %v1190_v50, %v1191_v28  ;;  %v7376_v50 = vmov 0.0  }
 0x14e   : > { %3771 = vmatprep.subr.msk.bf16.mxu0 %vm3770_vm2, %v7210_v63  ;;  %v1171_v54 = vmin.f32 %v1169_v62, %v1170_v58  ;;  %v7377_v62 = vld [vmem:[#allocation31_spill] sm:$0xff] }
 0x14f   : > { %v1193_v13 = vrot.slane %v1192_v22, 2 }
 0x150   : > { %v1172_v30 = vrot.slane %v1171_v54, 2 }
 0x151   : > { %v1194_v32 = vmin.f32 %v1192_v22, %v1193_v13  ;;  %3773 = vmatpush1.bf16.msk.msra.mxu0 %vm3772_vm9, %v7210_v63 }
 0x152   : > { %v1173_v8 = vmin.f32 %v1171_v54, %v1172_v30 }
 0x153   : > { %v1195_v18 = vrot.slane %v1194_v32, 1 }
 0x154   : > { %1018 = vmatmul.mubr.f32.vlgmr.msra.gmra.mrb[0].mxu0 %v4950_v25  ;;  %v1174_v58 = vrot.slane %v1173_v8, 1 }
 0x155   : > { %v1196_v26 = vmin.f32 %v1194_v32, %v1195_v18  ;;  %2041 = vmatprep.mubr.f32.mxu0 %v7376_v50 }
 0x156   : > { %v1175_v22 = vmin.f32 %v1173_v8, %v1174_v58 }
 0x157   : > { %v4955_v28 = vmin.f32 %v7377_v62, %v1196_v26 }
 0x158   : > { %v4975_v32 = vmin.f32 %v7377_v62, %v1175_v22 }
 0x159   : > { %vm3735_vm3 = vcmp.eq.f32.partialorder %v4955_v28, inf  ;;  %vm1250_vm10 = vcmp.eq.f32.partialorder %v4882_v52, %v4955_v28  ;;  %vm1222_vm11 = vcmp.eq.f32.partialorder %v4608_v61, %v4955_v28  ;;  %vm1224_vm13 = vcmp.eq.f32.partialorder %v4611_v17, %v4955_v28 }
 0x15a   : > { %v1202_v41 = vsel %vm3735_vm3, %v7378_v53, 136  ;;  %vm1226_vm14 = vcmp.eq.f32.partialorder %v4619_v51, %v4955_v28  ;;  %vm1228_vm1 = vcmp.eq.f32.partialorder %v4622_v38, %v4955_v28  ;;  %vm1252_vm4 = vcmp.eq.f32.partialorder %v4888_v20, %v4955_v28 }
 0x15b   : > { %v1212_v13 = vrot.slane %v1202_v41, 4  ;;  %v4972_v30 = vsel %vm1250_vm10, %v7368_v16, 136  ;;  %vm1230_vm5 = vcmp.eq.f32.partialorder %v4655_v29, %v4955_v28  ;;  %v1254_v8 = vsel %vm1222_vm11, %v4318_v1, 136 }
 0x15c   : > { %v1256_v26 = vsel %vm1224_vm13, %v4337_v7, 136  ;;  %v1258_v58 = vsel %vm1226_vm14, %v4345_v45, 136  ;;  %v1260_v63 = vsel %vm1228_vm1, %v4347_v37, 136  ;;  %vm1232_vm6 = vcmp.eq.f32.partialorder %v4658_v60, %v4955_v28 }
 0x15d   : > { %vm1213_vm12 = vcmp.lt.s32.totalorder %v1202_v41, %v1212_v13  ;;  %vm1234_vm15 = vcmp.eq.f32.partialorder %v4696_v48, %v4955_v28  ;;  %vm1236_vm0 = vcmp.eq.f32.partialorder %v4702_v6, %v4955_v28  ;;  %vm1238_vm7 = vcmp.eq.f32.partialorder %v4745_v46, %v4955_v28 }
 0x15e   : > { %v1214_v54 = vsel %vm1213_vm12, %v1202_v41, %v1212_v13  ;;  %v4984_v41 = vsel %vm1252_vm4, %v4375_v21, 136  ;;  %vm1240_vm8 = vcmp.eq.f32.partialorder %v4751_v42, %v4955_v28  ;;  %vm1242_vm2 = vcmp.eq.f32.partialorder %v4788_v44, %v4955_v28 }
 0x15f   : > { %v1215_v18 = vrot.slane %v1214_v54, 2  ;;  %v1262_v22 = vsel %vm1230_vm5, %v4349_v10, 136  ;;  %vm1324_vm3 = vcmp.lt.s32.totalorder %v1254_v8, %v1258_v58  ;;  %vm1326_vm10 = vcmp.lt.s32.totalorder %v1256_v26, %v1260_v63 }
 0x160   : > { %vm3734_vm11 = vcmp.eq.f32.partialorder %v4975_v32, inf  ;;  %v1264_v13 = vsel %vm1232_vm6, %v4351_v14, 136  ;;  %v1325_v50 = vsel %vm1324_vm3, %v1254_v8, %v1258_v58  ;;  %v1327_v25 = vsel %vm1326_vm10, %v1256_v26, %v1260_v63 }
 0x161   : > { %vm1216_vm9 = vcmp.lt.s32.totalorder %v1214_v54, %v1215_v18  ;;  %v1201_v62 = vsel %vm3734_vm11, %v7378_v53, 136  ;;  %vm1244_vm12 = vcmp.eq.f32.partialorder %v4794_v43, %v4955_v28  ;;  %v1266_v20 = vsel %vm1234_vm15, %v4353_v0, 136 }
 0x162   : > { %vm1328_vm13 = vcmp.lt.s32.totalorder %v1325_v50, %v1262_v22  ;;  %vm1330_vm14 = vcmp.lt.s32.totalorder %v1327_v25, %v1264_v13  ;;  %v1217_v52 = vsel %vm1216_vm9, %v1214_v54, %v1215_v18  ;;  %v1268_v48 = vsel %vm1236_vm0, %v4355_v15, 136 }
 0x163   : > { %v1329_v60 = vsel %vm1328_vm13, %v1325_v50, %v1262_v22  ;;  %v1331_v29 = vsel %vm1330_vm14, %v1327_v25, %v1264_v13  ;;  %vm1246_vm1 = vcmp.eq.f32.partialorder %v4832_v4, %v4955_v28  ;;  %v1203_v63 = vrot.slane %v1201_v62, 4 }
 0x164   : > { %vm1332_vm4 = vcmp.lt.s32.totalorder %v1329_v60, %v1266_v20  ;;  %vm1334_vm5 = vcmp.lt.s32.totalorder %v1331_v29, %v1268_v48  ;;  %v1270_v8 = vsel %vm1238_vm7, %v4359_v59, 136  ;;  %v1272_v54 = vsel %vm1240_vm8, %v4361_v56, 136 }
 0x165   : > { %v1333_v18 = vsel %vm1332_vm4, %v1329_v60, %v1266_v20  ;;  %v1335_v26 = vsel %vm1334_vm5, %v1331_v29, %v1268_v48  ;;  %v1218_v50 = vrot.slane %v1217_v52, 1  ;;  %vm1248_vm6 = vcmp.eq.f32.partialorder %v4838_v9, %v4955_v28 }
 0x166   : > { %vm1336_vm15 = vcmp.lt.s32.totalorder %v1333_v18, %v1270_v8  ;;  %vm1338_vm0 = vcmp.lt.s32.totalorder %v1335_v26, %v1272_v54  ;;  %v1274_v25 = vsel %vm1242_vm2, %v4365_v27, 136  ;;  %v1276_v58 = vsel %vm1244_vm12, %v7357_v5, 136 }
 0x167   : > { %v1337_v22 = vsel %vm1336_vm15, %v1333_v18, %v1270_v8  ;;  %v1339_v13 = vsel %vm1338_vm0, %v1335_v26, %v1272_v54  ;;  %vm1249_vm7 = vcmp.eq.f32.partialorder %v4896_v12, %v4975_v32  ;;  %vm1204_vm3 = vcmp.lt.s32.totalorder %v1201_v62, %v1203_v63 }
 0x168   : > { %vm1340_vm8 = vcmp.lt.s32.totalorder %v1337_v22, %v1274_v25  ;;  %vm1342_vm9 = vcmp.lt.s32.totalorder %v1339_v13, %v1276_v58  ;;  %v1278_v29 = vsel %vm1246_vm1, %v7362_v11, 136  ;;  %v1280_v60 = vsel %vm1248_vm6, %v7363_v33, 136 }
 0x169   : > { %v1341_v48 = vsel %vm1340_vm8, %v1337_v22, %v1274_v25  ;;  %v1343_v20 = vsel %vm1342_vm9, %v1339_v13, %v1276_v58  ;;  %vm1219_vm2 = vcmp.lt.s32.totalorder %v1217_v52, %v1218_v50  ;;  %vm1221_vm12 = vcmp.eq.f32.partialorder %v4602_v2, %v4975_v32 }
 0x16a   : > { %vm1344_vm10 = vcmp.lt.s32.totalorder %v1341_v48, %v1278_v29  ;;  %vm1346_vm11 = vcmp.lt.s32.totalorder %v1343_v20, %v1280_v60  ;;  %v5038_v18 = vsel %vm1204_vm3, %v1201_v62, %v1203_v63  ;;  %vm1223_vm13 = vcmp.eq.f32.partialorder %v4605_v3, %v4975_v32 }
 0x16b   : > { %v1345_v8 = vsel %vm1344_vm10, %v1341_v48, %v1278_v29  ;;  %v1347_v54 = vsel %vm1346_vm11, %v1343_v20, %v1280_v60  ;;  %vm1225_vm4 = vcmp.eq.f32.partialorder %v4630_v39, %v4975_v32  ;;  %vm1227_vm5 = vcmp.eq.f32.partialorder %v4641_v36, %v4975_v32 }
 0x16c   : > { %vm1348_vm14 = vcmp.lt.s32.totalorder %v1345_v8, %v4972_v30  ;;  %vm1350_vm1 = vcmp.lt.s32.totalorder %v1347_v54, %v4984_v41  ;;  %v5052_v28 = vsel %vm1249_vm7, %v7368_v16, 136  ;;  %v5054_v62 = vsel %vm1219_vm2, %v1217_v52, %v1218_v50 }
 0x16d   : > { %v1349_v63 = vsel %vm1348_vm14, %v1345_v8, %v4972_v30  ;;  %v1351_v26 = vsel %vm1350_vm1, %v1347_v54, %v4984_v41  ;;  %v7219_v25 = vrot.slane %v5038_v18, 2  ;;  %vm1229_vm15 = vcmp.eq.f32.partialorder %v4666_v23, %v4975_v32 }
 0x16e   : > { %vm1352_vm6 = vcmp.lt.s32.totalorder %v1349_v63, %v1351_v26  ;;  %v1253_v58 = vsel %vm1221_vm12, %v4318_v1, 136  ;;  %v1255_v13 = vsel %vm1223_vm13, %v4337_v7, 136  ;;  %v1257_v52 = vsel %vm1225_vm4, %v4345_v45, 136 }
 0x16f   : > { %v1353_v22 = vsel %vm1352_vm6, %v1349_v63, %v1351_v26  ;;  %v1259_v30 = vsel %vm1227_vm5, %v4347_v37, 136  ;;  %vm1231_vm0 = vcmp.eq.f32.partialorder %v4680_v24, %v4975_v32  ;;  %vm1233_vm7 = vcmp.eq.f32.partialorder %v4710_v35, %v4975_v32 }
 0x170   : > { %v1354_v50 = vrot.slane %v1353_v22, 4  ;;  %vm1235_vm8 = vcmp.eq.f32.partialorder %v4718_v19, %v4975_v32  ;;  %vm1251_vm9 = vcmp.eq.f32.partialorder %v4904_v34, %v4975_v32  ;;  %vm1237_vm3 = vcmp.eq.f32.partialorder %v4759_v55, %v4975_v32 }
 0x171   : > { %vm1239_vm2 = vcmp.eq.f32.partialorder %v4768_v40, %v4975_v32  ;;  %vm1241_vm10 = vcmp.eq.f32.partialorder %v4802_v47, %v4975_v32  ;;  %vm1243_vm11 = vcmp.eq.f32.partialorder %v4817_v31, %v4975_v32  ;;  %vm5087_vm13 = vcmp.lt.s32.totalorder %v5038_v18, %v7219_v25 }
 0x172   : > { %vm1355_vm12 = vcmp.lt.s32.totalorder %v1353_v22, %v1354_v50  ;;  %v1261_v29 = vsel %vm1229_vm15, %v4349_v10, 136  ;;  %vm1285_vm14 = vcmp.lt.s32.totalorder %v1253_v58, %v1257_v52  ;;  %vm1287_vm1 = vcmp.lt.s32.totalorder %v1255_v13, %v1259_v30 }
 0x173   : > { %v1356_v60 = vsel %vm1355_vm12, %v1353_v22, %v1354_v50  ;;  %v1263_v48 = vsel %vm1231_vm0, %v4351_v14, 136  ;;  %v1286_v20 = vsel %vm1285_vm14, %v1253_v58, %v1257_v52  ;;  %v1288_v8 = vsel %vm1287_vm1, %v1255_v13, %v1259_v30 }
 0x174   : > { %v1357_v54 = vrot.slane %v1356_v60, 2  ;;  %vm1245_vm4 = vcmp.eq.f32.partialorder %v4846_v49, %v4975_v32  ;;  %vm1289_vm5 = vcmp.lt.s32.totalorder %v1286_v20, %v1261_v29  ;;  %vm1291_vm6 = vcmp.lt.s32.totalorder %v1288_v8, %v1263_v48 }
 0x175   : > { %v1265_v63 = vsel %vm1233_vm7, %v4353_v0, 136  ;;  %v1267_v26 = vsel %vm1235_vm8, %v4355_v15, 136  ;;  %v1290_v22 = vsel %vm1289_vm5, %v1286_v20, %v1261_v29  ;;  %v1292_v50 = vsel %vm1291_vm6, %v1288_v8, %v1263_v48 }
 0x176   : > { %vm1358_vm15 = vcmp.lt.s32.totalorder %v1356_v60, %v1357_v54  ;;  %v1269_v58 = vsel %vm1237_vm3, %v4359_v59, 136  ;;  %vm1293_vm0 = vcmp.lt.s32.totalorder %v1290_v22, %v1265_v63  ;;  %vm1295_vm12 = vcmp.lt.s32.totalorder %v1292_v50, %v1267_v26 }
 0x177   : > { %v1359_v13 = vsel %vm1358_vm15, %v1356_v60, %v1357_v54  ;;  %v1271_v52 = vsel %vm1239_vm2, %v4361_v56, 136  ;;  %v1294_v30 = vsel %vm1293_vm0, %v1290_v22, %v1265_v63  ;;  %v1296_v25 = vsel %vm1295_vm12, %v1292_v50, %v1267_v26 }
 0x178   : > { %v1360_v53 = vrot.slane %v1359_v13, 1  ;;  %vm1247_vm7 = vcmp.eq.f32.partialorder %v4860_v57, %v4975_v32  ;;  %vm1297_vm8 = vcmp.lt.s32.totalorder %v1294_v30, %v1269_v58  ;;  %vm1299_vm14 = vcmp.lt.s32.totalorder %v1296_v25, %v1271_v52 }
 0x179   : > { %v1273_v29 = vsel %vm1241_vm10, %v4365_v27, 136  ;;  %v1275_v60 = vsel %vm1243_vm11, %v7357_v5, 136  ;;  %v1298_v48 = vsel %vm1297_vm8, %v1294_v30, %v1269_v58  ;;  %v1300_v20 = vsel %vm1299_vm14, %v1296_v25, %v1271_v52 }
 0x17a   : > { %vm1361_vm3 = vcmp.lt.s32.totalorder %v1359_v13, %v1360_v53  ;;  %v1277_v8 = vsel %vm1245_vm4, %v7362_v11, 136  ;;  %vm1301_vm2 = vcmp.lt.s32.totalorder %v1298_v48, %v1273_v29  ;;  %vm1303_vm1 = vcmp.lt.s32.totalorder %v1300_v20, %v1275_v60 }
 0x17b   : > { %v1362_v54 = vsel %vm1361_vm3, %v1359_v13, %v1360_v53  ;;  %v1279_v63 = vsel %vm1247_vm7, %v7363_v33, 136  ;;  %v1302_v26 = vsel %vm1301_vm2, %v1298_v48, %v1273_v29  ;;  %v1304_v22 = vsel %vm1303_vm1, %v1300_v20, %v1275_v60 }
 0x17c   : > { %v1283_v50 = vsel %vm1251_vm9, %v4375_v21, 136  ;;  %vm1365_vm10 = vcmp.lt.s32.totalorder %v5054_v62, %v1362_v54  ;;  %vm1305_vm11 = vcmp.lt.s32.totalorder %v1302_v26, %v1277_v8  ;;  %vm1307_vm5 = vcmp.lt.s32.totalorder %v1304_v22, %v1279_v63 }
 0x17d   : > { %v5135_v25 = vsel %vm1365_vm10, %v5054_v62, %v1362_v54  ;;  %v7382_v58 = vrot.slane %v5038_v18, 2  ;;  %v1306_v13 = vsel %vm1305_vm11, %v1302_v26, %v1277_v8  ;;  %v1308_v52 = vsel %vm1307_vm5, %v1304_v22, %v1279_v63  ;;  %v7385_v8 = vld [vmem:[#allocation7_spill] sm:$0xff]  ;;  %v7386_v54 = vld [vmem:[#allocation9_spill] sm:$0xff] }
 0x17e   : > { %7381 = vst [vmem:[#allocation10_spill] sm:$0xff] %v5135_v25  ;;  %vm1370_vm4 = vcmp.eq.s32.totalorder %v4318_v1, %v5135_v25  ;;  %vm1372_vm9 = vcmp.eq.s32.totalorder %v4337_v7, %v5135_v25  ;;  %vm1309_vm6 = vcmp.lt.s32.totalorder %v1306_v13, %v5052_v28  ;;  %vm1311_vm15 = vcmp.lt.s32.totalorder %v1308_v52, %v1283_v50 }
 0x17f   : > { %v1208_v53 = vsel %vm5087_vm13, %v5038_v18, %v7382_v58  ;;  %vm3774_vm0 = vmpackc.low %vm1372_vm9, %vm1370_vm4  ;;  %v5148_v32 = vsel %vm1370_vm4, inf, %v4608_v61  ;;  %v5151_v62 = vsel %vm1372_vm9, inf, %v4611_v17  ;;  %v1310_v18 = vsel %vm1309_vm6, %v1306_v13, %v5052_v28 }
 0x180   : > { %7383 = vst [vmem:[#allocation12_spill] sm:$0xff] %v5148_v32  ;;  %v1312_v41 = vsel %vm1311_vm15, %v1308_v52, %v1283_v50  ;;  %v7384_v30 = vmov 1.0|1.0   ;;  %vm1374_vm12 = vcmp.eq.s32.totalorder %v4345_v45, %v5135_v25  ;;  %vm1376_vm7 = vcmp.eq.s32.totalorder %v4347_v37, %v5135_v25  ;;  %v7388_v50 = vld [vmem:[#allocation6_spill] sm:$0xff] }
 0x181   : > { %3775 = vmatprep.subr.msk.bf16.mxu1 %vm3774_vm0, %v7384_v30  ;;  %vm1313_vm13 = vcmp.lt.s32.totalorder %v1310_v18, %v1312_v41  ;;  %vm1378_vm8 = vcmp.eq.s32.totalorder %v4349_v10, %v5135_v25  ;;  %v5165_v17 = vsel %vm1374_vm12, inf, %v4619_v51  ;;  %v5171_v28 = vsel %vm1376_vm7, inf, %v4622_v38 }
 0x182   : > { %v1314_v61 = vsel %vm1313_vm13, %v1310_v18, %v1312_v41  ;;  %vm1380_vm14 = vcmp.eq.s32.totalorder %v4351_v14, %v5135_v25  ;;  %v1209_v29 = vrot.slane %v1208_v53, 1  ;;  %v1688_v48 = vmin.f32 %v5148_v32, %v5165_v17 }
 0x183   : > { %v1315_v60 = vrot.slane %v1314_v61, 4  ;;  %v1689_v20 = vmin.f32 %v5151_v62, %v5171_v28  ;;  %v5183_v51 = vsel %vm1378_vm8, inf, %v7385_v8  ;;  %v5189_v38 = vsel %vm1380_vm14, inf, %v7386_v54 }
 0x184   : > { %7387 = vst [vmem:[#allocation15_spill] sm:$0xff] %v5189_v38  ;;  %vm1382_vm3 = vcmp.eq.s32.totalorder %v4353_v0, %v5135_v25  ;;  %vm1384_vm2 = vcmp.eq.s32.totalorder %v4355_v15, %v5135_v25  ;;  %v1690_v63 = vmin.f32 %v1688_v48, %v5183_v51  ;;  %vm1386_vm10 = vcmp.eq.s32.totalorder %v4359_v59, %v5135_v25 }
 0x185   : > { %vm1316_vm1 = vcmp.lt.s32.totalorder %v1314_v61, %v1315_v60  ;;  %v1691_v26 = vmin.f32 %v1689_v20, %v5189_v38  ;;  %v5203_v58 = vsel %vm1382_vm3, inf, %v7388_v50  ;;  %v5209_v13 = vsel %vm1384_vm2, inf, %v4702_v6  ;;  %v7390_v50 = vld [vmem:[#allocation8_spill] sm:$0xff] }
 0x186   : > { %v1317_v22 = vsel %vm1316_vm1, %v1314_v61, %v1315_v60  ;;  %7389 = vst [vmem:[#allocation17_spill] sm:$0xff] %v5203_v58  ;;  %vm1388_vm11 = vcmp.eq.s32.totalorder %v4361_v56, %v5135_v25  ;;  %v1692_v18 = vmin.f32 %v1690_v63, %v5203_v58  ;;  %v5219_v61 = vsel %vm1386_vm10, inf, %v4745_v46 }
 0x187   : > { %v1318_v52 = vrot.slane %v1317_v22, 2  ;;  %v1693_v41 = vmin.f32 %v1691_v26, %v5209_v13  ;;  %v5225_v6 = vsel %vm1388_vm11, inf, %v4751_v42  ;;  %vm7226_vm5 = vcmp.eq.s32.totalorder %v4365_v27, %v5135_v25 }
 0x188   : > { %vm7221_vm4 = vcmp.eq.s32.totalorder %v7357_v5, %v5135_v25  ;;  %v1694_v60 = vmin.f32 %v1692_v18, %v5219_v61  ;;  %vm1210_vm6 = vcmp.lt.s32.totalorder %v1208_v53, %v1209_v29  ;;  %v5237_v42 = vsel %vm7226_vm5, inf, %v4788_v44 }
 0x189   : > { %vm1319_vm9 = vcmp.lt.s32.totalorder %v1317_v22, %v1318_v52  ;;  %v1695_v48 = vmin.f32 %v1693_v41, %v5225_v6  ;;  %v5243_v8 = vsel %vm7221_vm4, inf, %v4794_v43  ;;  %vm7225_vm15 = vcmp.eq.s32.totalorder %v7362_v11, %v5135_v25 }
 0x18a   : > { %v1320_v46 = vsel %vm1319_vm9, %v1317_v22, %v1318_v52  ;;  %v1696_v54 = vmin.f32 %v1694_v60, %v5237_v42  ;;  %vm7223_vm0 = vcmp.eq.s32.totalorder %v7363_v33, %v5135_v25  ;;  %vm7222_vm13 = vcmp.eq.s32.totalorder %v7368_v16, %v5135_v25 }
 0x18b   : > { %v1321_v20 = vrot.slane %v1320_v46, 1  ;;  %v1697_v63 = vmin.f32 %v1695_v48, %v5243_v8  ;;  %vm7224_vm9 = vcmp.eq.s32.totalorder %v4375_v21, %v5135_v25  ;;  %v1211_v44 = vsel %vm1210_vm6, %v1208_v53, %v1209_v29 }
 0x18c   : > { %v5259_v26 = vsel %vm7225_vm15, inf, %v4832_v4  ;;  %v5265_v22 = vsel %vm7223_vm0, inf, %v4838_v9  ;;  %v5271_v52 = vsel %vm7222_vm13, inf, %v7390_v50  ;;  %v7392_v4 = vld [vmem:[#allocation11_spill] sm:$0xff] }
 0x18d   : > { %vm1322_vm1 = vcmp.lt.s32.totalorder %v1320_v46, %v1321_v20  ;;  %v1698_v29 = vmin.f32 %v1696_v54, %v5259_v26  ;;  %v1699_v18 = vmin.f32 %v1697_v63, %v5265_v22  ;;  %v5281_v41 = vsel %vm7224_vm9, inf, %v7392_v4 }
 0x18e   : > { %v1323_v43 = vsel %vm1322_vm1, %v1320_v46, %v1321_v20 }
 0x18f   : > { %vm1363_vm4 = vcmp.lt.s32.totalorder %v1211_v44, %v1323_v43  ;;  %v1700_v63 = vmin.f32 %v1698_v29, %v5271_v52 }
 0x190   : > { %v5273_v53 = vsel %vm1363_vm4, %v1211_v44, %v1323_v43 }
 0x191   : > { %7391 = vst [vmem:[#allocation14_spill] sm:$0xff] %v5273_v53  ;;  %vm1369_vm6 = vcmp.eq.s32.totalorder %v4318_v1, %v5273_v53  ;;  %vm1371_vm1 = vcmp.eq.s32.totalorder %v4337_v7, %v5273_v53  ;;  %vm1373_vm4 = vcmp.eq.s32.totalorder %v4345_v45, %v5273_v53  ;;  %vm1375_vm13 = vcmp.eq.s32.totalorder %v4347_v37, %v5273_v53 }
 0x192   : > { %vm3776_vm0 = vmpackc.low %vm1371_vm1, %vm1369_vm6  ;;  %v5292_v9 = vsel %vm1369_vm6, inf, %v4602_v2  ;;  %v5295_v60 = vsel %vm1371_vm1, inf, %v4605_v3  ;;  %v5301_v48 = vsel %vm1373_vm4, inf, %v4630_v39  ;;  %v5307_v46 = vsel %vm1375_vm13, inf, %v4641_v36 }
 0x193   : > { %3777 = vmatpush1.bf16.msk.msra.mxu1 %vm3776_vm0, %v7384_v30  ;;  %vm3778_vm6 = vmpackc.low %vm1376_vm7, %vm1374_vm12  ;;  %v1667_v2 = vmin.f32 %v5292_v9, %v5301_v48  ;;  %v1668_v3 = vmin.f32 %v5295_v60, %v5307_v46  ;;  %vm1377_vm1 = vcmp.eq.s32.totalorder %v4349_v10, %v5273_v53  ;;  %vm1379_vm9 = vcmp.eq.s32.totalorder %v4351_v14, %v5273_v53 }
 0x194   : > { %3779 = vmatprep.subr.msk.bf16.mxu1 %vm3778_vm6, %v7384_v30  ;;  %v5329_v39 = vsel %vm1377_vm1, inf, %v4666_v23  ;;  %v5335_v36 = vsel %vm1379_vm9, inf, %v4680_v24  ;;  %vm1381_vm12 = vcmp.eq.s32.totalorder %v4353_v0, %v5273_v53  ;;  %vm1383_vm7 = vcmp.eq.s32.totalorder %v4355_v15, %v5273_v53  ;;  %vm3780_vm0 = vmpackc.low %vm1375_vm13, %vm1373_vm4 }
 0x195   : > { %7393 = vst [vmem:[#allocation16_spill] sm:$0xff] %v5329_v39  ;;  %7394 = vst [vmem:[#allocation32_spill] sm:$0xff] %v5335_v36  ;;  %v1669_v20 = vmin.f32 %v1667_v2, %v5329_v39  ;;  %v1670_v54 = vmin.f32 %v1668_v3, %v5335_v36  ;;  %v1701_v23 = vmin.f32 %v1699_v18, %v5281_v41  ;;  %v5355_v24 = vsel %vm1381_vm12, inf, %v4710_v35 }
 0x196   : > { %7395 = vst [vmem:[#allocation19_spill] sm:$0xff] %v5355_v24  ;;  %v5361_v44 = vsel %vm1383_vm7, inf, %v4718_v19  ;;  %vm1385_vm6 = vcmp.eq.s32.totalorder %v4359_v59, %v5273_v53  ;;  %vm1387_vm15 = vcmp.eq.s32.totalorder %v4361_v56, %v5273_v53  ;;  %vm3782_vm13 = vmpackc.low %vm1380_vm14, %vm1378_vm8  ;;  %vm1389_vm4 = vcmp.eq.s32.totalorder %v4365_v27, %v5273_v53 }
 0x197   : > { %3781 = vmatpush1.bf16.msk.msra.mxu1 %vm3780_vm0, %v7384_v30  ;;  %v1671_v35 = vmin.f32 %v1669_v20, %v5355_v24  ;;  %v1672_v19 = vmin.f32 %v1670_v54, %v5361_v44  ;;  %vm1391_vm5 = vcmp.eq.s32.totalorder %v7357_v5, %v5273_v53  ;;  %v5385_v43 = vsel %vm1385_vm6, inf, %v4759_v55  ;;  %vm3784_vm0 = vmpackc.low %vm1379_vm9, %vm1377_vm1 }
 0x198   : > { %3783 = vmatprep.subr.msk.bf16.mxu1 %vm3782_vm13, %v7384_v30  ;;  %7396 = vst [vmem:[#allocation21_spill] sm:$0xff] %v5385_v43  ;;  %v5391_v50 = vsel %vm1387_vm15, inf, %v4768_v40  ;;  %vm1393_vm8 = vcmp.eq.s32.totalorder %v7362_v11, %v5273_v53  ;;  %vm1395_vm14 = vcmp.eq.s32.totalorder %v7363_v33, %v5273_v53  ;;  %v5409_v55 = vsel %vm1389_vm4, inf, %v4802_v47  ;;  %vm3786_vm9 = vmpackc.low %vm1384_vm2, %vm1382_vm3 }
 0x199   : > { %v1673_v29 = vmin.f32 %v1671_v35, %v5385_v43  ;;  %v1674_v18 = vmin.f32 %v1672_v19, %v5391_v50  ;;  %v5415_v40 = vsel %vm1391_vm5, inf, %v4817_v31  ;;  %v1702_v4 = vmin.f32 %v1700_v63, %v1701_v23  ;;  %vm3788_vm3 = vmpackc.low %vm1383_vm7, %vm1381_vm12 }
 0x19a   : > { %vm1397_vm1 = vcmp.eq.s32.totalorder %v7368_v16, %v5273_v53  ;;  %vm1399_vm13 = vcmp.eq.s32.totalorder %v4375_v21, %v5273_v53  ;;  %v5435_v31 = vsel %vm1393_vm8, inf, %v4846_v49  ;;  %v5441_v3 = vsel %vm1395_vm14, inf, %v4860_v57  ;;  %vm3790_vm2 = vmpackc.low %vm1388_vm11, %vm1386_vm10 }
 0x19b   : > { %3785 = vmatpush1.bf16.msk.msra.mxu1 %vm3784_vm0, %v7384_v30  ;;  %v1675_v2 = vmin.f32 %v1673_v29, %v5409_v55  ;;  %v1676_v47 = vmin.f32 %v1674_v18, %v5415_v40  ;;  %7397 = vst [vmem:[#allocation18_spill] sm:$0xff] %v5435_v31  ;;  %7398 = vst [vmem:[#allocation20_spill] sm:$0xff] %v5441_v3  ;;  %v1703_v20 = vrot.slane %v1702_v4, 4  ;;  %v5455_v23 = vsel %vm1397_vm1, inf, %v4896_v12 }
 0x19c   : > { %3787 = vmatprep.subr.msk.bf16.mxu1 %vm3786_vm9, %v7384_v30  ;;  %7399 = vst [vmem:[#allocation33_spill] sm:$0xff] %v5455_v23  ;;  %v5461_v57 = vsel %vm1399_vm13, inf, %v4904_v34  ;;  %vm3792_vm12 = vmpackc.low %vm1387_vm15, %vm1385_vm6  ;;  %vm7401_vm10 = vcmp.eq.s32.totalorder %v4365_v27, %v5135_v25  ;;  %vm7402_vm11 = vcmp.eq.s32.totalorder %v7357_v5, %v5135_v25  ;;  %vm7403_vm6 = vcmp.eq.s32.totalorder %v7362_v11, %v5135_v25 }
 0x19d   : > { %v1677_v54 = vmin.f32 %v1675_v2, %v5435_v31  ;;  %v1678_v63 = vmin.f32 %v1676_v47, %v5441_v3  ;;  %v1704_v49 = vmin.f32 %v1702_v4, %v1703_v20  ;;  %7400 = vst [vmem:[#allocation34_spill] sm:$0xff] %v5461_v57  ;;  %vm3794_vm7 = vmpackc.low %vm7402_vm11, %vm7401_vm10  ;;  %vm7404_vm0 = vcmp.eq.s32.totalorder %v7363_v33, %v5135_v25 }
 0x19e   : > { %vm3796_vm15 = vmpackc.low %vm1391_vm5, %vm1389_vm4 }
 0x19f   : > { %3789 = vmatpush1.bf16.msk.msra.mxu1 %vm3788_vm3, %v7384_v30  ;;  %v1679_v35 = vmin.f32 %v1677_v54, %v5455_v23  ;;  %v1680_v12 = vmin.f32 %v1678_v63, %v5461_v57  ;;  %v1705_v19 = vrot.slane %v1704_v49, 2  ;;  %vm3798_vm9 = vmpackc.low %vm7404_vm0, %vm7403_vm6  ;;  %v7405_v54 = vld [vmem:[#allocation31_spill] sm:$0xff]  ;;  %vm7406_vm3 = vcmp.eq.s32.totalorder %v7368_v16, %v5135_v25 }
 0x1a0   : > { %3791 = vmatprep.subr.msk.bf16.mxu1 %vm3790_vm2, %v7384_v30  ;;  %vm3800_vm5 = vmpackc.low %vm1395_vm14, %vm1393_vm8  ;;  %vm7407_vm2 = vcmp.eq.s32.totalorder %v4375_v21, %v5135_v25 }
 0x1a1   : > { %v1681_v29 = vmin.f32 %v1679_v35, %v1680_v12  ;;  %v1706_v34 = vmin.f32 %v1704_v49, %v1705_v19  ;;  %v7408_v12 = vld [vmem:[#allocation30_spill] sm:$0xff]  ;;  %vm3804_vm8 = vmpackc.low %vm1399_vm13, %vm1397_vm1 }
 0x1a3   : > { %3793 = vmatpush1.bf16.msk.msra.mxu1 %vm3792_vm12, %v7384_v30  ;;  %v1682_v18 = vrot.slane %v1681_v29, 4  ;;  %v1707_v4 = vrot.slane %v1706_v34, 1  ;;  %vm3802_vm12 = vmpackc.low %vm7407_vm2, %vm7406_vm3 }
 0x1a4   : > { %3795 = vmatprep.subr.msk.bf16.mxu1 %vm3794_vm7, %v7384_v30 }
 0x1a5   : > { %v1683_v2 = vmin.f32 %v1681_v29, %v1682_v18  ;;  %v1708_v47 = vmin.f32 %v1706_v34, %v1707_v4 }
 0x1a7   : > { %3797 = vmatpush1.bf16.msk.msra.mxu1 %vm3796_vm15, %v7384_v30  ;;  %v1684_v20 = vrot.slane %v1683_v2, 2  ;;  %v5502_v63 = vmin.f32 %v7405_v54, %v1708_v47 }
 0x1a8   : > { %3799 = vmatprep.subr.msk.bf16.mxu1 %vm3798_vm9, %v7384_v30 }
 0x1a9   : > { %v1685_v49 = vmin.f32 %v1683_v2, %v1684_v20  ;;  %vm3737_vm4 = vcmp.eq.f32.partialorder %v5502_v63, inf  ;;  %v7409_v2 = vld [vmem:[#allocation13_spill] sm:$0xff]  ;;  %vm1734_vm11 = vcmp.eq.f32.partialorder %v5148_v32, %v5502_v63  ;;  %vm1746_vm2 = vcmp.eq.f32.partialorder %v5203_v58, %v5502_v63 }
 0x1aa   : > { %v1714_v19 = vsel %vm3737_vm4, %v7408_v12, 136 }
 0x1ab   : > { %3801 = vmatpush1.bf16.msk.msra.mxu1 %vm3800_vm5, %v7384_v30  ;;  %v1686_v35 = vrot.slane %v1685_v49, 1  ;;  %v1724_v29 = vrot.slane %v1714_v19, 4 }
 0x1ac   : > { %3803 = vmatprep.subr.msk.bf16.mxu1 %vm3802_vm12, %v7384_v30 }
 0x1ad   : > { %v1687_v34 = vmin.f32 %v1685_v49, %v1686_v35  ;;  %vm1725_vm14 = vcmp.lt.s32.totalorder %v1714_v19, %v1724_v29  ;;  %v7410_v49 = vmov 0.0  }
 0x1ae   : > { %v5533_v20 = vsel %vm1725_vm14, %v1714_v19, %v1724_v29  ;;  %v5550_v29 = vsel %vm1734_vm11, %v4318_v1, 136 }
 0x1af   : > { %3805 = vmatpush1.bf16.msk.msra.mxu1 %vm3804_vm8, %v7384_v30  ;;  %v5528_v18 = vmin.f32 %v7405_v54, %v1687_v34 }
 0x1b1   : > { %vm3736_vm10 = vcmp.eq.f32.partialorder %v5528_v18, inf  ;;  %vm1733_vm1 = vcmp.eq.f32.partialorder %v5292_v9, %v5528_v18  ;;  %vm1735_vm7 = vcmp.eq.f32.partialorder %v5295_v60, %v5528_v18  ;;  %vm1737_vm15 = vcmp.eq.f32.partialorder %v5301_v48, %v5528_v18 }
 0x1b2   : > { %v1713_v4 = vsel %vm3736_vm10, %v7408_v12, 136  ;;  %1530 = vmatmul.mubr.f32.vlgmr.msra.gmra.mrb[0].mxu1 %v7409_v2  ;;  %vm1739_vm6 = vcmp.eq.f32.partialorder %v5307_v46, %v5528_v18  ;;  %vm1741_vm0 = vcmp.eq.f32.partialorder %v5329_v39, %v5528_v18  ;;  %vm1743_vm9 = vcmp.eq.f32.partialorder %v5335_v36, %v5528_v18 }
 0x1b3   : > { %v1715_v47 = vrot.slane %v1713_v4, 4  ;;  %2553 = vmatprep.mubr.f32.mxu1 %v7410_v49  ;;  %vm1745_vm5 = vcmp.eq.f32.partialorder %v5355_v24, %v5528_v18  ;;  %vm1747_vm4 = vcmp.eq.f32.partialorder %v5361_v44, %v5528_v18  ;;  %v1765_v34 = vsel %vm1733_vm1, %v4318_v1, 136 }
 0x1b4   : > { %v1767_v2 = vsel %vm1735_vm7, %v4337_v7, 136  ;;  %v1771_v19 = vsel %vm1739_vm6, %v4347_v37, 136  ;;  %vm1749_vm8 = vcmp.eq.f32.partialorder %v5385_v43, %v5528_v18  ;;  %vm1751_vm14 = vcmp.eq.f32.partialorder %v5391_v50, %v5528_v18 }
 0x1b5   : > { %vm1716_vm13 = vcmp.lt.s32.totalorder %v1713_v4, %v1715_v47  ;;  %vm1753_vm10 = vcmp.eq.f32.partialorder %v5409_v55, %v5528_v18  ;;  %vm1755_vm11 = vcmp.eq.f32.partialorder %v5415_v40, %v5528_v18  ;;  %vm1757_vm7 = vcmp.eq.f32.partialorder %v5435_v31, %v5528_v18 }
 0x1b6   : > { %v1717_v35 = vsel %vm1716_vm13, %v1713_v4, %v1715_v47  ;;  %v1769_v47 = vsel %vm1737_vm15, %v4345_v45, 136  ;;  %vm1759_vm15 = vcmp.eq.f32.partialorder %v5441_v3, %v5528_v18  ;;  %vm1761_vm6 = vcmp.eq.f32.partialorder %v5455_v23, %v5528_v18 }
 0x1b7   : > { %v1718_v4 = vrot.slane %v1717_v35, 2  ;;  %vm1763_vm12 = vcmp.eq.f32.partialorder %v5461_v57, %v5528_v18  ;;  %v1773_v25 = vsel %vm1741_vm0, %v4349_v10, 136  ;;  %v1775_v53 = vsel %vm1743_vm9, %v4351_v14, 136 }
 0x1b8   : > { %vm1797_vm13 = vcmp.lt.s32.totalorder %v1765_v34, %v1769_v47  ;;  %vm1799_vm1 = vcmp.lt.s32.totalorder %v1767_v2, %v1771_v19  ;;  %v1777_v54 = vsel %vm1745_vm5, %v4353_v0, 136  ;;  %v1779_v39 = vsel %vm1747_vm4, %v4355_v15, 136 }
 0x1b9   : > { %vm1719_vm3 = vcmp.lt.s32.totalorder %v1717_v35, %v1718_v4  ;;  %v1798_v30 = vsel %vm1797_vm13, %v1765_v34, %v1769_v47  ;;  %v1800_v32 = vsel %vm1799_vm1, %v1767_v2, %v1771_v19  ;;  %v1781_v36 = vsel %vm1749_vm8, %v4359_v59, 136 }
 0x1ba   : > { %vm1801_vm0 = vcmp.lt.s32.totalorder %v1798_v30, %v1773_v25  ;;  %vm1803_vm9 = vcmp.lt.s32.totalorder %v1800_v32, %v1775_v53  ;;  %v1783_v24 = vsel %vm1751_vm14, %v4361_v56, 136  ;;  %v1785_v19 = vsel %vm1753_vm10, %v4365_v27, 136 }
 0x1bb   : > { %v1802_v34 = vsel %vm1801_vm0, %v1798_v30, %v1773_v25  ;;  %v1804_v2 = vsel %vm1803_vm9, %v1800_v32, %v1775_v53  ;;  %vm1748_vm5 = vcmp.eq.f32.partialorder %v5209_v13, %v5502_v63  ;;  %v5620_v47 = vsel %vm1719_vm3, %v1717_v35, %v1718_v4 }
 0x1bc   : > { %v1787_v43 = vsel %vm1755_vm11, %v7357_v5, 136  ;;  %vm1805_vm4 = vcmp.lt.s32.totalorder %v1802_v34, %v1777_v54  ;;  %vm1807_vm8 = vcmp.lt.s32.totalorder %v1804_v2, %v1779_v39  ;;  %vm1750_vm14 = vcmp.eq.f32.partialorder %v5219_v61, %v5502_v63 }
 0x1bd   : > { %v1789_v25 = vsel %vm1757_vm7, %v7362_v11, 136  ;;  %v1791_v32 = vsel %vm1759_vm15, %v7363_v33, 136  ;;  %v1806_v30 = vsel %vm1805_vm4, %v1802_v34, %v1777_v54  ;;  %v1808_v53 = vsel %vm1807_vm8, %v1804_v2, %v1779_v39 }
 0x1be   : > { %vm1752_vm3 = vcmp.eq.f32.partialorder %v5225_v6, %v5502_v63  ;;  %v1793_v35 = vsel %vm1761_vm6, %v7368_v16, 136  ;;  %v1795_v4 = vsel %vm1763_vm12, %v4375_v21, 136  ;;  %vm1809_vm10 = vcmp.lt.s32.totalorder %v1806_v30, %v1781_v36 }
 0x1bf   : > { %vm1811_vm11 = vcmp.lt.s32.totalorder %v1808_v53, %v1783_v24  ;;  %vm1754_vm1 = vcmp.eq.f32.partialorder %v5237_v42, %v5502_v63  ;;  %v1810_v54 = vsel %vm1809_vm10, %v1806_v30, %v1781_v36  ;;  %vm1756_vm13 = vcmp.eq.f32.partialorder %v5243_v8, %v5502_v63 }
 0x1c0   : > { %v1812_v34 = vsel %vm1811_vm11, %v1808_v53, %v1783_v24  ;;  %vm7411_vm7 = vcmp.eq.f32.partialorder %v5165_v17, %v5502_v63  ;;  %vm1813_vm15 = vcmp.lt.s32.totalorder %v1810_v54, %v1785_v19  ;;  %vm1758_vm12 = vcmp.eq.f32.partialorder %v5259_v26, %v5502_v63 }
 0x1c1   : > { %v1770_v2 = vsel %vm7411_vm7, %v4345_v45, 136  ;;  %vm1815_vm6 = vcmp.lt.s32.totalorder %v1812_v34, %v1787_v43  ;;  %vm7412_vm0 = vcmp.eq.f32.partialorder %v5151_v62, %v5502_v63  ;;  %vm7413_vm9 = vcmp.eq.f32.partialorder %v5171_v28, %v5502_v63 }
 0x1c2   : > { %v1768_v18 = vsel %vm7412_vm0, %v4337_v7, 136  ;;  %v1772_v36 = vsel %vm7413_vm9, %v4347_v37, 136  ;;  %v1814_v24 = vsel %vm1813_vm15, %v1810_v54, %v1785_v19  ;;  %v1816_v30 = vsel %vm1815_vm6, %v1812_v34, %v1787_v43 }
 0x1c3   : > { %vm7414_vm8 = vcmp.eq.f32.partialorder %v5183_v51, %v5502_v63  ;;  %vm7415_vm10 = vcmp.eq.f32.partialorder %v5189_v38, %v5502_v63  ;;  %vm1817_vm15 = vcmp.lt.s32.totalorder %v1814_v24, %v1789_v25  ;;  %vm1819_vm6 = vcmp.lt.s32.totalorder %v1816_v30, %v1791_v32 }
 0x1c4   : > { %v1774_v53 = vsel %vm7414_vm8, %v4349_v10, 136  ;;  %v1776_v39 = vsel %vm7415_vm10, %v4351_v14, 136  ;;  %v1778_v43 = vsel %vm1746_vm2, %v4353_v0, 136  ;;  %vm1836_vm0 = vcmp.lt.s32.totalorder %v5550_v29, %v1770_v2 }
 0x1c5   : > { %v1818_v19 = vsel %vm1817_vm15, %v1814_v24, %v1789_v25  ;;  %v1820_v54 = vsel %vm1819_vm6, %v1816_v30, %v1791_v32  ;;  %v1837_v34 = vsel %vm1836_vm0, %v5550_v29, %v1770_v2  ;;  %vm1838_vm9 = vcmp.lt.s32.totalorder %v1768_v18, %v1772_v36 }
 0x1c6   : > { %vm1821_vm8 = vcmp.lt.s32.totalorder %v1818_v19, %v1793_v35  ;;  %vm1823_vm10 = vcmp.lt.s32.totalorder %v1820_v54, %v1795_v4  ;;  %v1839_v57 = vsel %vm1838_vm9, %v1768_v18, %v1772_v36  ;;  %vm1840_vm11 = vcmp.lt.s32.totalorder %v1837_v34, %v1774_v53 }
 0x1c7   : > { %v1822_v23 = vsel %vm1821_vm8, %v1818_v19, %v1793_v35  ;;  %v1824_v3 = vsel %vm1823_vm10, %v1820_v54, %v1795_v4  ;;  %v1841_v31 = vsel %vm1840_vm11, %v1837_v34, %v1774_v53  ;;  %vm1842_vm7 = vcmp.lt.s32.totalorder %v1839_v57, %v1776_v39 }
 0x1c8   : > { %vm1825_vm4 = vcmp.lt.s32.totalorder %v1822_v23, %v1824_v3  ;;  %v1780_v58 = vsel %vm1748_vm5, %v4355_v15, 136  ;;  %v1843_v38 = vsel %vm1842_vm7, %v1839_v57, %v1776_v39  ;;  %vm1844_vm2 = vcmp.lt.s32.totalorder %v1841_v31, %v1778_v43 }
 0x1c9   : > { %v1826_v25 = vsel %vm1825_vm4, %v1822_v23, %v1824_v3  ;;  %v1782_v29 = vsel %vm1750_vm14, %v4359_v59, 136  ;;  %v1845_v32 = vsel %vm1844_vm2, %v1841_v31, %v1778_v43  ;;  %vm1846_vm15 = vcmp.lt.s32.totalorder %v1843_v38, %v1780_v58  ;;  %v7425_v3 = vld [vmem:[#allocation37_spill] sm:$0xff] }
 0x1ca   : > { %v1827_v35 = vrot.slane %v1826_v25, 4  ;;  %v1784_v4 = vsel %vm1752_vm3, %v4361_v56, 136  ;;  %v1847_v2 = vsel %vm1846_vm15, %v1843_v38, %v1780_v58  ;;  %vm1848_vm11 = vcmp.lt.s32.totalorder %v1845_v32, %v1782_v29 }
 0x1cb   : > { %v7416_v18 = vrot.slane %v5533_v20, 2  ;;  %v1786_v31 = vsel %vm1754_vm1, %v4365_v27, 136  ;;  %v1849_v23 = vsel %vm1848_vm11, %v1845_v32, %v1782_v29  ;;  %vm1850_vm14 = vcmp.lt.s32.totalorder %v1847_v2, %v1784_v4 }
 0x1cc   : > { %vm1828_vm4 = vcmp.lt.s32.totalorder %v1826_v25, %v1827_v35  ;;  %v1788_v38 = vsel %vm1756_vm13, %v7357_v5, 136  ;;  %v1851_v58 = vsel %vm1850_vm14, %v1847_v2, %v1784_v4  ;;  %vm1852_vm3 = vcmp.lt.s32.totalorder %v1849_v23, %v1786_v31 }
 0x1cd   : > { %vm5700_vm5 = vcmp.lt.s32.totalorder %v5533_v20, %v7416_v18  ;;  %v1829_v57 = vsel %vm1828_vm4, %v1826_v25, %v1827_v35  ;;  %v1790_v39 = vsel %vm1758_vm12, %v7362_v11, 136  ;;  %v1853_v36 = vsel %vm1852_vm3, %v1849_v23, %v1786_v31  ;;  %v7424_v31 = vld [vmem:[#allocation36_spill] sm:$0xff] }
 0x1ce   : > { %vm1854_vm7 = vcmp.lt.s32.totalorder %v1851_v58, %v1788_v38  ;;  %v1830_v24 = vrot.slane %v1829_v57, 2  ;;  %vm7419_vm1 = vcmp.eq.f32.partialorder %v5265_v22, %v5502_v63  ;;  %vm1856_vm6 = vcmp.lt.s32.totalorder %v1853_v36, %v1790_v39 }
 0x1cf   : > { %v1792_v30 = vsel %vm7419_vm1, %v7363_v33, 136  ;;  %v1855_v53 = vsel %vm1854_vm7, %v1851_v58, %v1788_v38  ;;  %vm7420_vm13 = vcmp.eq.f32.partialorder %v5271_v52, %v5502_v63  ;;  %vm7421_vm0 = vcmp.eq.f32.partialorder %v5281_v41, %v5502_v63 }
 0x1d0   : > { %v1794_v43 = vsel %vm7420_vm13, %v7368_v16, 136  ;;  %v1796_v19 = vsel %vm7421_vm0, %v4375_v21, 136  ;;  %v1857_v54 = vsel %vm1856_vm6, %v1853_v36, %v1790_v39  ;;  %vm1858_vm12 = vcmp.lt.s32.totalorder %v1855_v53, %v1792_v30 }
 0x1d1   : > { %vm1831_vm9 = vcmp.lt.s32.totalorder %v1829_v57, %v1830_v24  ;;  %v7422_v34 = vmov %v7416_v18  ;;  %v1859_v29 = vsel %vm1858_vm12, %v1855_v53, %v1792_v30  ;;  %vm1860_vm8 = vcmp.lt.s32.totalorder %v1857_v54, %v1794_v43 }
 0x1d2   : > { %v1729_v25 = vsel %vm5700_vm5, %v5533_v20, %v7422_v34  ;;  %v1832_v32 = vsel %vm1831_vm9, %v1829_v57, %v1830_v24  ;;  %v1861_v35 = vsel %vm1860_vm8, %v1857_v54, %v1794_v43  ;;  %vm1862_vm10 = vcmp.lt.s32.totalorder %v1859_v29, %v1796_v19  ;;  %v7432_v34 = vld [vmem:[#allocation16_spill] sm:$0xff] }
 0x1d3   : > { %v7423_v4 = vrot.slane %v5620_v47, 1  ;;  %v1833_v63 = vrot.slane %v1832_v32, 1  ;;  %v1863_v2 = vsel %vm1862_vm10, %v1859_v29, %v1796_v19  ;;  %v1730_v18 = vrot.slane %v1729_v25, 1 }
 0x1d4   : > { %vm1864_vm15 = vcmp.lt.s32.totalorder %v1861_v35, %v1863_v2  ;;  %vm855_vm11 = vcmp.eq.s32.totalorder %v7408_v12, %v7424_v31  ;;  %vm856_vm5 = vcmp.eq.s32.totalorder %v7408_v12, %v7425_v3  ;;  %v7436_v31 = vld [vmem:[#allocation19_spill] sm:$0xff] }
 0x1d5   : > { %vm1722_vm2 = vcmp.lt.s32.totalorder %v5620_v47, %v7423_v4  ;;  %vm1834_vm14 = vcmp.lt.s32.totalorder %v1832_v32, %v1833_v63  ;;  %v1865_v23 = vsel %vm1864_vm15, %v1861_v35, %v1863_v2  ;;  %v7426_v20 = vmov %v7423_v4 }
 0x1d6   : > { %v1723_v38 = vsel %vm1722_vm2, %v5620_v47, %v7426_v20  ;;  %v1835_v58 = vsel %vm1834_vm14, %v1832_v32, %v1833_v63  ;;  %v1866_v57 = vrot.slane %v1865_v23, 4  ;;  %v5744_v39 = vsel %vm855_vm11, 1.0, %v7410_v49  ;;  %v7434_v32 = vld [vmem:[#allocation32_spill] sm:$0xff] }
 0x1d7   : > { %vm1875_vm4 = vcmp.lt.s32.totalorder %v1723_v38, %v1835_v58  ;;  %vm5748_vm3 = vcmp.lt.s32.totalorder %v1729_v25, %v1730_v18  ;;  %v5753_v30 = vsel %vm856_vm5, 1.0, %v7410_v49 }
 0x1d8   : > { %v5746_v36 = vsel %vm1875_vm4, %v1723_v38, %v1835_v58  ;;  %vm1867_vm7 = vcmp.lt.s32.totalorder %v1865_v23, %v1866_v57  ;;  %v1732_v20 = vsel %vm5748_vm3, %v1729_v25, %v1730_v18 }
 0x1d9   : > { %7427 = vst [vmem:[#allocation23_spill] sm:$0xff] %v5746_v36  ;;  %vm1881_vm1 = vcmp.eq.s32.totalorder %v4318_v1, %v5746_v36  ;;  %vm1883_vm6 = vcmp.eq.s32.totalorder %v4337_v7, %v5746_v36  ;;  %v1868_v47 = vsel %vm1867_vm7, %v1865_v23, %v1866_v57  ;;  %vm1885_vm13 = vcmp.eq.s32.totalorder %v4345_v45, %v5746_v36 }
 0x1da   : > { %v5765_v53 = vsel %vm1881_vm1, inf, %v5292_v9  ;;  %v5771_v43 = vsel %vm1883_vm6, inf, %v5295_v60  ;;  %v1869_v19 = vrot.slane %v1868_v47, 2  ;;  %vm1887_vm0 = vcmp.eq.s32.totalorder %v4347_v37, %v5746_v36 }
 0x1db   : > { %v5779_v54 = vsel %vm1885_vm13, inf, %v5301_v48  ;;  %v5785_v9 = vsel %vm1887_vm0, inf, %v5307_v46  ;;  %vm1889_vm12 = vcmp.eq.s32.totalorder %v4349_v10, %v5746_v36  ;;  %vm1891_vm9 = vcmp.eq.s32.totalorder %v4351_v14, %v5746_v36 }
 0x1dc   : > { %7430 = vst [vmem:[#allocation25_spill] sm:$0xff] %v5779_v54  ;;  %7431 = vst [vmem:[#allocation22_spill] sm:$0xff] %v5785_v9  ;;  %vm1870_vm8 = vcmp.lt.s32.totalorder %v1868_v47, %v1869_v19  ;;  %v2179_v60 = vmin.f32 %v5765_v53, %v5779_v54  ;;  %v2180_v48 = vmin.f32 %v5771_v43, %v5785_v9  ;;  %v5799_v29 = vsel %vm1889_vm12, inf, %v7432_v34 }
 0x1dd   : > { %7433 = vst [vmem:[#allocation24_spill] sm:$0xff] %v5799_v29  ;;  %v1871_v46 = vsel %vm1870_vm8, %v1868_v47, %v1869_v19  ;;  %v5805_v35 = vsel %vm1891_vm9, inf, %v7434_v32  ;;  %vm7247_vm10 = vcmp.eq.s32.totalorder %v4353_v0, %v5746_v36  ;;  %vm7246_vm2 = vcmp.eq.s32.totalorder %v4355_v15, %v5746_v36 }
 0x1de   : > { %7435 = vst [vmem:[#allocation35_spill] sm:$0xff] %v5805_v35  ;;  %v1872_v4 = vrot.slane %v1871_v46, 1  ;;  %v2181_v63 = vmin.f32 %v2179_v60, %v5799_v29  ;;  %v2182_v2 = vmin.f32 %v2180_v48, %v5805_v35  ;;  %v5817_v23 = vsel %vm7247_vm10, inf, %v7436_v31 }
 0x1df   : > { %7437 = vst [vmem:[#allocation27_spill] sm:$0xff] %v5817_v23  ;;  %v5823_v3 = vsel %vm7246_vm2, inf, %v5361_v44  ;;  %vm7245_vm15 = vcmp.eq.s32.totalorder %v4359_v59, %v5746_v36  ;;  %vm7244_vm11 = vcmp.eq.s32.totalorder %v4361_v56, %v5746_v36  ;;  %vm7242_vm14 = vcmp.eq.s32.totalorder %v4365_v27, %v5746_v36  ;;  %v7439_v44 = vld [vmem:[#allocation21_spill] sm:$0xff]  ;;  %vm3812_vm2 = vmpackc.low %vm1887_vm0, %vm1885_vm13 }
 0x1e0   : > { %7438 = vst [vmem:[#allocation29_spill] sm:$0xff] %v5823_v3  ;;  %vm1873_vm5 = vcmp.lt.s32.totalorder %v1871_v46, %v1872_v4  ;;  %v2183_v38 = vmin.f32 %v2181_v63, %v5817_v23  ;;  %v2184_v58 = vmin.f32 %v2182_v2, %v5823_v3  ;;  %v5839_v47 = vsel %vm7245_vm15, inf, %v7439_v44 }
 0x1e1   : > { %v1874_v57 = vsel %vm1873_vm5, %v1871_v46, %v1872_v4  ;;  %7440 = vst [vmem:[#allocation26_spill] sm:$0xff] %v5839_v47  ;;  %v5845_v19 = vsel %vm7244_vm11, inf, %v5391_v50  ;;  %vm7243_vm4 = vcmp.eq.s32.totalorder %v7357_v5, %v5746_v36  ;;  %v5855_v24 = vsel %vm7242_vm14, inf, %v5409_v55  ;;  %v7444_v55 = vld [vmem:[#allocation12_spill] sm:$0xff] }
 0x1e2   : > { %7441 = vst [vmem:[#allocation28_spill] sm:$0xff] %v5845_v19  ;;  %vm1877_vm3 = vcmp.lt.s32.totalorder %v1732_v20, %v1874_v57  ;;  %v2185_v25 = vmin.f32 %v2183_v38, %v5839_v47  ;;  %v2186_v18 = vmin.f32 %v2184_v58, %v5845_v19  ;;  %v5863_v50 = vsel %vm7243_vm4, inf, %v5415_v40 }
 0x1e3   : > { %v5857_v60 = vsel %vm1877_vm3, %v1732_v20, %v1874_v57  ;;  %7443 = vst [vmem:[#allocation9_spill] sm:$0xff] %v5863_v50  ;;  %vm1905_vm7 = vcmp.eq.s32.totalorder %v7362_v11, %v5746_v36  ;;  %vm1907_vm8 = vcmp.eq.s32.totalorder %v7363_v33, %v5746_v36  ;;  %vm3808_vm3 = vmpackc.low %vm1883_vm6, %vm1881_vm1  ;;  %v7445_v32 = vmov 1.0|1.0  }
 0x1e4   : > { %7442 = vst [vmem:[#allocation7_spill] sm:$0xff] %v5857_v60  ;;  %vm1882_vm5 = vcmp.eq.s32.totalorder %v4318_v1, %v5857_v60  ;;  %vm1884_vm14 = vcmp.eq.s32.totalorder %v4337_v7, %v5857_v60  ;;  %vm1886_vm4 = vcmp.eq.s32.totalorder %v4345_v45, %v5857_v60  ;;  %vm1888_vm11 = vcmp.eq.s32.totalorder %v4347_v37, %v5857_v60 }
 0x1e5   : > { %vm3806_vm15 = vmpackc.low %vm1884_vm14, %vm1882_vm5  ;;  %v5884_v40 = vsel %vm1882_vm5, inf, %v7444_v55  ;;  %v5887_v48 = vsel %vm1884_vm14, inf, %v5151_v62  ;;  %v5890_v34 = vsel %vm1886_vm4, inf, %v5165_v17  ;;  %v5893_v46 = vsel %vm1888_vm11, inf, %v5171_v28  ;;  %v7447_v17 = vld [vmem:[#allocation15_spill] sm:$0xff] }
 0x1e6   : > { %3807 = vmatprep.subr.msk.bf16.mxu0 %vm3806_vm15, %v7445_v32  ;;  %v2200_v4 = vmin.f32 %v5884_v40, %v5890_v34  ;;  %v2201_v63 = vmin.f32 %v5887_v48, %v5893_v46  ;;  %vm1890_vm1 = vcmp.eq.s32.totalorder %v4349_v10, %v5857_v60  ;;  %vm1892_vm6 = vcmp.eq.s32.totalorder %v4351_v14, %v5857_v60  ;;  %vm3810_vm14 = vmpackc.low %vm1888_vm11, %vm1886_vm4 }
 0x1e7   : > { %3809 = vmatpush1.bf16.msk.msra.mxu0 %vm3808_vm3, %v7445_v32  ;;  %v5909_v62 = vsel %vm1890_vm1, inf, %v5183_v51  ;;  %v5915_v28 = vsel %vm1892_vm6, inf, %v7447_v17  ;;  %vm1894_vm15 = vcmp.eq.s32.totalorder %v4353_v0, %v5857_v60  ;;  %vm1896_vm5 = vcmp.eq.s32.totalorder %v4355_v15, %v5857_v60  ;;  %v7449_v51 = vld [vmem:[#allocation17_spill] sm:$0xff]  ;;  %vm3814_vm13 = vmpackc.low %vm1892_vm6, %vm1890_vm1 }
 0x1e8   : > { %7446 = vst [vmem:[#allocation6_spill] sm:$0xff] %v5909_v62  ;;  %7448 = vst [vmem:[#allocation8_spill] sm:$0xff] %v5915_v28  ;;  %3811 = vmatprep.subr.msk.bf16.mxu0 %vm3810_vm14, %v7445_v32  ;;  %v2202_v2 = vmin.f32 %v2200_v4, %v5909_v62  ;;  %v2203_v31 = vmin.f32 %v2201_v63, %v5915_v28  ;;  %v5928_v20 = vsel %vm1894_vm15, inf, %v7449_v51  ;;  %v5936_v38 = vsel %vm1896_vm5, inf, %v5209_v13 }
 0x1e9   : > { %vm1909_vm11 = vcmp.eq.s32.totalorder %v7368_v16, %v5746_v36  ;;  %vm1898_vm4 = vcmp.eq.s32.totalorder %v4359_v59, %v5857_v60  ;;  %vm1900_vm3 = vcmp.eq.s32.totalorder %v4361_v56, %v5857_v60  ;;  %vm1902_vm14 = vcmp.eq.s32.totalorder %v4365_v27, %v5857_v60  ;;  %vm3816_vm1 = vmpackc.low %vm1891_vm9, %vm1889_vm12 }
 0x1ea   : > { %v2204_v58 = vmin.f32 %v2202_v2, %v5928_v20  ;;  %v2205_v13 = vmin.f32 %v2203_v31, %v5936_v38  ;;  %v5956_v57 = vsel %vm1898_vm4, inf, %v5219_v61  ;;  %vm1904_vm10 = vcmp.eq.s32.totalorder %v7357_v5, %v5857_v60  ;;  %v7452_v2 = vld [vmem:[#allocation20_spill] sm:$0xff]  ;;  %vm3818_vm6 = vmpackc.low %vm1896_vm5, %vm1894_vm15 }
 0x1eb   : > { %3813 = vmatpush1.bf16.msk.msra.mxu0 %vm3812_vm2, %v7445_v32  ;;  %v5971_v44 = vsel %vm1900_vm3, inf, %v5225_v6  ;;  %v5977_v61 = vsel %vm1902_vm14, inf, %v5237_v42  ;;  %v2187_v55 = vmin.f32 %v2185_v25, %v5855_v24  ;;  %v2188_v4 = vmin.f32 %v2186_v18, %v5863_v50  ;;  %v7450_v25 = vld [vmem:[#allocation18_spill] sm:$0xff] }
 0x1ec   : > { %3815 = vmatprep.subr.msk.bf16.mxu0 %vm3814_vm13, %v7445_v32  ;;  %v2206_v63 = vmin.f32 %v2204_v58, %v5956_v57  ;;  %v2207_v17 = vmin.f32 %v2205_v13, %v5971_v44  ;;  %vm1906_vm0 = vcmp.eq.s32.totalorder %v7362_v11, %v5857_v60  ;;  %vm1908_vm2 = vcmp.eq.s32.totalorder %v7363_v33, %v5857_v60 }
 0x1ed   : > { %v5992_v6 = vsel %vm1904_vm10, inf, %v5243_v8  ;;  %v5998_v42 = vsel %vm1906_vm0, inf, %v5259_v26  ;;  %v6004_v18 = vsel %vm1905_vm7, inf, %v7450_v25  ;;  %v6010_v31 = vsel %vm1907_vm8, inf, %v7452_v2 }
 0x1ee   : > { %7451 = vst [vmem:[#allocation11_spill] sm:$0xff] %v6004_v18  ;;  %7453 = vst [vmem:[#allocation30_spill] sm:$0xff] %v6010_v31  ;;  %v2208_v8 = vmin.f32 %v2206_v63, %v5977_v61  ;;  %v2209_v26 = vmin.f32 %v2207_v17, %v5992_v6  ;;  %v2189_v51 = vmin.f32 %v2187_v55, %v6004_v18  ;;  %v6033_v13 = vsel %vm1908_vm2, inf, %v5265_v22  ;;  %v7454_v63 = vld [vmem:[#allocation33_spill] sm:$0xff] }
 0x1ef   : > { %v2190_v58 = vmin.f32 %v2188_v4, %v6010_v31  ;;  %3817 = vmatpush1.bf16.msk.msra.mxu0 %vm3816_vm1, %v7445_v32  ;;  %vm1910_vm12 = vcmp.eq.s32.totalorder %v7368_v16, %v5857_v60  ;;  %vm1912_vm9 = vcmp.eq.s32.totalorder %v4375_v21, %v5857_v60  ;;  %vm7250_vm13 = vcmp.eq.s32.totalorder %v4375_v21, %v5746_v36  ;;  %v6141_v60 = vld [vmem:[%s4940_s20] sm:$0x7] }
 0x1f0   : > { %3819 = vmatprep.subr.msk.bf16.mxu0 %vm3818_vm6, %v7445_v32  ;;  %v2210_v55 = vmin.f32 %v2208_v8, %v5998_v42  ;;  %v2211_v4 = vmin.f32 %v2209_v26, %v6033_v13  ;;  %v6048_v22 = vsel %vm1909_vm11, inf, %v7454_v63  ;;  %v1028_v17 = vmul.f32 0.0, %v5744_v39  ;;  %v7458_v8 = vld [vmem:[#allocation34_spill] sm:$0xff]  ;;  %vm3822_vm6 = vmpackc.low %vm1900_vm3, %vm1898_vm4  ;;  %7467 = vst [vmem:[#allocation16_spill] sm:$0xff] %v6141_v60 }
 0x1f1   : > { %7455 = vst [vmem:[#allocation13_spill] sm:$0xff] %v6048_v22  ;;  %v6055_v25 = vsel %vm1910_vm12, inf, %v5271_v52  ;;  %v6061_v2 = vsel %vm1912_vm9, inf, %v5281_v41  ;;  %v6067_v26 = vsel %vm7250_vm13, inf, %v7458_v8  ;;  %v2191_v39 = vmin.f32 %v2189_v51, %v6048_v22  ;;  %vm3826_vm4 = vmpackc.low %vm1904_vm10, %vm1902_vm14 }
 0x1f2   : > { %7456 = vst [vmem:[#allocation36_spill] sm:$0xff] %v6055_v25  ;;  %7457 = vst [vmem:[#allocation37_spill] sm:$0xff] %v6061_v2  ;;  %vm7459_vm15 = vcmp.eq.s32.totalorder %v4353_v0, %v5746_v36  ;;  %vm7460_vm5 = vcmp.eq.s32.totalorder %v4355_v15, %v5746_v36  ;;  %v2212_v52 = vmin.f32 %v2210_v55, %v6055_v25  ;;  %v1029_v31 = vmul.f32 0.0, %v5753_v30 }
 0x1f3   : > { %vm3820_vm1 = vmpackc.low %vm7460_vm5, %vm7459_vm15  ;;  %v2213_v41 = vmin.f32 %v2211_v4, %v6061_v2  ;;  %v2192_v63 = vmin.f32 %v2190_v58, %v6067_v26  ;;  %vm7461_vm15 = vcmp.eq.s32.totalorder %v4359_v59, %v5746_v36  ;;  %vm7462_vm5 = vcmp.eq.s32.totalorder %v4361_v56, %v5746_v36 }
 0x1f4   : > { %3821 = vmatpush1.bf16.msk.msra.mxu0 %vm3820_vm1, %v7445_v32  ;;  %vm3824_vm13 = vmpackc.low %vm7462_vm5, %vm7461_vm15  ;;  %v1030_v55 = vrot.slane %v1028_v17, 4  ;;  %v1036_v4 = vrot.slane %v1029_v31, 4  ;;  %vm7463_vm3 = vcmp.eq.s32.totalorder %v4365_v27, %v5746_v36  ;;  %vm7464_vm1 = vcmp.eq.s32.totalorder %v7357_v5, %v5746_v36 }
 0x1f5   : > { %3823 = vmatprep.subr.msk.bf16.mxu0 %vm3822_vm6, %v7445_v32  ;;  %v2214_v51 = vmin.f32 %v2212_v52, %v2213_v41  ;;  %v2193_v8 = vmin.f32 %v2191_v39, %v2192_v63  ;;  %vm3828_vm6 = vmpackc.low %vm7464_vm1, %vm7463_vm3 }
 0x1f6   : > { %v1031_v18 = vadd.f32 %v1030_v55, %v1028_v17  ;;  %v1037_v50 = vadd.f32 %v1036_v4, %v1029_v31  ;;  %vm3830_vm10 = vmpackc.low %vm1908_vm2, %vm1906_vm0  ;;  %v7465_v4 = vld [vmem:[#allocation31_spill] sm:$0xff] }
 0x1f7   : > { %v2215_v30 = vrot.slane %v2214_v51, 4  ;;  %v2194_v58 = vrot.slane %v2193_v8, 4  ;;  %vm3832_vm14 = vmpackc.low %vm1907_vm8, %vm1905_vm7  ;;  %vm7466_vm7 = vcmp.eq.s32.totalorder %v4375_v21, %v5746_v36 }
 0x1f8   : > { %3825 = vmatpush1.bf16.msk.msra.mxu0 %vm3824_vm13, %v7445_v32  ;;  %v1032_v17 = vrot.slane %v1031_v18, 2  ;;  %vm3834_vm0 = vmpackc.low %vm1912_vm9, %vm1910_vm12 }
 0x1f9   : > { %3827 = vmatprep.subr.msk.bf16.mxu0 %vm3826_vm4, %v7445_v32  ;;  %v2216_v39 = vmin.f32 %v2214_v51, %v2215_v30  ;;  %v2195_v52 = vmin.f32 %v2193_v8, %v2194_v58  ;;  %v1038_v30 = vrot.slane %v1037_v50, 2  ;;  %vm3836_vm8 = vmpackc.low %vm7466_vm7, %vm1909_vm11 }
 0x1fb   : > { %v2217_v41 = vrot.slane %v2216_v39, 2  ;;  %v2196_v63 = vrot.slane %v2195_v52, 2 }
 0x1fc   : > { %3829 = vmatpush1.bf16.msk.msra.mxu0 %vm3828_vm6, %v7445_v32 }
 0x1fd   : > { %3831 = vmatprep.subr.msk.bf16.mxu0 %vm3830_vm10, %v7445_v32  ;;  %v2218_v51 = vmin.f32 %v2216_v39, %v2217_v41  ;;  %v2197_v8 = vmin.f32 %v2195_v52, %v2196_v63  ;;  %v1033_v52 = vadd.f32 %v1032_v17, %v1031_v18  ;;  %v1039_v41 = vadd.f32 %v1038_v30, %v1037_v50 }
 0x1ff   : > { %v2219_v31 = vrot.slane %v2218_v51, 1  ;;  %v2198_v55 = vrot.slane %v2197_v8, 1 }
 0x200   : > { %3833 = vmatpush1.bf16.msk.msra.mxu0 %vm3832_vm14, %v7445_v32 }
 0x201   : > { %3835 = vmatprep.subr.msk.bf16.mxu0 %vm3834_vm0, %v7445_v32  ;;  %v2220_v58 = vmin.f32 %v2218_v51, %v2219_v31  ;;  %v2199_v63 = vmin.f32 %v2197_v8, %v2198_v55  ;;  %v1034_v51 = vrot.slane %v1033_v52, 1  ;;  %v1040_v31 = vrot.slane %v1039_v41, 1 }
 0x203   : > { %v6131_v39 = vmin.f32 %v7465_v4, %v2220_v58  ;;  %v6154_v50 = vmin.f32 %v7465_v4, %v2199_v63  ;;  %v6163_v17 = vadd.f32 %v1034_v51, %v1033_v52  ;;  %v6165_v30 = vadd.f32 %v1040_v31, %v1039_v41 }
 0x204   : > { %3837 = vmatpush1.bf16.msk.msra.mxu0 %vm3836_vm8, %v7445_v32 }
 0x205   : > { %vm3739_vm2 = vcmp.eq.f32.partialorder %v6131_v39, inf  ;;  %vm2274_vm12 = vcmp.eq.f32.partialorder %v6055_v25, %v6131_v39  ;;  %vm2246_vm11 = vcmp.eq.f32.partialorder %v5884_v40, %v6131_v39  ;;  %vm2250_vm9 = vcmp.eq.f32.partialorder %v5890_v34, %v6131_v39 }
 0x206   : > { %v2226_v58 = vsel %vm3739_vm2, %v7408_v12, 136  ;;  %vm2248_vm13 = vcmp.eq.f32.partialorder %v5887_v48, %v6131_v39  ;;  %vm2252_vm15 = vcmp.eq.f32.partialorder %v5893_v46, %v6131_v39  ;;  %v6161_v8 = vsel %vm2274_vm12, %v7368_v16, 136 }
 0x207   : > { %2042 = vmatmul.mubr.f32.vlgmr.msra.gmra.mrb[2].mxu0 %v6141_v60  ;;  %v2236_v18 = vrot.slane %v2226_v58, 4  ;;  %vm2254_vm4 = vcmp.eq.f32.partialorder %v5909_v62, %v6131_v39  ;;  %v2278_v63 = vsel %vm2246_vm11, %v4318_v1, 136  ;;  %v2282_v36 = vsel %vm2250_vm9, %v4345_v45, 136 }
 0x208   : > { %3065 = vmatprep.mubr.f32.mxu0 %v7410_v49  ;;  %vm2276_vm3 = vcmp.eq.f32.partialorder %v6061_v2, %v6131_v39  ;;  %vm2256_vm1 = vcmp.eq.f32.partialorder %v5915_v28, %v6131_v39  ;;  %v2280_v52 = vsel %vm2248_vm13, %v4337_v7, 136  ;;  %v2284_v41 = vsel %vm2252_vm15, %v4347_v37, 136 }
 0x209   : > { %vm2237_vm5 = vcmp.lt.s32.totalorder %v2226_v58, %v2236_v18  ;;  %vm2273_vm6 = vcmp.eq.f32.partialorder %v6048_v22, %v6154_v50  ;;  %vm2258_vm10 = vcmp.eq.f32.partialorder %v5928_v20, %v6131_v39  ;;  %vm2260_vm14 = vcmp.eq.f32.partialorder %v5936_v38, %v6131_v39 }
 0x20a   : > { %v2238_v55 = vsel %vm2237_vm5, %v2226_v58, %v2236_v18  ;;  %vm2262_vm0 = vcmp.eq.f32.partialorder %v5956_v57, %v6131_v39  ;;  %vm2264_vm7 = vcmp.eq.f32.partialorder %v5971_v44, %v6131_v39  ;;  %vm2266_vm8 = vcmp.eq.f32.partialorder %v5977_v61, %v6131_v39 }
 0x20b   : > { %v2239_v60 = vrot.slane %v2238_v55, 2  ;;  %vm2268_vm2 = vcmp.eq.f32.partialorder %v5992_v6, %v6131_v39  ;;  %v2286_v51 = vsel %vm2254_vm4, %v4349_v10, 136  ;;  %vm2348_vm12 = vcmp.lt.s32.totalorder %v2278_v63, %v2282_v36 }
 0x20c   : > { %v2349_v31 = vsel %vm2348_vm12, %v2278_v63, %v2282_v36  ;;  %vm2350_vm9 = vcmp.lt.s32.totalorder %v2280_v52, %v2284_v41  ;;  %vm3738_vm13 = vcmp.eq.f32.partialorder %v6154_v50, inf  ;;  %v2288_v58 = vsel %vm2256_vm1, %v4351_v14, 136 }
 0x20d   : > { %vm2240_vm11 = vcmp.lt.s32.totalorder %v2238_v55, %v2239_v60  ;;  %v2351_v18 = vsel %vm2350_vm9, %v2280_v52, %v2284_v41  ;;  %vm2352_vm15 = vcmp.lt.s32.totalorder %v2349_v31, %v2286_v51  ;;  %v2225_v4 = vsel %vm3738_vm13, %v7408_v12, 136 }
 0x20e   : > { %v2290_v25 = vsel %vm2258_vm10, %v4353_v0, 136  ;;  %v2292_v36 = vsel %vm2260_vm14, %v4355_v15, 136  ;;  %v2353_v63 = vsel %vm2352_vm15, %v2349_v31, %v2286_v51  ;;  %vm2354_vm5 = vcmp.lt.s32.totalorder %v2351_v18, %v2288_v58 }
 0x20f   : > { %v2241_v49 = vsel %vm2240_vm11, %v2238_v55, %v2239_v60  ;;  %v2355_v62 = vsel %vm2354_vm5, %v2351_v18, %v2288_v58  ;;  %vm2356_vm4 = vcmp.lt.s32.totalorder %v2353_v63, %v2290_v25  ;;  %v2227_v28 = vrot.slane %v2225_v4, 4 }
 0x210   : > { %vm2270_vm1 = vcmp.eq.f32.partialorder %v5998_v42, %v6131_v39  ;;  %v2294_v52 = vsel %vm2262_vm0, %v4359_v59, 136  ;;  %v2357_v41 = vsel %vm2356_vm4, %v2353_v63, %v2290_v25  ;;  %vm2358_vm10 = vcmp.lt.s32.totalorder %v2355_v62, %v2292_v36 }
 0x211   : > { %vm2272_vm12 = vcmp.eq.f32.partialorder %v6033_v13, %v6131_v39  ;;  %v2296_v60 = vsel %vm2264_vm7, %v4361_v56, 136  ;;  %v2359_v55 = vsel %vm2358_vm10, %v2355_v62, %v2292_v36  ;;  %vm2360_vm14 = vcmp.lt.s32.totalorder %v2357_v41, %v2294_v52 }
 0x212   : > { %v2242_v51 = vrot.slane %v2241_v49, 1  ;;  %v2298_v31 = vsel %vm2266_vm8, %v4365_v27, 136  ;;  %v2361_v58 = vsel %vm2360_vm14, %v2357_v41, %v2294_v52  ;;  %vm2362_vm0 = vcmp.lt.s32.totalorder %v2359_v55, %v2296_v60 }
 0x213   : > { %v2300_v25 = vsel %vm2268_vm2, %v7357_v5, 136  ;;  %v2363_v18 = vsel %vm2362_vm0, %v2359_v55, %v2296_v60  ;;  %vm2364_vm11 = vcmp.lt.s32.totalorder %v2361_v58, %v2298_v31  ;;  %vm2228_vm9 = vcmp.lt.s32.totalorder %v2225_v4, %v2227_v28 }
 0x214   : > { %v2308_v62 = vsel %vm2276_vm3, %v4375_v21, 136  ;;  %v2302_v36 = vsel %vm2270_vm1, %v7362_v11, 136  ;;  %v2365_v63 = vsel %vm2364_vm11, %v2361_v58, %v2298_v31  ;;  %vm2366_vm7 = vcmp.lt.s32.totalorder %v2363_v18, %v2300_v25 }
 0x215   : > { %v6238_v52 = vsel %vm2273_vm6, %v7368_v16, 136  ;;  %v2304_v41 = vsel %vm2272_vm12, %v7363_v33, 136  ;;  %v2367_v60 = vsel %vm2366_vm7, %v2363_v18, %v2300_v25  ;;  %vm2368_vm3 = vcmp.lt.s32.totalorder %v2365_v63, %v2302_v36 }
 0x216   : > { %vm2243_vm8 = vcmp.lt.s32.totalorder %v2241_v49, %v2242_v51  ;;  %v2369_v55 = vsel %vm2368_vm3, %v2365_v63, %v2302_v36  ;;  %vm2370_vm2 = vcmp.lt.s32.totalorder %v2367_v60, %v2304_v41  ;;  %v6244_v2 = vsel %vm2228_vm9, %v2225_v4, %v2227_v28  ;;  %v7468_v36 = vld [vmem:[#allocation9_spill] sm:$0xff]  ;;  %v7469_v63 = vld [vmem:[#allocation11_spill] sm:$0xff] }
 0x217   : > { %v2371_v31 = vsel %vm2370_vm2, %v2367_v60, %v2304_v41  ;;  %vm2372_vm13 = vcmp.lt.s32.totalorder %v2369_v55, %v6161_v8  ;;  %vm2245_vm15 = vcmp.eq.f32.partialorder %v5765_v53, %v6154_v50  ;;  %vm2247_vm6 = vcmp.eq.f32.partialorder %v5771_v43, %v6154_v50 }
 0x218   : > { %v2373_v58 = vsel %vm2372_vm13, %v2369_v55, %v6161_v8  ;;  %vm2374_vm5 = vcmp.lt.s32.totalorder %v2371_v31, %v2308_v62  ;;  %vm2249_vm4 = vcmp.eq.f32.partialorder %v5779_v54, %v6154_v50  ;;  %vm2251_vm1 = vcmp.eq.f32.partialorder %v5785_v9, %v6154_v50 }
 0x219   : > { %v6256_v28 = vsel %vm2243_vm8, %v2241_v49, %v2242_v51  ;;  %v2375_v4 = vsel %vm2374_vm5, %v2371_v31, %v2308_v62  ;;  %v7266_v39 = vrot.slane %v6244_v2, 2  ;;  %vm2253_vm10 = vcmp.eq.f32.partialorder %v5799_v29, %v6154_v50 }
 0x21a   : > { %vm2376_vm12 = vcmp.lt.s32.totalorder %v2373_v58, %v2375_v4  ;;  %vm2255_vm14 = vcmp.eq.f32.partialorder %v5805_v35, %v6154_v50  ;;  %vm2257_vm0 = vcmp.eq.f32.partialorder %v5817_v23, %v6154_v50  ;;  %v2277_v8 = vsel %vm2245_vm15, %v4318_v1, 136 }
 0x21b   : > { %v2377_v25 = vsel %vm2376_vm12, %v2373_v58, %v2375_v4  ;;  %v2279_v18 = vsel %vm2247_vm6, %v4337_v7, 136  ;;  %v2281_v49 = vsel %vm2249_vm4, %v4345_v45, 136  ;;  %v2283_v51 = vsel %vm2251_vm1, %v4347_v37, 136 }
 0x21c   : > { %v2378_v62 = vrot.slane %v2377_v25, 4  ;;  %vm2259_vm11 = vcmp.eq.f32.partialorder %v5823_v3, %v6154_v50  ;;  %vm2261_vm9 = vcmp.eq.f32.partialorder %v5839_v47, %v6154_v50  ;;  %vm2263_vm7 = vcmp.eq.f32.partialorder %v5845_v19, %v6154_v50  ;;  %v7473_v19 = vld [vmem:[#allocation30_spill] sm:$0xff] }
 0x21d   : > { %vm2275_vm3 = vcmp.eq.f32.partialorder %v6067_v26, %v6154_v50  ;;  %vm2265_vm8 = vcmp.eq.f32.partialorder %v5855_v24, %v6154_v50  ;;  %vm2267_vm2 = vcmp.eq.f32.partialorder %v7468_v36, %v6154_v50  ;;  %vm2269_vm13 = vcmp.eq.f32.partialorder %v7469_v63, %v6154_v50 }
 0x21e   : > { %v2285_v41 = vsel %vm2253_vm10, %v4349_v10, 136  ;;  %vm2379_vm15 = vcmp.lt.s32.totalorder %v2377_v25, %v2378_v62  ;;  %vm6290_vm6 = vcmp.lt.s32.totalorder %v6244_v2, %v7266_v39  ;;  %v2287_v55 = vsel %vm2255_vm14, %v4351_v14, 136 }
 0x21f   : > { %vm2309_vm5 = vcmp.lt.s32.totalorder %v2277_v8, %v2281_v49  ;;  %vm2311_vm4 = vcmp.lt.s32.totalorder %v2279_v18, %v2283_v51  ;;  %v2380_v31 = vsel %vm2379_vm15, %v2377_v25, %v2378_v62  ;;  %v2289_v58 = vsel %vm2257_vm0, %v4353_v0, 136 }
 0x220   : > { %v2310_v4 = vsel %vm2309_vm5, %v2277_v8, %v2281_v49  ;;  %v2312_v22 = vsel %vm2311_vm4, %v2279_v18, %v2283_v51  ;;  %v2381_v29 = vrot.slane %v2380_v31, 2  ;;  %v2291_v39 = vsel %vm2259_vm11, %v4355_v15, 136 }
 0x221   : > { %vm2313_vm1 = vcmp.lt.s32.totalorder %v2310_v4, %v2285_v41  ;;  %vm2315_vm10 = vcmp.lt.s32.totalorder %v2312_v22, %v2287_v55  ;;  %v2293_v25 = vsel %vm2261_vm9, %v4359_v59, 136  ;;  %v2295_v62 = vsel %vm2263_vm7, %v4361_v56, 136 }
 0x222   : > { %v2314_v8 = vsel %vm2313_vm1, %v2310_v4, %v2285_v41  ;;  %v2316_v18 = vsel %vm2315_vm10, %v2312_v22, %v2287_v55  ;;  %vm2382_vm12 = vcmp.lt.s32.totalorder %v2380_v31, %v2381_v29  ;;  %vm2271_vm11 = vcmp.eq.f32.partialorder %v7473_v19, %v6154_v50 }
 0x223   : > { %vm2317_vm14 = vcmp.lt.s32.totalorder %v2314_v8, %v2289_v58  ;;  %vm2319_vm0 = vcmp.lt.s32.totalorder %v2316_v18, %v2291_v39  ;;  %v2383_v23 = vsel %vm2382_vm12, %v2380_v31, %v2381_v29  ;;  %v2297_v22 = vsel %vm2265_vm8, %v4365_v27, 136 }
 0x224   : > { %v2318_v35 = vsel %vm2317_vm14, %v2314_v8, %v2289_v58  ;;  %v2320_v9 = vsel %vm2319_vm0, %v2316_v18, %v2291_v39  ;;  %v2384_v54 = vrot.slane %v2383_v23, 1  ;;  %v2299_v29 = vsel %vm2267_vm2, %v7357_v5, 136 }
 0x225   : > { %vm2321_vm9 = vcmp.lt.s32.totalorder %v2318_v35, %v2293_v25  ;;  %vm2323_vm7 = vcmp.lt.s32.totalorder %v2320_v9, %v2295_v62  ;;  %v2303_v41 = vsel %vm2271_vm11, %v7363_v33, 136  ;;  %v2307_v58 = vsel %vm2275_vm3, %v4375_v21, 136 }
 0x226   : > { %v2324_v39 = vsel %vm2323_vm7, %v2320_v9, %v2295_v62  ;;  %vm2385_vm15 = vcmp.lt.s32.totalorder %v2383_v23, %v2384_v54 }
 0x227   : > { %v1019_v49 = vpop.f32.mrb[0].mxu0  ;;  %vm2327_vm4 = vcmp.lt.s32.totalorder %v2324_v39, %v2299_v29 }
 0x228   : > { %v6315_v51 = vadd.f32 %v6163_v17, %v1019_v49  ;;  %v1021_v3 = vpop.f32.mrb[1].mxu0  ;;  %v2322_v17 = vsel %vm2321_vm9, %v2318_v35, %v2293_v25  ;;  %v2328_v31 = vsel %vm2327_vm4, %v2324_v39, %v2299_v29  ;;  %v7475_v35 = vrot.slane %v6244_v2, 2  ;;  %v7476_v49 = vld [vmem:[#allocation6_spill] sm:$0xff] }
 0x229   : > { %v6318_v47 = vadd.f32 %v6165_v30, %v1021_v3  ;;  %v2301_v3 = vsel %vm2269_vm13, %v7362_v11, 136  ;;  %vm2325_vm5 = vcmp.lt.s32.totalorder %v2322_v17, %v2297_v22  ;;  %v2386_v30 = vsel %vm2385_vm15, %v2383_v23, %v2384_v54 }
 0x22a   : > { %v2326_v55 = vsel %vm2325_vm5, %v2322_v17, %v2297_v22  ;;  %vm2389_vm8 = vcmp.lt.s32.totalorder %v6256_v28, %v2386_v30  ;;  %vm2331_vm1 = vcmp.lt.s32.totalorder %v2328_v31, %v2303_v41  ;;  %v2232_v54 = vsel %vm6290_vm6, %v6244_v2, %v7475_v35  ;;  %v7477_v22 = vld [vmem:[#allocation8_spill] sm:$0xff] }
 0x22b   : > { %7472 = vst [vmem:[#allocation32_spill] sm:$0xff] %v6318_v47  ;;  %vm2329_vm2 = vcmp.lt.s32.totalorder %v2326_v55, %v2301_v3  ;;  %v6341_v9 = vsel %vm2389_vm8, %v6256_v28, %v2386_v30  ;;  %v2332_v4 = vsel %vm2331_vm1, %v2328_v31, %v2303_v41  ;;  %v2233_v25 = vrot.slane %v2232_v54, 1 }
 0x22c   : > { %7474 = vst [vmem:[#allocation19_spill] sm:$0xff] %v6341_v9  ;;  %v2330_v23 = vsel %vm2329_vm2, %v2326_v55, %v2301_v3  ;;  %vm2394_vm13 = vcmp.eq.s32.totalorder %v4318_v1, %v6341_v9  ;;  %vm2396_vm3 = vcmp.eq.s32.totalorder %v4337_v7, %v6341_v9  ;;  %vm2335_vm12 = vcmp.lt.s32.totalorder %v2332_v4, %v2307_v58 }
 0x22d   : > { %vm2333_vm10 = vcmp.lt.s32.totalorder %v2330_v23, %v6238_v52  ;;  %vm3838_vm14 = vmpackc.low %vm2396_vm3, %vm2394_vm13  ;;  %v6354_v50 = vsel %vm2394_vm13, inf, %v5884_v40  ;;  %v6357_v28 = vsel %vm2396_vm3, inf, %v5887_v48  ;;  %v2336_v60 = vsel %vm2335_vm12, %v2332_v4, %v2307_v58  ;;  %v7479_v4 = vld [vmem:[#allocation10_spill] sm:$0xff] }
 0x22e   : > { %v2334_v2 = vsel %vm2333_vm10, %v2330_v23, %v6238_v52  ;;  %3839 = vmatprep.subr.msk.bf16.mxu1 %vm3838_vm14, %v7445_v32  ;;  %vm2398_vm0 = vcmp.eq.s32.totalorder %v4345_v45, %v6341_v9  ;;  %vm2400_vm11 = vcmp.eq.s32.totalorder %v4347_v37, %v6341_v9  ;;  %vm2402_vm9 = vcmp.eq.s32.totalorder %v4349_v10, %v6341_v9  ;;  %v7478_v23 = vld [vmem:[#allocation14_spill] sm:$0xff] }
 0x22f   : > { %vm2337_vm6 = vcmp.lt.s32.totalorder %v2334_v2, %v2336_v60  ;;  %v6371_v48 = vsel %vm2398_vm0, inf, %v5890_v34  ;;  %v6377_v52 = vsel %vm2400_vm11, inf, %v5893_v46  ;;  %vm2404_vm7 = vcmp.eq.s32.totalorder %v4351_v14, %v6341_v9 }
 0x230   : > { %v2338_v40 = vsel %vm2337_vm6, %v2334_v2, %v2336_v60  ;;  %v2712_v8 = vmin.f32 %v6354_v50, %v6371_v48  ;;  %v2713_v18 = vmin.f32 %v6357_v28, %v6377_v52  ;;  %v6389_v34 = vsel %vm2402_vm9, inf, %v7476_v49 }
 0x231   : > { %v2339_v62 = vrot.slane %v2338_v40, 4  ;;  %v6395_v46 = vsel %vm2404_vm7, inf, %v7477_v22  ;;  %vm2406_vm15 = vcmp.eq.s32.totalorder %v4353_v0, %v6341_v9  ;;  %vm2408_vm5 = vcmp.eq.s32.totalorder %v4355_v15, %v6341_v9 }
 0x232   : > { %v2714_v29 = vmin.f32 %v2712_v8, %v6389_v34  ;;  %v2715_v17 = vmin.f32 %v2713_v18, %v6395_v46  ;;  %vm2410_vm8 = vcmp.eq.s32.totalorder %v4359_v59, %v6341_v9  ;;  %v6409_v3 = vsel %vm2406_vm15, inf, %v5928_v20 }
 0x233   : > { %vm2340_vm4 = vcmp.lt.s32.totalorder %v2338_v40, %v2339_v62  ;;  %v6415_v30 = vsel %vm2408_vm5, inf, %v5936_v38  ;;  %vm7275_vm2 = vcmp.eq.s32.totalorder %v4361_v56, %v6341_v9  ;;  %v6425_v20 = vsel %vm2410_vm8, inf, %v5956_v57 }
 0x234   : > { %v2341_v39 = vsel %vm2340_vm4, %v2338_v40, %v2339_v62  ;;  %v2716_v55 = vmin.f32 %v2714_v29, %v6409_v3  ;;  %v2717_v31 = vmin.f32 %v2715_v17, %v6415_v30  ;;  %v6431_v38 = vsel %vm7275_vm2, inf, %v5971_v44  ;;  %v7481_v17 = vld [vmem:[#allocation36_spill] sm:$0xff] }
 0x235   : > { %v2342_v41 = vrot.slane %v2341_v39, 2  ;;  %vm7274_vm1 = vcmp.eq.s32.totalorder %v4365_v27, %v6341_v9  ;;  %vm7276_vm13 = vcmp.eq.s32.totalorder %v7357_v5, %v6341_v9  ;;  %vm2234_vm10 = vcmp.lt.s32.totalorder %v2232_v54, %v2233_v25 }
 0x236   : > { %v2718_v58 = vmin.f32 %v2716_v55, %v6425_v20  ;;  %v2719_v35 = vmin.f32 %v2717_v31, %v6431_v38  ;;  %vm1367_vm12 = vcmp.eq.s32.totalorder %v7408_v12, %v7478_v23  ;;  %vm1368_vm14 = vcmp.eq.s32.totalorder %v7408_v12, %v7479_v4  ;;  %v7485_v4 = vld [vmem:[#allocation24_spill] sm:$0xff] }
 0x237   : > { %vm2343_vm3 = vcmp.lt.s32.totalorder %v2341_v39, %v2342_v41  ;;  %v6447_v2 = vsel %vm7274_vm1, inf, %v5977_v61  ;;  %v6453_v60 = vsel %vm7276_vm13, inf, %v5992_v6  ;;  %vm2418_vm6 = vcmp.eq.s32.totalorder %v7362_v11, %v6341_v9 }
 0x238   : > { %v2344_v57 = vsel %vm2343_vm3, %v2341_v39, %v2342_v41  ;;  %v2720_v40 = vmin.f32 %v2718_v58, %v6447_v2  ;;  %v2721_v62 = vmin.f32 %v2719_v35, %v6453_v60  ;;  %vm7279_vm4 = vcmp.eq.s32.totalorder %v7363_v33, %v6341_v9  ;;  %v7483_v58 = vld [vmem:[#allocation25_spill] sm:$0xff] }
 0x239   : > { %v2345_v44 = vrot.slane %v2344_v57, 1  ;;  %vm7278_vm3 = vcmp.eq.s32.totalorder %v7368_v16, %v6341_v9  ;;  %vm7277_vm2 = vcmp.eq.s32.totalorder %v4375_v21, %v6341_v9  ;;  %v2235_v61 = vsel %vm2234_vm10, %v2232_v54, %v2233_v25 }
 0x23a   : > { %v7480_v8 = vmov 0.0   ;;  %v6471_v22 = vsel %vm2418_vm6, inf, %v5998_v42  ;;  %v6477_v29 = vsel %vm7279_vm4, inf, %v6033_v13  ;;  %v6483_v54 = vsel %vm7278_vm3, inf, %v7481_v17  ;;  %v7482_v42 = vld [vmem:[#allocation37_spill] sm:$0xff] }
 0x23b   : > { %vm2346_vm1 = vcmp.lt.s32.totalorder %v2344_v57, %v2345_v44  ;;  %v3526_v18 = vsel %vm1367_vm12, 1.0, %v7480_v8  ;;  %v3527_v49 = vsel %vm1368_vm14, 1.0, %v7480_v8  ;;  %v2722_v39 = vmin.f32 %v2720_v40, %v6471_v22  ;;  %v7486_v40 = vld [vmem:[#allocation35_spill] sm:$0xff] }
 0x23c   : > { %v2347_v6 = vsel %vm2346_vm1, %v2344_v57, %v2345_v44  ;;  %v2723_v41 = vmin.f32 %v2721_v62, %v6477_v29  ;;  %v6493_v55 = vsel %vm7277_vm2, inf, %v7482_v42  ;;  %v7484_v57 = vld [vmem:[#allocation22_spill] sm:$0xff] }
 0x23d   : > { %vm2387_vm13 = vcmp.lt.s32.totalorder %v2235_v61, %v2347_v6  ;;  %v2724_v17 = vmin.f32 %v2722_v39, %v6483_v54 }
 0x23e   : > { %v6485_v25 = vsel %vm2387_vm13, %v2235_v61, %v2347_v6  ;;  %v2725_v42 = vmin.f32 %v2723_v41, %v6493_v55 }
 0x23f   : > { %vm2393_vm1 = vcmp.eq.s32.totalorder %v4318_v1, %v6485_v25  ;;  %vm2395_vm10 = vcmp.eq.s32.totalorder %v4337_v7, %v6485_v25  ;;  %vm2397_vm13 = vcmp.eq.s32.totalorder %v4345_v45, %v6485_v25  ;;  %vm2399_vm12 = vcmp.eq.s32.totalorder %v4347_v37, %v6485_v25 }
 0x240   : > { %vm3840_vm14 = vmpackc.low %vm2395_vm10, %vm2393_vm1  ;;  %v6504_v13 = vsel %vm2393_vm1, inf, %v5765_v53  ;;  %v6507_v31 = vsel %vm2395_vm10, inf, %v5771_v43  ;;  %v6513_v35 = vsel %vm2397_vm13, inf, %v7483_v58  ;;  %v6519_v23 = vsel %vm2399_vm12, inf, %v7484_v57  ;;  %v7487_v58 = vld [vmem:[#allocation27_spill] sm:$0xff] }
 0x241   : > { %3841 = vmatpush1.bf16.msk.msra.mxu1 %vm3840_vm14, %v7445_v32  ;;  %vm3842_vm1 = vmpackc.low %vm2400_vm11, %vm2398_vm0  ;;  %v2691_v53 = vmin.f32 %v6504_v13, %v6513_v35  ;;  %v2692_v43 = vmin.f32 %v6507_v31, %v6519_v23  ;;  %vm2401_vm10 = vcmp.eq.s32.totalorder %v4349_v10, %v6485_v25  ;;  %vm2403_vm2 = vcmp.eq.s32.totalorder %v4351_v14, %v6485_v25 }
 0x242   : > { %3843 = vmatprep.subr.msk.bf16.mxu1 %vm3842_vm1, %v7445_v32  ;;  %v6541_v44 = vsel %vm2401_vm10, inf, %v7485_v4  ;;  %v6547_v62 = vsel %vm2403_vm2, inf, %v7486_v40  ;;  %vm2405_vm0 = vcmp.eq.s32.totalorder %v4353_v0, %v6485_v25  ;;  %vm2407_vm11 = vcmp.eq.s32.totalorder %v4355_v15, %v6485_v25  ;;  %vm3844_vm14 = vmpackc.low %vm2399_vm12, %vm2397_vm13  ;;  %v7489_v4 = vld [vmem:[#allocation26_spill] sm:$0xff] }
 0x243   : > { %v2693_v61 = vmin.f32 %v2691_v53, %v6541_v44  ;;  %v2694_v6 = vmin.f32 %v2692_v43, %v6547_v62  ;;  %v6567_v57 = vsel %vm2405_vm0, inf, %v7487_v58  ;;  %v7488_v53 = vld [vmem:[#allocation29_spill] sm:$0xff]  ;;  %vm2409_vm1 = vcmp.eq.s32.totalorder %v4359_v59, %v6485_v25  ;;  %vm3846_vm13 = vmpackc.low %vm2404_vm7, %vm2402_vm9  ;;  %v7490_v58 = vld [vmem:[#allocation28_spill] sm:$0xff] }
 0x244   : > { %v6573_v39 = vsel %vm2407_vm11, inf, %v7488_v53  ;;  %vm2411_vm3 = vcmp.eq.s32.totalorder %v4361_v56, %v6485_v25  ;;  %vm2413_vm12 = vcmp.eq.s32.totalorder %v4365_v27, %v6485_v25  ;;  %vm2415_vm4 = vcmp.eq.s32.totalorder %v7357_v5, %v6485_v25 }
 0x245   : > { %3845 = vmatpush1.bf16.msk.msra.mxu1 %vm3844_vm14, %v7445_v32  ;;  %v2695_v41 = vmin.f32 %v2693_v61, %v6567_v57  ;;  %v2696_v43 = vmin.f32 %v2694_v6, %v6573_v39  ;;  %v6597_v40 = vsel %vm2409_vm1, inf, %v7489_v4  ;;  %v6603_v61 = vsel %vm2411_vm3, inf, %v7490_v58  ;;  %vm3848_vm14 = vmpackc.low %vm2403_vm2, %vm2401_vm10 }
 0x246   : > { %3847 = vmatprep.subr.msk.bf16.mxu1 %vm3846_vm13, %v7445_v32  ;;  %v1541_v6 = vmul.f32 0.0, %v3527_v49  ;;  %vm2417_vm9 = vcmp.eq.s32.totalorder %v7362_v11, %v6485_v25  ;;  %vm2419_vm7 = vcmp.eq.s32.totalorder %v7363_v33, %v6485_v25  ;;  %v6621_v49 = vsel %vm2413_vm12, inf, %v5855_v24  ;;  %vm3850_vm2 = vmpackc.low %vm2408_vm5, %vm2406_vm15 }
 0x247   : > { %v2697_v53 = vmin.f32 %v2695_v41, %v6597_v40  ;;  %v2698_v8 = vmin.f32 %v2696_v43, %v6603_v61  ;;  %v6627_v41 = vsel %vm2415_vm4, inf, %v7468_v36  ;;  %v2726_v43 = vmin.f32 %v2724_v17, %v2725_v42  ;;  %vm3852_vm15 = vmpackc.low %vm2407_vm11, %vm2405_vm0 }
 0x248   : > { %7491 = vst [vmem:[#allocation21_spill] sm:$0xff] %v6627_v41  ;;  %v1540_v4 = vmul.f32 0.0, %v3526_v18  ;;  %vm2421_vm10 = vcmp.eq.s32.totalorder %v7368_v16, %v6485_v25  ;;  %vm2423_vm13 = vcmp.eq.s32.totalorder %v4375_v21, %v6485_v25  ;;  %v6647_v36 = vsel %vm2417_vm9, inf, %v7469_v63  ;;  %vm3856_vm11 = vmpackc.low %vm2411_vm3, %vm2409_vm1 }
 0x249   : > { %3849 = vmatpush1.bf16.msk.msra.mxu1 %vm3848_vm14, %v7445_v32  ;;  %v2699_v24 = vmin.f32 %v2697_v53, %v6621_v49  ;;  %v2700_v58 = vmin.f32 %v2698_v8, %v6627_v41  ;;  %7492 = vst [vmem:[#allocation12_spill] sm:$0xff] %v6647_v36  ;;  %v6653_v18 = vsel %vm2419_vm7, inf, %v7473_v19  ;;  %v2727_v8 = vrot.slane %v2726_v43, 4  ;;  %v7494_v53 = vld [vmem:[#allocation13_spill] sm:$0xff]  ;;  %vm3860_vm3 = vmpackc.low %vm2415_vm4, %vm2413_vm12 }
 0x24a   : > { %3851 = vmatprep.subr.msk.bf16.mxu1 %vm3850_vm2, %v7445_v32  ;;  %7493 = vst [vmem:[#allocation15_spill] sm:$0xff] %v6653_v18  ;;  %v6667_v47 = vsel %vm2421_vm10, inf, %v7494_v53  ;;  %v6673_v19 = vsel %vm2423_vm13, inf, %v6067_v26  ;;  %vm7495_vm5 = vcmp.eq.s32.totalorder %v4361_v56, %v6341_v9  ;;  %vm7497_vm14 = vcmp.eq.s32.totalorder %v7357_v5, %v6341_v9  ;;  %vm3864_vm4 = vmpackc.low %vm2419_vm7, %vm2417_vm9 }
 0x24b   : > { %v2701_v17 = vmin.f32 %v2699_v24, %v6647_v36  ;;  %v2702_v42 = vmin.f32 %v2700_v58, %v6653_v18  ;;  %v2728_v63 = vmin.f32 %v2726_v43, %v2727_v8  ;;  %vm3854_vm0 = vmpackc.low %vm7495_vm5, %vm2410_vm8  ;;  %v1542_v58 = vrot.slane %v1540_v4, 4 }
 0x24c   : > { %v1548_v8 = vrot.slane %v1541_v6, 4  ;;  %vm7496_vm8 = vcmp.eq.s32.totalorder %v4365_v27, %v6341_v9  ;;  %vm7498_vm1 = vcmp.eq.s32.totalorder %v7363_v33, %v6341_v9  ;;  %vm7501_vm5 = vcmp.eq.s32.totalorder %v4375_v21, %v6341_v9  ;;  %vm3868_vm9 = vmpackc.low %vm2423_vm13, %vm2421_vm10 }
 0x24d   : > { %3853 = vmatpush1.bf16.msk.msra.mxu1 %vm3852_vm15, %v7445_v32  ;;  %v2703_v43 = vmin.f32 %v2701_v17, %v6667_v47  ;;  %v2704_v24 = vmin.f32 %v2702_v42, %v6673_v19  ;;  %v2729_v53 = vrot.slane %v2728_v63, 2  ;;  %vm3858_vm2 = vmpackc.low %vm7497_vm14, %vm7496_vm8  ;;  %v1543_v42 = vadd.f32 %v1542_v58, %v1540_v4 }
 0x24e   : > { %3855 = vmatprep.subr.msk.bf16.mxu1 %vm3854_vm0, %v7445_v32  ;;  %vm3862_vm15 = vmpackc.low %vm7498_vm1, %vm2418_vm6  ;;  %vm7500_vm6 = vcmp.eq.s32.totalorder %v7368_v16, %v6341_v9  ;;  %v6740_v41 = vsub.s32 1, %v7408_v12 }
 0x24f   : > { %v2705_v26 = vmin.f32 %v2703_v43, %v2704_v24  ;;  %v2730_v18 = vmin.f32 %v2728_v63, %v2729_v53  ;;  %v1549_v43 = vadd.f32 %v1548_v8, %v1541_v6  ;;  %v1544_v4 = vrot.slane %v1543_v42, 2  ;;  %v7499_v8 = vld [vmem:[#allocation31_spill] sm:$0xff]  ;;  %vm3866_vm0 = vmpackc.low %vm7501_vm5, %vm7500_vm6 }
 0x251   : > { %3857 = vmatpush1.bf16.msk.msra.mxu1 %vm3856_vm11, %v7445_v32  ;;  %v2706_v17 = vrot.slane %v2705_v26, 4  ;;  %v2731_v24 = vrot.slane %v2730_v18, 1  ;;  %v1550_v58 = vrot.slane %v1549_v43, 2 }
 0x252   : > { %3859 = vmatprep.subr.msk.bf16.mxu1 %vm3858_vm2, %v7445_v32 }
 0x253   : > { %v2707_v36 = vmin.f32 %v2705_v26, %v2706_v17  ;;  %v2732_v63 = vmin.f32 %v2730_v18, %v2731_v24  ;;  %v6731_v17 = vadd.f32 %v1544_v4, %v1543_v42  ;;  %v6733_v24 = vadd.f32 %v1550_v58, %v1549_v43 }
 0x254   : > { %v6749_v43 = vsub.s32 2, %v7408_v12 }
 0x255   : > { %3861 = vmatpush1.bf16.msk.msra.mxu1 %vm3860_vm3, %v7445_v32  ;;  %v2708_v6 = vrot.slane %v2707_v36, 2  ;;  %v6714_v53 = vmin.f32 %v7499_v8, %v2732_v63 }
 0x256   : > { %3863 = vmatprep.subr.msk.bf16.mxu1 %vm3862_vm15, %v7445_v32 }
 0x257   : > { %v2709_v26 = vmin.f32 %v2707_v36, %v2708_v6  ;;  %vm3741_vm12 = vcmp.eq.f32.partialorder %v6714_v53, inf  ;;  %v6737_v6 = vsub.s32 0, %v7408_v12  ;;  %vm2786_vm11 = vcmp.eq.f32.partialorder %v6483_v54, %v6714_v53 }
 0x258   : > { %v2738_v36 = vsel %vm3741_vm12, %v7408_v12, 136  ;;  %vm2758_vm8 = vcmp.eq.f32.partialorder %v6354_v50, %v6714_v53  ;;  %vm2760_vm10 = vcmp.eq.f32.partialorder %v6357_v28, %v6714_v53  ;;  %vm2762_vm13 = vcmp.eq.f32.partialorder %v6371_v48, %v6714_v53  ;;  %v7502_v48 = vld [vmem:[#allocation16_spill] sm:$0xff] }
 0x259   : > { %3865 = vmatpush1.bf16.msk.msra.mxu1 %vm3864_vm4, %v7445_v32  ;;  %v2710_v18 = vrot.slane %v2709_v26, 1  ;;  %v2748_v63 = vrot.slane %v2738_v36, 4  ;;  %vm2764_vm14 = vcmp.eq.f32.partialorder %v6377_v52, %v6714_v53  ;;  %vm2788_vm2 = vcmp.eq.f32.partialorder %v6493_v55, %v6714_v53 }
 0x25a   : > { %3867 = vmatprep.subr.msk.bf16.mxu1 %vm3866_vm0, %v7445_v32  ;;  %v6771_v50 = vsel %vm2786_vm11, %v7368_v16, 136  ;;  %vm2766_vm3 = vcmp.eq.f32.partialorder %v6389_v34, %v6714_v53  ;;  %v2790_v55 = vsel %vm2758_vm8, %v4318_v1, 136  ;;  %v6786_v54 = vsel %vm2788_vm2, %v4375_v21, 136 }
 0x25b   : > { %v2711_v42 = vmin.f32 %v2709_v26, %v2710_v18  ;;  %vm2749_vm7 = vcmp.lt.s32.totalorder %v2738_v36, %v2748_v63  ;;  %v2796_v26 = vsel %vm2764_vm14, %v4347_v37, 136  ;;  %vm2768_vm1 = vcmp.eq.f32.partialorder %v6395_v46, %v6714_v53 }
 0x25c   : > { %v2750_v4 = vsel %vm2749_vm7, %v2738_v36, %v2748_v63  ;;  %v2792_v36 = vsel %vm2760_vm10, %v4337_v7, 136  ;;  %v2794_v63 = vsel %vm2762_vm13, %v4345_v45, 136  ;;  %vm2770_vm15 = vcmp.eq.f32.partialorder %v6409_v3, %v6714_v53 }
 0x25d   : > { %3869 = vmatpush1.bf16.msk.msra.mxu1 %vm3868_vm9, %v7445_v32  ;;  %v2751_v18 = vrot.slane %v2750_v4, 2  ;;  %v6774_v28 = vmin.f32 %v7499_v8, %v2711_v42  ;;  %vm2772_vm4 = vcmp.eq.f32.partialorder %v6415_v30, %v6714_v53  ;;  %vm2774_vm6 = vcmp.eq.f32.partialorder %v6425_v20, %v6714_v53 }
 0x25e   : > { %vm2776_vm5 = vcmp.eq.f32.partialorder %v6431_v38, %v6714_v53  ;;  %vm2778_vm0 = vcmp.eq.f32.partialorder %v6447_v2, %v6714_v53  ;;  %v2798_v34 = vsel %vm2766_vm3, %v4349_v10, 136  ;;  %vm2860_vm9 = vcmp.lt.s32.totalorder %v2790_v55, %v2794_v63 }
 0x25f   : > { %vm2752_vm12 = vcmp.lt.s32.totalorder %v2750_v4, %v2751_v18  ;;  %vm2862_vm7 = vcmp.lt.s32.totalorder %v2792_v36, %v2796_v26  ;;  %vm3740_vm11 = vcmp.eq.f32.partialorder %v6774_v28, inf  ;;  %v2800_v46 = vsel %vm2768_vm1, %v4351_v14, 136 }
 0x260   : > { %2554 = vmatmul.mubr.f32.vlgmr.msra.gmra.mrb[2].mxu1 %v7502_v48  ;;  %v2861_v8 = vsel %vm2860_vm9, %v2790_v55, %v2794_v63  ;;  %v2863_v42 = vsel %vm2862_vm7, %v2792_v36, %v2796_v26  ;;  %v2737_v48 = vsel %vm3740_vm11, %v7408_v12, 136  ;;  %v2753_v52 = vsel %vm2752_vm12, %v2750_v4, %v2751_v18 }
 0x261   : > { %vm2780_vm8 = vcmp.eq.f32.partialorder %v6453_v60, %v6714_v53  ;;  %vm2864_vm10 = vcmp.lt.s32.totalorder %v2861_v8, %v2798_v34  ;;  %vm2866_vm13 = vcmp.lt.s32.totalorder %v2863_v42, %v2800_v46  ;;  %v2802_v9 = vsel %vm2770_vm15, %v4353_v0, 136 }
 0x262   : > { %v2804_v58 = vsel %vm2772_vm4, %v4355_v15, 136  ;;  %v2865_v55 = vsel %vm2864_vm10, %v2861_v8, %v2798_v34  ;;  %v2867_v26 = vsel %vm2866_vm13, %v2863_v42, %v2800_v46  ;;  %vm2782_vm14 = vcmp.eq.f32.partialorder %v6471_v22, %v6714_v53 }
 0x263   : > { %vm2868_vm2 = vcmp.lt.s32.totalorder %v2865_v55, %v2802_v9  ;;  %vm2870_vm3 = vcmp.lt.s32.totalorder %v2867_v26, %v2804_v58  ;;  %v2739_v4 = vrot.slane %v2737_v48, 4  ;;  %v2806_v18 = vsel %vm2774_vm6, %v4359_v59, 136 }
 0x264   : > { %v2808_v3 = vsel %vm2776_vm5, %v4361_v56, 136  ;;  %v2869_v30 = vsel %vm2868_vm2, %v2865_v55, %v2802_v9  ;;  %v2871_v36 = vsel %vm2870_vm3, %v2867_v26, %v2804_v58  ;;  %v2754_v63 = vrot.slane %v2753_v52, 1 }
 0x265   : > { %vm2784_vm1 = vcmp.eq.f32.partialorder %v6477_v29, %v6714_v53  ;;  %vm2872_vm15 = vcmp.lt.s32.totalorder %v2869_v30, %v2806_v18  ;;  %vm2874_vm4 = vcmp.lt.s32.totalorder %v2871_v36, %v2808_v3  ;;  %v2810_v34 = vsel %vm2778_vm0, %v4365_v27, 136 }
 0x266   : > { %v2812_v20 = vsel %vm2780_vm8, %v7357_v5, 136  ;;  %v2873_v38 = vsel %vm2872_vm15, %v2869_v30, %v2806_v18  ;;  %v2875_v46 = vsel %vm2874_vm4, %v2871_v36, %v2808_v3  ;;  %vm2785_vm12 = vcmp.eq.f32.partialorder %v6667_v47, %v6774_v28  ;;  %v7504_v36 = vld [vmem:[#allocation12_spill] sm:$0xff] }
 0x267   : > { %vm2876_vm6 = vcmp.lt.s32.totalorder %v2873_v38, %v2810_v34  ;;  %vm2878_vm5 = vcmp.lt.s32.totalorder %v2875_v46, %v2812_v20  ;;  %vm2740_vm9 = vcmp.lt.s32.totalorder %v2737_v48, %v2739_v4  ;;  %v2814_v9 = vsel %vm2782_vm14, %v7362_v11, 136 }
 0x268   : > { %v2816_v2 = vsel %vm2784_vm1, %v7363_v33, 136  ;;  %v2877_v29 = vsel %vm2876_vm6, %v2873_v38, %v2810_v34  ;;  %v2879_v58 = vsel %vm2878_vm5, %v2875_v46, %v2812_v20  ;;  %vm2755_vm0 = vcmp.lt.s32.totalorder %v2753_v52, %v2754_v63 }
 0x269   : > { %vm2880_vm7 = vcmp.lt.s32.totalorder %v2877_v29, %v2814_v9  ;;  %vm2882_vm11 = vcmp.lt.s32.totalorder %v2879_v58, %v2816_v2  ;;  %vm2757_vm8 = vcmp.eq.f32.partialorder %v6504_v13, %v6774_v28  ;;  %v6843_v42 = vsel %vm2740_vm9, %v2737_v48, %v2739_v4  ;;  %v7503_v13 = vld [vmem:[#allocation21_spill] sm:$0xff] }
 0x26a   : > { %v2881_v60 = vsel %vm2880_vm7, %v2877_v29, %v2814_v9  ;;  %v2883_v8 = vsel %vm2882_vm11, %v2879_v58, %v2816_v2  ;;  %vm2759_vm10 = vcmp.eq.f32.partialorder %v6507_v31, %v6774_v28  ;;  %vm2761_vm2 = vcmp.eq.f32.partialorder %v6513_v35, %v6774_v28  ;;  %v7505_v29 = vld [vmem:[#allocation15_spill] sm:$0xff] }
 0x26b   : > { %vm2884_vm13 = vcmp.lt.s32.totalorder %v2881_v60, %v6771_v50  ;;  %vm2886_vm14 = vcmp.lt.s32.totalorder %v2883_v8, %v6786_v54  ;;  %vm2763_vm3 = vcmp.eq.f32.partialorder %v6519_v23, %v6774_v28  ;;  %v6857_v22 = vsel %vm2785_vm12, %v7368_v16, 136 }
 0x26c   : > { %v6859_v53 = vsel %vm2755_vm0, %v2753_v52, %v2754_v63  ;;  %v2885_v31 = vsel %vm2884_vm13, %v2881_v60, %v6771_v50  ;;  %v2887_v48 = vsel %vm2886_vm14, %v2883_v8, %v6786_v54  ;;  %v2742_v55 = vrot.slane %v6843_v42, 2 }
 0x26d   : > { %vm2888_vm1 = vcmp.lt.s32.totalorder %v2885_v31, %v2887_v48  ;;  %vm2765_vm15 = vcmp.eq.f32.partialorder %v6541_v44, %v6774_v28  ;;  %v2789_v35 = vsel %vm2757_vm8, %v4318_v1, 136  ;;  %v2791_v23 = vsel %vm2759_vm10, %v4337_v7, 136 }
 0x26e   : > { %v2889_v47 = vsel %vm2888_vm1, %v2885_v31, %v2887_v48  ;;  %v2793_v52 = vsel %vm2761_vm2, %v4345_v45, 136  ;;  %v2795_v50 = vsel %vm2763_vm3, %v4347_v37, 136  ;;  %vm2767_vm4 = vcmp.eq.f32.partialorder %v6547_v62, %v6774_v28 }
 0x26f   : > { %v2890_v26 = vrot.slane %v2889_v47, 4  ;;  %vm2769_vm12 = vcmp.eq.f32.partialorder %v6567_v57, %v6774_v28  ;;  %vm2771_vm6 = vcmp.eq.f32.partialorder %v6573_v39, %v6774_v28  ;;  %vm2787_vm5 = vcmp.eq.f32.partialorder %v6673_v19, %v6774_v28  ;;  %v7506_v19 = vld [vmem:[#allocation32_spill] sm:$0xff] }
 0x270   : > { %vm2773_vm9 = vcmp.eq.f32.partialorder %v6597_v40, %v6774_v28  ;;  %vm2775_vm0 = vcmp.eq.f32.partialorder %v6603_v61, %v6774_v28  ;;  %vm2777_vm7 = vcmp.eq.f32.partialorder %v6621_v49, %v6774_v28  ;;  %vm2779_vm11 = vcmp.eq.f32.partialorder %v7503_v13, %v6774_v28 }
 0x271   : > { %vm2891_vm8 = vcmp.lt.s32.totalorder %v2889_v47, %v2890_v26  ;;  %v2797_v62 = vsel %vm2765_vm15, %v4349_v10, 136  ;;  %vm2821_vm10 = vcmp.lt.s32.totalorder %v2789_v35, %v2793_v52  ;;  %vm2823_vm13 = vcmp.lt.s32.totalorder %v2791_v23, %v2795_v50 }
 0x272   : > { %v2892_v54 = vsel %vm2891_vm8, %v2889_v47, %v2890_v26  ;;  %v2799_v4 = vsel %vm2767_vm4, %v4351_v14, 136  ;;  %v2822_v18 = vsel %vm2821_vm10, %v2789_v35, %v2793_v52  ;;  %v2824_v3 = vsel %vm2823_vm13, %v2791_v23, %v2795_v50 }
 0x273   : > { %v2893_v30 = vrot.slane %v2892_v54, 2  ;;  %vm2781_vm14 = vcmp.eq.f32.partialorder %v7504_v36, %v6774_v28  ;;  %vm2825_vm2 = vcmp.lt.s32.totalorder %v2822_v18, %v2797_v62  ;;  %vm2827_vm3 = vcmp.lt.s32.totalorder %v2824_v3, %v2799_v4 }
 0x274   : > { %v2801_v63 = vsel %vm2769_vm12, %v4353_v0, 136  ;;  %v2803_v44 = vsel %vm2771_vm6, %v4355_v15, 136  ;;  %v2826_v34 = vsel %vm2825_vm2, %v2822_v18, %v2797_v62  ;;  %v2828_v20 = vsel %vm2827_vm3, %v2824_v3, %v2799_v4 }
 0x275   : > { %vm2894_vm1 = vcmp.lt.s32.totalorder %v2892_v54, %v2893_v30  ;;  %v2805_v38 = vsel %vm2773_vm9, %v4359_v59, 136  ;;  %vm2829_vm15 = vcmp.lt.s32.totalorder %v2826_v34, %v2801_v63  ;;  %vm2831_vm4 = vcmp.lt.s32.totalorder %v2828_v20, %v2803_v44 }
 0x276   : > { %vm1076_vm8 = vcmp.eq.s32.totalorder %v7408_v12, 0  ;;  %v2895_v46 = vsel %vm2894_vm1, %v2892_v54, %v2893_v30  ;;  %v2807_v57 = vsel %vm2775_vm0, %v4361_v56, 136  ;;  %v2830_v39 = vsel %vm2829_vm15, %v2826_v34, %v2801_v63 }
 0x277   : > { %v2832_v9 = vsel %vm2831_vm4, %v2828_v20, %v2803_v44  ;;  %v2896_v2 = vrot.slane %v2895_v46, 1  ;;  %vm2783_vm12 = vcmp.eq.f32.partialorder %v7505_v29, %v6774_v28  ;;  %vm2833_vm6 = vcmp.lt.s32.totalorder %v2830_v39, %v2805_v38 }
 0x278   : > { %vm2835_vm10 = vcmp.lt.s32.totalorder %v2832_v9, %v2807_v57  ;;  %v2809_v40 = vsel %vm2777_vm7, %v4365_v27, 136  ;;  %v2811_v58 = vsel %vm2779_vm11, %v7357_v5, 136  ;;  %v2834_v61 = vsel %vm2833_vm6, %v2830_v39, %v2805_v38 }
 0x279   : > { %v2836_v60 = vsel %vm2835_vm10, %v2832_v9, %v2807_v57  ;;  %vm2897_vm9 = vcmp.lt.s32.totalorder %v2895_v46, %v2896_v2  ;;  %v2813_v8 = vsel %vm2781_vm14, %v7362_v11, 136  ;;  %vm2837_vm0 = vcmp.lt.s32.totalorder %v2834_v61, %v2809_v40 }
 0x27a   : > { %vm2839_vm13 = vcmp.lt.s32.totalorder %v2836_v60, %v2811_v58  ;;  %v2898_v31 = vsel %vm2897_vm9, %v2895_v46, %v2896_v2  ;;  %v2815_v48 = vsel %vm2783_vm12, %v7363_v33, 136  ;;  %v2838_v49 = vsel %vm2837_vm0, %v2834_v61, %v2809_v40 }
 0x27b   : > { %v2840_v35 = vsel %vm2839_vm13, %v2836_v60, %v2811_v58  ;;  %v2819_v47 = vsel %vm2787_vm5, %v4375_v21, 136  ;;  %vm2901_vm7 = vcmp.lt.s32.totalorder %v6859_v53, %v2898_v31  ;;  %vm2841_vm11 = vcmp.lt.s32.totalorder %v2838_v49, %v2813_v8 }
 0x27c   : > { %vm2843_vm2 = vcmp.lt.s32.totalorder %v2840_v35, %v2815_v48  ;;  %v6934_v23 = vsel %vm2901_vm7, %v6859_v53, %v2898_v31  ;;  %vm2743_vm14 = vcmp.lt.s32.totalorder %v6843_v42, %v2742_v55  ;;  %v2842_v52 = vsel %vm2841_vm11, %v2838_v49, %v2813_v8 }
 0x27d   : > { %v2844_v50 = vsel %vm2843_vm2, %v2840_v35, %v2815_v48  ;;  %vm2906_vm3 = vcmp.eq.s32.totalorder %v4318_v1, %v6934_v23  ;;  %vm2908_vm1 = vcmp.eq.s32.totalorder %v4337_v7, %v6934_v23  ;;  %vm2845_vm5 = vcmp.lt.s32.totalorder %v2842_v52, %v6857_v22 }
 0x27e   : > { %vm2847_vm15 = vcmp.lt.s32.totalorder %v2844_v50, %v2819_v47  ;;  %v1086_v28 = vrot.slane %v7506_v19, %v6737_v6  ;;  %v1096_v53 = vrot.slane %v7506_v19, %v6740_v41  ;;  %vm3870_vm4 = vmpackc.low %vm2908_vm1, %vm2906_vm3  ;;  %v2846_v26 = vsel %vm2845_vm5, %v2842_v52, %v6857_v22 }
 0x27f   : > { %v2848_v13 = vsel %vm2847_vm15, %v2844_v50, %v2819_v47  ;;  %3871 = vmatprep.subr.msk.bf16.mxu0 %vm3870_vm4, %v7445_v32  ;;  %v2744_v62 = vsel %vm2743_vm14, %v6843_v42, %v2742_v55  ;;  %v7507_v18 = vrot.slane %v6731_v17, 1  ;;  %v7508_v30 = vrot.slane %v6733_v24, 1 }
 0x280   : > { %vm2849_vm12 = vcmp.lt.s32.totalorder %v2846_v26, %v2848_v13  ;;  %v7509_v22 = vrot.slane %v6315_v51, %v6737_v6  ;;  %v7510_v44 = vrot.slane %v6315_v51, %v6740_v41  ;;  %v7511_v55 = vrot.slane %v6315_v51, %v6749_v43 }
 0x281   : > { %v2850_v54 = vsel %vm2849_vm12, %v2846_v26, %v2848_v13  ;;  %v1547_v3 = vadd.f32 %v7507_v18, %v6731_v17  ;;  %v1553_v36 = vadd.f32 %v7508_v30, %v6733_v24  ;;  %v1088_v20 = vsel %vm1076_vm8, %v1086_v28, 0.0 }
 0x282   : > { %v1087_v63 = vsel %vm1076_vm8, %v7509_v22, 0.0  ;;  %v1097_v42 = vsel %vm1076_vm8, %v7510_v44, 0.0  ;;  %v1107_v17 = vsel %vm1076_vm8, %v7511_v55, 0.0  ;;  %v2851_v34 = vrot.slane %v2850_v54, 4 }
 0x283   : > { %v1098_v38 = vsel %vm1076_vm8, %v1096_v53, 0.0  ;;  %v1106_v46 = vrot.slane %v7506_v19, %v6749_v43  ;;  %v2745_v39 = vrot.slane %v2744_v62, 1  ;;  %vm1588_vm10 = vcmp.eq.s32.totalorder %v7408_v12, 1 }
 0x284   : > { %vm2852_vm6 = vcmp.lt.s32.totalorder %v2850_v54, %v2851_v34  ;;  %vm2910_vm7 = vcmp.eq.s32.totalorder %v4345_v45, %v6934_v23  ;;  %vm2912_vm11 = vcmp.eq.s32.totalorder %v4347_v37, %v6934_v23  ;;  %vm2914_vm4 = vcmp.eq.s32.totalorder %v4349_v10, %v6934_v23 }
 0x285   : > { %v1531_v4 = vpop.f32.mrb[0].mxu1  ;;  %v2853_v9 = vsel %vm2852_vm6, %v2850_v54, %v2851_v34  ;;  %v1108_v31 = vsel %vm1076_vm8, %v1106_v46, 0.0  ;;  %vm2746_vm8 = vcmp.lt.s32.totalorder %v2744_v62, %v2745_v39  ;;  %vm3874_vm1 = vmpackc.low %vm2912_vm11, %vm2910_vm7  ;;  %vm2916_vm12 = vcmp.eq.s32.totalorder %v4351_v14, %v6934_v23 }
 0x286   : > { %v1533_v24 = vpop.f32.mrb[1].mxu1  ;;  %v1554_v57 = vadd.f32 %v1547_v3, %v1531_v4  ;;  %v2854_v58 = vrot.slane %v2853_v9, 2  ;;  %v2747_v53 = vsel %vm2746_vm8, %v2744_v62, %v2745_v39  ;;  %v7515_v39 = vld [vmem:[#allocation19_spill] sm:$0xff] }
 0x287   : > { %v1555_v51 = vadd.f32 %v1553_v36, %v1533_v24 }
 0x288   : > { %v1594_v2 = vrot.slane %v1554_v57, %v6737_v6  ;;  %v1604_v29 = vrot.slane %v1554_v57, %v6740_v41  ;;  %v1614_v40 = vrot.slane %v1554_v57, %v6749_v43  ;;  %vm2855_vm9 = vcmp.lt.s32.totalorder %v2853_v9, %v2854_v58 }
 0x289   : > { %v1598_v61 = vrot.slane %v1555_v51, %v6737_v6  ;;  %v1608_v60 = vrot.slane %v1555_v51, %v6740_v41  ;;  %v1618_v8 = vrot.slane %v1555_v51, %v6749_v43  ;;  %v2856_v19 = vsel %vm2855_vm9, %v2853_v9, %v2854_v58 }
 0x28a   : > { %v6991_v48 = vsel %vm1588_vm10, %v1594_v2, %v1087_v63  ;;  %v6995_v49 = vsel %vm1588_vm10, %v1604_v29, %v1097_v42  ;;  %v6999_v35 = vsel %vm1588_vm10, %v1614_v40, %v1107_v17  ;;  %v2857_v28 = vrot.slane %v2856_v19, 1 }
 0x28b   : > { %v7003_v47 = vsel %vm1588_vm10, %v1598_v61, %v1088_v20  ;;  %v7007_v52 = vsel %vm1588_vm10, %v1608_v60, %v1098_v38  ;;  %v7011_v50 = vsel %vm1588_vm10, %v1618_v8, %v1108_v31  ;;  %vm3878_vm10 = vmpackc.low %vm2916_vm12, %vm2914_vm4 }
 0x28c   : > { %vm2858_vm0 = vcmp.lt.s32.totalorder %v2856_v19, %v2857_v28 }
 0x28d   : > { %v2859_v26 = vsel %vm2858_vm0, %v2856_v19, %v2857_v28  ;;  %vm2918_vm0 = vcmp.eq.s32.totalorder %v4353_v0, %v6934_v23 }
 0x28e   : > { %vm2899_vm13 = vcmp.lt.s32.totalorder %v2747_v53, %v2859_v26 }
 0x28f   : > { %v7013_v13 = vsel %vm2899_vm13, %v2747_v53, %v2859_v26  ;;  %vm2920_vm13 = vcmp.eq.s32.totalorder %v4355_v15, %v6934_v23 }
 0x290   : > { %vm2905_vm2 = vcmp.eq.s32.totalorder %v4318_v1, %v7013_v13  ;;  %vm2907_vm14 = vcmp.eq.s32.totalorder %v4337_v7, %v7013_v13  ;;  %vm2909_vm5 = vcmp.eq.s32.totalorder %v4345_v45, %v7013_v13  ;;  %vm2911_vm15 = vcmp.eq.s32.totalorder %v4347_v37, %v7013_v13  ;;  %vm3882_vm11 = vmpackc.low %vm2920_vm13, %vm2918_vm0  ;;  %v3949_v1 = vld [vmem:[%s4940_s20] sm:$0x7]  ;;  %v7512_v7 = vld [vmem:[#allocation23_spill] sm:$0xff] }
 0x291   : > { %vm3872_vm3 = vmpackc.low %vm2907_vm14, %vm2905_vm2  ;;  %vm2913_vm9 = vcmp.eq.s32.totalorder %v4349_v10, %v7013_v13  ;;  %vm2915_vm8 = vcmp.eq.s32.totalorder %v4351_v14, %v7013_v13  ;;  %vm2917_vm2 = vcmp.eq.s32.totalorder %v4353_v0, %v7013_v13  ;;  %vm2919_vm14 = vcmp.eq.s32.totalorder %v4355_v15, %v7013_v13  ;;  %v7513_v45 = vld [vmem:[#allocation7_spill] sm:$0xff] }
 0x292   : > { %3873 = vmatpush1.bf16.msk.msra.mxu0 %vm3872_vm3, %v7445_v32  ;;  %vm3876_vm6 = vmpackc.low %vm2911_vm15, %vm2909_vm5  ;;  %vm2922_vm3 = vcmp.eq.s32.totalorder %v4359_v59, %v6934_v23  ;;  %vm2921_vm4 = vcmp.eq.s32.totalorder %v4359_v59, %v7013_v13  ;;  %vm2923_vm12 = vcmp.eq.s32.totalorder %v4361_v56, %v7013_v13  ;;  %vm2925_vm0 = vcmp.eq.s32.totalorder %v4365_v27, %v7013_v13 }
 0x293   : > { %3875 = vmatprep.subr.msk.bf16.mxu0 %vm3874_vm1, %v7445_v32  ;;  %vm3880_vm7 = vmpackc.low %vm2915_vm8, %vm2913_vm9  ;;  %vm2924_vm1 = vcmp.eq.s32.totalorder %v4361_v56, %v6934_v23  ;;  %vm2927_vm13 = vcmp.eq.s32.totalorder %v7357_v5, %v7013_v13  ;;  %v7514_v37 = vmov 0.0  }
 0x294   : > { %vm3884_vm5 = vmpackc.low %vm2919_vm14, %vm2917_vm2 }
 0x295   : > { %vm3886_vm15 = vmpackc.low %vm2924_vm1, %vm2922_vm3  ;;  %vm2929_vm3 = vcmp.eq.s32.totalorder %v7362_v11, %v7013_v13  ;;  %vm2931_vm1 = vcmp.eq.s32.totalorder %v7363_v33, %v7013_v13 }
 0x296   : > { %3877 = vmatpush1.bf16.msk.msra.mxu0 %vm3876_vm6, %v7445_v32  ;;  %vm2926_vm6 = vcmp.eq.s32.totalorder %v4365_v27, %v6934_v23  ;;  %vm3888_vm9 = vmpackc.low %vm2923_vm12, %vm2921_vm4 }
 0x297   : > { %3879 = vmatprep.subr.msk.bf16.mxu0 %vm3878_vm10, %v7445_v32  ;;  %vm2928_vm10 = vcmp.eq.s32.totalorder %v7357_v5, %v6934_v23  ;;  %vm3892_vm2 = vmpackc.low %vm2927_vm13, %vm2925_vm0  ;;  %vm1880_vm0 = vcmp.eq.s32.totalorder %v7408_v12, %v7513_v45  ;;  %vm2100_vm13 = vcmp.eq.s32.totalorder %v7408_v12, 2 }
 0x298   : > { %vm3890_vm8 = vmpackc.low %vm2928_vm10, %vm2926_vm6  ;;  %vm2933_vm6 = vcmp.eq.s32.totalorder %v7368_v16, %v7013_v13  ;;  %vm2935_vm10 = vcmp.eq.s32.totalorder %v4375_v21, %v7013_v13  ;;  %v3593_v14 = vsel %vm1880_vm0, 1.0, %v7514_v37 }
 0x299   : > { %vm3896_vm4 = vmpackc.low %vm2931_vm1, %vm2929_vm3  ;;  %v2053_v15 = vmul.f32 0.0, %v3593_v14  ;;  %vm2904_vm3 = vcmp.eq.s32.totalorder %v7408_v12, %v6934_v23  ;;  %vm3124_vm1 = vcmp.eq.s32.totalorder %v7408_v12, 4 }
 0x29a   : > { %3881 = vmatpush1.bf16.msk.msra.mxu0 %vm3880_vm7, %v7445_v32  ;;  %vm2930_vm7 = vcmp.eq.s32.totalorder %v7362_v11, %v6934_v23 }
 0x29b   : > { %3883 = vmatprep.subr.msk.bf16.mxu0 %vm3882_vm11, %v7445_v32  ;;  %vm2932_vm11 = vcmp.eq.s32.totalorder %v7363_v33, %v6934_v23  ;;  %v2060_v56 = vrot.slane %v2053_v15, 4 }
 0x29c   : > { %vm3894_vm14 = vmpackc.low %vm2932_vm11, %vm2930_vm7  ;;  %vm2391_vm7 = vcmp.eq.s32.totalorder %v7408_v12, %v6485_v25  ;;  %vm2392_vm11 = vcmp.eq.s32.totalorder %v7408_v12, %v7515_v39 }
 0x29d   : > { %v3658_v51 = vsel %vm2391_vm7, 1.0, %v7514_v37  ;;  %v3659_v9 = vsel %vm2392_vm11, 1.0, %v7514_v37 }
 0x29e   : > { %3885 = vmatpush1.bf16.msk.msra.mxu0 %vm3884_vm5, %v7445_v32  ;;  %vm2934_vm5 = vcmp.eq.s32.totalorder %v7368_v16, %v6934_v23  ;;  %v2564_v2 = vmul.f32 0.0, %v3658_v51  ;;  %v2565_v29 = vmul.f32 0.0, %v3659_v9 }
 0x29f   : > { %3887 = vmatprep.subr.msk.bf16.mxu0 %vm3886_vm15, %v7445_v32  ;;  %vm2936_vm15 = vcmp.eq.s32.totalorder %v4375_v21, %v6934_v23  ;;  %v2061_v21 = vadd.f32 %v2060_v56, %v2053_v15 }
 0x2a0   : > { %vm3898_vm12 = vmpackc.low %vm2936_vm15, %vm2934_vm5  ;;  %v2566_v40 = vrot.slane %v2564_v2, 4  ;;  %v2572_v58 = vrot.slane %v2565_v29, 4 }
 0x2a1   : > { %v2062_v11 = vrot.slane %v2061_v21, 2 }
 0x2a2   : > { %3889 = vmatpush1.bf16.msk.msra.mxu0 %vm3888_vm9, %v7445_v32  ;;  %vm3900_vm9 = vmpackc.low %vm2935_vm10, %vm2933_vm6  ;;  %v2567_v61 = vadd.f32 %v2566_v40, %v2564_v2  ;;  %v2573_v60 = vadd.f32 %v2572_v58, %v2565_v29 }
 0x2a3   : > { %3891 = vmatprep.subr.msk.bf16.mxu0 %vm3890_vm8, %v7445_v32  ;;  %vm1879_vm8 = vcmp.eq.s32.totalorder %v7408_v12, %v7512_v7  ;;  %v2063_v16 = vadd.f32 %v2062_v11, %v2061_v21  ;;  %v3725_v11 = vsel %vm2904_vm3, 1.0, %v7514_v37 }
 0x2a4   : > { %v3592_v10 = vsel %vm1879_vm8, 1.0, %v7514_v37  ;;  %v2568_v8 = vrot.slane %v2567_v61, 2  ;;  %v2574_v31 = vrot.slane %v2573_v60, 2 }
 0x2a5   : > { %v2052_v0 = vmul.f32 0.0, %v3592_v10  ;;  %v2064_v62 = vrot.slane %v2063_v16, 1 }
 0x2a6   : > { %3893 = vmatpush1.bf16.msk.msra.mxu0 %vm3892_vm2, %v7445_v32  ;;  %vm2612_vm2 = vcmp.eq.s32.totalorder %v7408_v12, 3 }
 0x2a7   : > { %3895 = vmatprep.subr.msk.bf16.mxu0 %vm3894_vm14, %v7445_v32  ;;  %v2054_v59 = vrot.slane %v2052_v0, 4  ;;  %v2065_v18 = vadd.f32 %v2064_v62, %v2063_v16  ;;  %vm2903_vm14 = vcmp.eq.s32.totalorder %v7408_v12, %v7013_v13  ;;  %v3077_v16 = vmul.f32 0.0, %v3725_v11 }
 0x2a9   : > { %v2055_v27 = vadd.f32 %v2054_v59, %v2052_v0  ;;  %v3084_v62 = vrot.slane %v3077_v16, 4 }
 0x2aa   : > { %3897 = vmatpush1.bf16.msk.msra.mxu0 %vm3896_vm4, %v7445_v32 }
 0x2ab   : > { %3899 = vmatprep.subr.msk.bf16.mxu0 %vm3898_vm12, %v7445_v32  ;;  %v2056_v5 = vrot.slane %v2055_v27, 2 }
 0x2ad   : > { %v2057_v33 = vadd.f32 %v2056_v5, %v2055_v27  ;;  %v3724_v5 = vsel %vm2903_vm14, 1.0, %v7514_v37 }
 0x2ae   : > { %3901 = vmatpush1.bf16.msk.msra.mxu0 %vm3900_vm9, %v7445_v32 }
 0x2af   : > { %v2058_v32 = vrot.slane %v2057_v33, 1 }
 0x2b1   : > { %3066 = vmatmul.mubr.f32.vlgmr.msra.gmra.mrb[4].mxu0 %v3949_v1  ;;  %v2059_v54 = vadd.f32 %v2058_v32, %v2057_v33  ;;  %v3076_v33 = vmul.f32 0.0, %v3724_v5 }
 0x2b3   : > { %v3078_v32 = vrot.slane %v3076_v33, 4 }
 0x2da   : > { %v2043_v4 = vpop.f32.mrb[2].mxu0 }
 0x2db   : > { %v2066_v3 = vadd.f32 %v2059_v54, %v2043_v4  ;;  %v2045_v30 = vpop.f32.mrb[3].mxu0  ;;  %v3079_v54 = vadd.f32 %v3078_v32, %v3076_v33  ;;  %v3085_v4 = vadd.f32 %v3084_v62, %v3077_v16 }
 0x2dc   : > { %v2067_v36 = vadd.f32 %v2065_v18, %v2045_v30 }
 0x2dd   : > { %v2106_v22 = vrot.slane %v2066_v3, %v6737_v6  ;;  %v2116_v63 = vrot.slane %v2066_v3, %v6740_v41  ;;  %v2126_v44 = vrot.slane %v2066_v3, %v6749_v43  ;;  %v3080_v18 = vrot.slane %v3079_v54, 2 }
 0x2de   : > { %v2110_v42 = vrot.slane %v2067_v36, %v6737_v6  ;;  %v2120_v55 = vrot.slane %v2067_v36, %v6740_v41  ;;  %v2130_v17 = vrot.slane %v2067_v36, %v6749_v43  ;;  %v3086_v3 = vrot.slane %v3085_v4, 2 }
 0x2df   : > { %v2111_v34 = vsel %vm2100_vm13, %v2106_v22, %v6991_v48  ;;  %v2121_v24 = vsel %vm2100_vm13, %v2116_v63, %v6995_v49  ;;  %v2131_v20 = vsel %vm2100_vm13, %v2126_v44, %v6999_v35  ;;  %v2569_v48 = vadd.f32 %v2568_v8, %v2567_v61 }
 0x2e0   : > { %v2112_v38 = vsel %vm2100_vm13, %v2110_v42, %v7003_v47  ;;  %v2122_v46 = vsel %vm2100_vm13, %v2120_v55, %v7007_v52  ;;  %v2132_v57 = vsel %vm2100_vm13, %v2130_v17, %v7011_v50  ;;  %v2575_v49 = vadd.f32 %v2574_v31, %v2573_v60 }
 0x2e1   : > { %v2570_v35 = vrot.slane %v2569_v48, 1  ;;  %v3081_v30 = vadd.f32 %v3080_v18, %v3079_v54  ;;  %v3087_v36 = vadd.f32 %v3086_v3, %v3085_v4 }
 0x2e2   : > { %v2576_v47 = vrot.slane %v2575_v49, 1 }
 0x2e3   : > { %v2571_v25 = vadd.f32 %v2570_v35, %v2569_v48  ;;  %v3082_v22 = vrot.slane %v3081_v30, 1  ;;  %v3088_v63 = vrot.slane %v3087_v36, 1 }
 0x2e4   : > { %v2577_v50 = vadd.f32 %v2576_v47, %v2575_v49 }
 0x2e5   : > { %v3083_v13 = vadd.f32 %v3082_v22, %v3081_v30  ;;  %v3089_v42 = vadd.f32 %v3088_v63, %v3087_v36 }
 0x333   : > { %v2555_v52 = vpop.f32.mrb[2].mxu1 }
 0x334   : > { %v2578_v19 = vadd.f32 %v2571_v25, %v2555_v52  ;;  %v2557_v28 = vpop.f32.mrb[3].mxu1 }
 0x335   : > { %v2579_v53 = vadd.f32 %v2577_v50, %v2557_v28  ;;  %v3979_v50 = vmov 1966171168  }
 0x336   : > { %v2618_v26 = vrot.slane %v2578_v19, %v6737_v6  ;;  %v2628_v1 = vrot.slane %v2578_v19, %v6740_v41  ;;  %v2638_v7 = vrot.slane %v2578_v19, %v6749_v43  ;;  %v3190_v19 = vunpack.c.l.s4 %v3979_v50 }
 0x337   : > { %v2622_v45 = vrot.slane %v2579_v53, %v6737_v6  ;;  %v2632_v10 = vrot.slane %v2579_v53, %v6740_v41  ;;  %v2642_v14 = vrot.slane %v2579_v53, %v6749_v43 }
 0x338   : > { %v2623_v0 = vsel %vm2612_vm2, %v2618_v26, %v2111_v34  ;;  %v2633_v15 = vsel %vm2612_vm2, %v2628_v1, %v2121_v24  ;;  %v2643_v59 = vsel %vm2612_vm2, %v2638_v7, %v2131_v20 }
 0x339   : > { %v2624_v56 = vsel %vm2612_vm2, %v2622_v45, %v2112_v38  ;;  %v2634_v27 = vsel %vm2612_vm2, %v2632_v10, %v2122_v46  ;;  %v2644_v21 = vsel %vm2612_vm2, %v2642_v14, %v2132_v57 }
 0x384   : > { %v3067_v44 = vpop.f32.mrb[4].mxu0 }
 0x385   : > { %v3090_v23 = vadd.f32 %v3083_v13, %v3067_v44  ;;  %v3069_v55 = vpop.f32.mrb[5].mxu0 }
 0x386   : > { %v3091_v37 = vadd.f32 %v3089_v42, %v3069_v55 }
 0x387   : > { %v3130_v17 = vrot.slane %v3090_v23, %v6737_v6  ;;  %v3140_v34 = vrot.slane %v3090_v23, %v6740_v41  ;;  %v3150_v24 = vrot.slane %v3090_v23, %v6749_v43 }
 0x388   : > { %v3134_v20 = vrot.slane %v3091_v37, %v6737_v6  ;;  %v3144_v38 = vrot.slane %v3091_v37, %v6740_v41  ;;  %v3154_v46 = vrot.slane %v3091_v37, %v6749_v43  ;;  %v7516_v37 = vlaneseq }
 0x389   : > { %v3135_v57 = vsel %vm3124_vm1, %v3130_v17, %v2623_v0  ;;  %v3145_v39 = vsel %vm3124_vm1, %v3140_v34, %v2633_v15  ;;  %v3155_v51 = vsel %vm3124_vm1, %v3150_v24, %v2643_v59 }
 0x38a   : > { %v3172_v9 = vrot.slane %v3135_v57, 4  ;;  %v3209_v2 = vrot.slane %v3145_v39, 4  ;;  %v3243_v29 = vrot.slane %v3155_v51, 4  ;;  %v3136_v40 = vsel %vm3124_vm1, %v3134_v20, %v2624_v56 }
 0x38b   : > { %v3146_v41 = vsel %vm3124_vm1, %v3144_v38, %v2634_v27  ;;  %v3156_v6 = vsel %vm3124_vm1, %v3154_v46, %v2644_v21  ;;  %v3178_v43 = vrot.slane %v3136_v40, 4  ;;  %v3191_v27 = vunpack.c.0.s8 %v3190_v19 }
 0x38c   : > { %v3173_v58 = vadd.f32 %v3172_v9, %v3135_v57  ;;  %v3210_v61 = vadd.f32 %v3209_v2, %v3145_v39  ;;  %v3244_v60 = vadd.f32 %v3243_v29, %v3155_v51  ;;  %v3215_v8 = vrot.slane %v3146_v41, 4 }
 0x38d   : > { %v3179_v31 = vadd.f32 %v3178_v43, %v3136_v40  ;;  %v3249_v48 = vrot.slane %v3156_v6, 4  ;;  %v3194_v36 = vsub.s32 %v3191_v27, %v7408_v12  ;;  %vm3206_vm5 = vcmp.lt.s32.totalorder %v7516_v37, 256 }
 0x38e   : > { %v3174_v49 = vrot.slane %v3173_v58, 2  ;;  %v3211_v35 = vrot.slane %v3210_v61, 2  ;;  %v3245_v47 = vrot.slane %v3244_v60, 2  ;;  %v3216_v25 = vadd.f32 %v3215_v8, %v3146_v41 }
 0x38f   : > { %v3180_v52 = vrot.slane %v3179_v31, 2  ;;  %v3250_v28 = vadd.f32 %v3249_v48, %v3156_v6 }
 0x390   : > { %v3175_v53 = vadd.f32 %v3174_v49, %v3173_v58  ;;  %v3212_v26 = vadd.f32 %v3211_v35, %v3210_v61  ;;  %v3246_v1 = vadd.f32 %v3245_v47, %v3244_v60  ;;  %v3217_v7 = vrot.slane %v3216_v25, 2 }
 0x391   : > { %v3181_v45 = vadd.f32 %v3180_v52, %v3179_v31  ;;  %v3251_v10 = vrot.slane %v3250_v28, 2 }
 0x392   : > { %v3176_v14 = vrot.slane %v3175_v53, 1  ;;  %v3213_v0 = vrot.slane %v3212_v26, 1  ;;  %v3247_v15 = vrot.slane %v3246_v1, 1  ;;  %v3218_v59 = vadd.f32 %v3217_v7, %v3216_v25 }
 0x393   : > { %v3182_v56 = vrot.slane %v3181_v45, 1  ;;  %v3252_v21 = vadd.f32 %v3251_v10, %v3250_v28 }
 0x394   : > { %v3177_v5 = vadd.f32 %v3176_v14, %v3175_v53  ;;  %v3214_v11 = vadd.f32 %v3213_v0, %v3212_v26  ;;  %v3248_v33 = vadd.f32 %v3247_v15, %v3246_v1  ;;  %v3219_v16 = vrot.slane %v3218_v59, 1 }
 0x395   : > { %v3183_v32 = vadd.f32 %v3182_v56, %v3181_v45  ;;  %v3253_v62 = vrot.slane %v3252_v21, 1 }
 0x396   : > { %v3184_v54 = vmul.f32 0.2, %v3177_v5  ;;  %v3221_v4 = vmul.f32 0.2, %v3214_v11  ;;  %v3220_v18 = vadd.f32 %v3219_v16, %v3218_v59  ;;  %v3255_v3 = vmul.f32 0.2, %v3248_v33 }
 0x397   : > { %v3185_v30 = vmul.f32 0.2, %v3183_v32  ;;  %v3254_v22 = vadd.f32 %v3253_v62, %v3252_v21 }
 0x398   : > { %v3222_v63 = vmul.f32 0.2, %v3220_v18 }
 0x399   : > { %v3188_v13 = vcombine.low %v3184_v54, %v3185_v30  ;;  %v3256_v44 = vmul.f32 0.2, %v3254_v22 }
 0x39a   : > { %v3225_v42 = vcombine.low %v3221_v4, %v3222_v63 }
 0x39b   : > { %v3195_v23 = vrot.slane %v3188_v13, %v3194_v36  ;;  %v3259_v55 = vcombine.low %v3255_v3, %v3256_v44 }
 0x39c   : > { %v3232_v17 = vrot.slane %v3225_v42, %v3194_v36 }
 0x39d   : > { %v3202_v34 = vrot.slane %v3195_v23, %v3194_v36  ;;  %v3266_v24 = vrot.slane %v3259_v55, %v3194_v36 }
 0x39e   : > { %v3239_v20 = vrot.slane %v3232_v17, %v3194_v36 }
 0x39f   : > { %3208 = vst.msk [vmem:[%s216_s24] ss:$4 sm:$0x3] %vm3206_vm5, %v3202_v34  ;;  %v3273_v12 = vrot.slane %v3266_v24, %v3194_v36 }
 0x3a0   : > { %3726 = vst.msk [vmem:[%s216_s24 + $0x1] ss:$4 sm:$0x3] %vm3206_vm5, %v3239_v20 }
 0x3a1   : > { %3727 = vst.msk [vmem:[%s216_s24 + $0x2] ss:$4 sm:$0x3] %vm3206_vm5, %v3273_v12 }
 0x3a2 PF: > { %s12_s11 = sadd.s32 1, %s3972_s11   ;;  %s7517_s9 = smov %s3968_s10 }
 0x3a3   : > { %p9_p5 = scmp.ge.s32.totalorder %s12_s11, 4   ;;  %s7518_s10 = smov %s7520_s12 }
 0x3a5   :  { %11 = sbr.rel (!%p9_p5) target bundleno = 2 (0x2), region = 75 }

</bundles_post_ra>
